<compile_context>
chip_gen: v7x
topology: tpu7x:2x2x1
jax: 0.10.0
libtpu: 0.0.40
codegen_flags: <defaults>
</compile_context>

<pallas_src>
import math
import functools

import jax
import jax.numpy as jnp
from jax.experimental import pallas as pl
from jax.experimental.pallas import tpu as pltpu


def encoder_layer_kernel(
    xq_ref, xkv_ref,
    wq_ref, bq_ref, wk_ref, bk_ref, wv_ref, bv_ref, wo_ref, bo_ref,
    w1_ref, b1_ref, w2_ref, b2_ref,
    g1_ref, be1_ref, g2_ref, be2_ref,
    out_ref,
    k_scratch, v_scratch,
    *, n_heads: int, head_dim: int,
):
    f32 = jnp.float32
    cd = wq_ref.dtype                      # matmul compute dtype (bf16 or f32)
    exact = jnp.dtype(cd) == jnp.dtype(jnp.float32)

    TQ, D = xq_ref.shape                   # query tile
    S = xkv_ref.shape[0]                   # full sequence (keys/values)
    H, hd = n_heads, head_dim
    qt = pl.program_id(1)

    # --- Project K/V once per batch element, keep resident in VMEM scratch ----
    @pl.when(qt == 0)
    def _():
        xkv = xkv_ref[...].astype(cd)                                   # (S, D)
        k = jnp.dot(xkv, wk_ref[...], preferred_element_type=f32) + bk_ref[...]
        v = jnp.dot(xkv, wv_ref[...], preferred_element_type=f32) + bv_ref[...]
        k_scratch[...] = jnp.transpose(k.reshape(S, H, hd), (1, 0, 2)).astype(cd)
        v_scratch[...] = jnp.transpose(v.reshape(S, H, hd), (1, 0, 2)).astype(cd)

    # --- Multi-head self-attention for this query tile -------------------------
    x = xq_ref[...]                                                     # (TQ, D) f32
    q = jnp.dot(x.astype(cd), wq_ref[...], preferred_element_type=f32) + bq_ref[...]
    q = q * (1.0 / math.sqrt(hd))          # fold 1/sqrt(hd) into q once
    qh = jnp.transpose(q.reshape(TQ, H, hd), (1, 0, 2)).astype(cd)      # (H, TQ, hd)

    # One batched matmul over all heads; contraction on the last dim of both
    # operands (no explicit transpose of K).
    scores = jax.lax.dot_general(
        qh, k_scratch[...],
        dimension_numbers=(((2,), (2,)), ((0,), (0,))),
        preferred_element_type=f32)                                     # (H, TQ, S)

    # Softmax over keys (f32).  TODO(synk): optional src_mask (masked_fill with
    # -inf) not wired; default None path of the PyTorch module.
    m = jnp.max(scores, axis=-1, keepdims=True)
    e = jnp.exp(scores - m)
    denom = jnp.sum(e, axis=-1, keepdims=True)
    if exact:
        p = e / denom
    else:
        p = e * pl.reciprocal(denom, approx=True)

    ctx = jax.lax.dot_general(
        p.astype(cd), v_scratch[...],
        dimension_numbers=(((2,), (1,)), ((0,), (0,))),
        preferred_element_type=f32)                                     # (H, TQ, hd)
    attn = jnp.transpose(ctx, (1, 0, 2)).reshape(TQ, D)                 # lane-dense

    attn_out = (jnp.dot(attn.astype(cd), wo_ref[...], preferred_element_type=f32)
                + bo_ref[...])

    # --- Residual + LayerNorm 1 (f32) ------------------------------------------
    x1 = x + attn_out
    mu1 = jnp.mean(x1, axis=-1, keepdims=True)
    var1 = jnp.mean((x1 - mu1) ** 2, axis=-1, keepdims=True)
    x1n = (x1 - mu1) * jax.lax.rsqrt(var1 + 1e-5) * g1_ref[...] + be1_ref[...]

    # --- Position-wise feed-forward ---------------------------------------------
    h1 = jnp.dot(x1n.astype(cd), w1_ref[...], preferred_element_type=f32) + b1_ref[...]
    h1 = jnp.maximum(h1, 0.0)
    ff = jnp.dot(h1.astype(cd), w2_ref[...], preferred_element_type=f32) + b2_ref[...]

    # --- Residual + LayerNorm 2 (f32) ------------------------------------------
    x2 = x1n + ff
    mu2 = jnp.mean(x2, axis=-1, keepdims=True)
    var2 = jnp.mean((x2 - mu2) ** 2, axis=-1, keepdims=True)
    out = (x2 - mu2) * jax.lax.rsqrt(var2 + 1e-5) * g2_ref[...] + be2_ref[...]

    out_ref[...] = out.astype(out_ref.dtype)


def encoder_layer(src, params, *, n_heads, q_tile=None, use_bf16=True):
    """src: (B, S, D) float32.  params: dict of (in, out)-layout weights (f32)."""
    B, S, D = src.shape
    assert D % n_heads == 0, "d_model must be divisible by n_heads"
    head_dim = D // n_heads
    FF = params["w1"].shape[1]

    if q_tile is None:
        q_tile = S
        for cand in (512, 256, 128):
            if S % cand == 0:
                q_tile = cand
                break
    assert S % q_tile == 0, "q_tile must divide the sequence length"
    num_q_tiles = S // q_tile

    cd = jnp.bfloat16 if use_bf16 else jnp.float32
    # Matmul weights in compute dtype; biases / LayerNorm params stay f32.
    weight_args = (
        params["wq"].astype(cd), params["bq"],
        params["wk"].astype(cd), params["bk"],
        params["wv"].astype(cd), params["bv"],
        params["wo"].astype(cd), params["bo"],
        params["w1"].astype(cd), params["b1"],
        params["w2"].astype(cd), params["b2"],
        params["g1"], params["be1"], params["g2"], params["be2"],
    )

    kernel = functools.partial(encoder_layer_kernel, n_heads=n_heads, head_dim=head_dim)

    # VMEM budget: resident weights (+double-buffer headroom) + per-step activations.
    wbytes = sum(int(w.size) * w.dtype.itemsize for w in weight_args)
    act_bytes = 4 * (2 * S * D + 8 * q_tile * D + 2 * n_heads * q_tile * S
                     + 2 * q_tile * FF + 2 * n_heads * S * head_dim)
    vmem_limit = int(min(100 << 20, max(32 << 20, 2 * wbytes + 2 * act_bytes + (8 << 20))))

    def build(single_buffer_weights):
        def wspec(shape):
            idx = lambda b, qt, _s=shape: tuple(0 for _ in _s)   # never re-fetched
            if single_buffer_weights and hasattr(pl, "Buffered"):
                try:
                    return pl.BlockSpec(shape, idx, pipeline_mode=pl.Buffered(1))
                except TypeError:
                    pass
            return pl.BlockSpec(shape, idx)

        in_specs = [
            # query tile for this grid step (batch dim squeezed away)
            pl.BlockSpec((None, q_tile, D), lambda b, qt: (b, qt, 0)),
            # full sequence of the batch element (for K/V); constant over qt,
            # so it is only DMA'd when b changes.
            pl.BlockSpec((None, S, D), lambda b, qt: (b, 0, 0)),
        ] + [wspec(w.shape) for w in weight_args]

        return pl.pallas_call(
            kernel,
            out_shape=jax.ShapeDtypeStruct((B, S, D), src.dtype),
            grid_spec=pltpu.PrefetchScalarGridSpec(
                num_scalar_prefetch=0,
                grid=(B, num_q_tiles),
                in_specs=in_specs,
                out_specs=pl.BlockSpec((None, q_tile, D), lambda b, qt: (b, qt, 0)),
                scratch_shapes=[
                    pltpu.VMEM((n_heads, S, head_dim), cd),   # K (head-major)
                    pltpu.VMEM((n_heads, S, head_dim), cd),   # V (head-major)
                ],
            ),
            compiler_params=pltpu.CompilerParams(
                dimension_semantics=("parallel", "arbitrary"),
                vmem_limit_bytes=vmem_limit,
            ),
        )

    args = (src, src) + weight_args
    try:
        return build(True)(*args)
    except Exception:
        # Fallback for jax builds that reject single-buffered weight blocks
        # (pl.Buffered(1)); functionally identical, just double-buffers weights.
        return build(False)(*args)


def reference_encoder_layer(src, params, *, n_heads):
    """Pure-JAX reference mirroring the PyTorch forward (dropout = identity)."""
    B, S, D = src.shape
    hd = D // n_heads

    def lin(x, w, b):
        return jnp.einsum("bsd,df->bsf", x, w) + b

    q = lin(src, params["wq"], params["bq"]).reshape(B, S, n_heads, hd).transpose(0, 2, 1, 3)
    k = lin(src, params["wk"], params["bk"]).reshape(B, S, n_heads, hd).transpose(0, 2, 1, 3)
    v = lin(src, params["wv"], params["bv"]).reshape(B, S, n_heads, hd).transpose(0, 2, 1, 3)
    energy = jnp.einsum("bhqd,bhkd->bhqk", q, k) / math.sqrt(hd)
    attn = jax.nn.softmax(energy, axis=-1)
    x = jnp.einsum("bhqk,bhkd->bhqd", attn, v).transpose(0, 2, 1, 3).reshape(B, S, D)
    x = lin(x, params["wo"], params["bo"])

    def layernorm(y, g, b):
        mu = jnp.mean(y, axis=-1, keepdims=True)
        var = jnp.mean((y - mu) ** 2, axis=-1, keepdims=True)
        return (y - mu) / jnp.sqrt(var + 1e-5) * g + b

    x1 = layernorm(src + x, params["g1"], params["be1"])
    ff = lin(jnp.maximum(lin(x1, params["w1"], params["b1"]), 0.0), params["w2"], params["b2"])
    return layernorm(x1 + ff, params["g2"], params["be2"])


if __name__ == "__main__":
    B, S, D, H, FF = 2, 16, 32, 4, 64    # small demo shapes; S=16 with q_tile=8
    key = jax.random.PRNGKey(0)
    keys = jax.random.split(key, 16)

    def init_linear(kw, kb, fan_in, fan_out):
        bound = 1.0 / math.sqrt(fan_in)
        w = jax.random.uniform(kw, (fan_in, fan_out), jnp.float32, -bound, bound)
        b = jax.random.uniform(kb, (1, fan_out), jnp.float32, -bound, bound)
        return w, b

    wq, bq = init_linear(keys[0], keys[1], D, D)
    wk, bk = init_linear(keys[2], keys[3], D, D)
    wv, bv = init_linear(keys[4], keys[5], D, D)
    wo, bo = init_linear(keys[6], keys[7], D, D)
    w1, b1 = init_linear(keys[8], keys[9], D, FF)
    w2, b2 = init_linear(keys[10], keys[11], FF, D)

    params = dict(
        wq=wq, bq=bq, wk=wk, bk=bk, wv=wv, bv=bv, wo=wo, bo=bo,
        w1=w1, b1=b1, w2=w2, b2=b2,
        g1=jnp.ones((1, D), jnp.float32), be1=jnp.zeros((1, D), jnp.float32),
        g2=jnp.ones((1, D), jnp.float32), be2=jnp.zeros((1, D), jnp.float32),
    )

    src = jax.random.normal(keys[12], (B, S, D), jnp.float32)
    ref = reference_encoder_layer(src, params, n_heads=H)

    # Exact (f32 MXU) path: tight semantic check vs. the pure-JAX reference.
    out_f32 = jax.block_until_ready(
        encoder_layer(src, params, n_heads=H, q_tile=8, use_bf16=False))
    assert out_f32.shape == (B, S, D)
    assert jnp.allclose(out_f32, ref, atol=1e-4, rtol=1e-4), "f32 path mismatch vs reference"

    # Optimized (bf16 MXU, f32 accumulation / softmax / LayerNorm) path.
    out_bf16 = jax.block_until_ready(
        encoder_layer(src, params, n_heads=H, q_tile=8, use_bf16=True))
    assert out_bf16.shape == (B, S, D)
    assert jnp.allclose(out_bf16, ref, atol=5e-2, rtol=5e-2), "bf16 path mismatch vs reference"

    print("KERNEL_OK")
</pallas_src>

<mosaic_0001>
module attributes {stable_mosaic.version = 11 : i64} {
  func.func @encoder_layer_kernel(%arg0: i32, %arg1: i32, %arg2: memref<1x8x32xf32, #tpu.memory_space<vmem>>, %arg3: memref<1x16x32xf32, #tpu.memory_space<vmem>>, %arg4: memref<32x32xf32, #tpu.memory_space<vmem>>, %arg5: memref<1x32xf32, #tpu.memory_space<vmem>>, %arg6: memref<32x32xf32, #tpu.memory_space<vmem>>, %arg7: memref<1x32xf32, #tpu.memory_space<vmem>>, %arg8: memref<32x32xf32, #tpu.memory_space<vmem>>, %arg9: memref<1x32xf32, #tpu.memory_space<vmem>>, %arg10: memref<32x32xf32, #tpu.memory_space<vmem>>, %arg11: memref<1x32xf32, #tpu.memory_space<vmem>>, %arg12: memref<32x64xf32, #tpu.memory_space<vmem>>, %arg13: memref<1x64xf32, #tpu.memory_space<vmem>>, %arg14: memref<64x32xf32, #tpu.memory_space<vmem>>, %arg15: memref<1x32xf32, #tpu.memory_space<vmem>>, %arg16: memref<1x32xf32, #tpu.memory_space<vmem>>, %arg17: memref<1x32xf32, #tpu.memory_space<vmem>>, %arg18: memref<1x32xf32, #tpu.memory_space<vmem>>, %arg19: memref<1x32xf32, #tpu.memory_space<vmem>>, %arg20: memref<1x8x32xf32, #tpu.memory_space<vmem>>, %arg21: memref<4x16x8xf32, #tpu.memory_space<vmem>>, %arg22: memref<4x16x8xf32, #tpu.memory_space<vmem>>) attributes {dimension_semantics = [#tpu.dimension_semantics<parallel>, #tpu.dimension_semantics<arbitrary>], iteration_bounds = array<i64: 2, 2>, scalar_prefetch = 0 : i64, scratch_operands = 2 : i64, tpu.core_type = #tpu.core_type<tc>, window_params = [{transform_indices = @transform_0, window_bounds = array<i64: 1, 8, 32>}, {transform_indices = @transform_1, window_bounds = array<i64: 1, 16, 32>}, {pipeline_mode = #tpu.pipeline_mode<synchronous>, transform_indices = @transform_2, window_bounds = array<i64: 32, 32>}, {pipeline_mode = #tpu.pipeline_mode<synchronous>, transform_indices = @transform_3, window_bounds = array<i64: 1, 32>}, {pipeline_mode = #tpu.pipeline_mode<synchronous>, transform_indices = @transform_4, window_bounds = array<i64: 32, 32>}, {pipeline_mode = #tpu.pipeline_mode<synchronous>, transform_indices = @transform_5, window_bounds = array<i64: 1, 32>}, {pipeline_mode = #tpu.pipeline_mode<synchronous>, transform_indices = @transform_6, window_bounds = array<i64: 32, 32>}, {pipeline_mode = #tpu.pipeline_mode<synchronous>, transform_indices = @transform_7, window_bounds = array<i64: 1, 32>}, {pipeline_mode = #tpu.pipeline_mode<synchronous>, transform_indices = @transform_8, window_bounds = array<i64: 32, 32>}, {pipeline_mode = #tpu.pipeline_mode<synchronous>, transform_indices = @transform_9, window_bounds = array<i64: 1, 32>}, {pipeline_mode = #tpu.pipeline_mode<synchronous>, transform_indices = @transform_10, window_bounds = array<i64: 32, 64>}, {pipeline_mode = #tpu.pipeline_mode<synchronous>, transform_indices = @transform_11, window_bounds = array<i64: 1, 64>}, {pipeline_mode = #tpu.pipeline_mode<synchronous>, transform_indices = @transform_12, window_bounds = array<i64: 64, 32>}, {pipeline_mode = #tpu.pipeline_mode<synchronous>, transform_indices = @transform_13, window_bounds = array<i64: 1, 32>}, {pipeline_mode = #tpu.pipeline_mode<synchronous>, transform_indices = @transform_14, window_bounds = array<i64: 1, 32>}, {pipeline_mode = #tpu.pipeline_mode<synchronous>, transform_indices = @transform_15, window_bounds = array<i64: 1, 32>}, {pipeline_mode = #tpu.pipeline_mode<synchronous>, transform_indices = @transform_16, window_bounds = array<i64: 1, 32>}, {pipeline_mode = #tpu.pipeline_mode<synchronous>, transform_indices = @transform_17, window_bounds = array<i64: 1, 32>}, {transform_indices = @transform_18, window_bounds = array<i64: 1, 8, 32>}]} {
    %c0_i32 = arith.constant 0 : i32
    %0 = arith.cmpi eq, %arg1, %c0_i32 : i32
    %1 = arith.extui %0 : i1 to i32
    %c0_i32_0 = arith.constant 0 : i32
    %2 = arith.cmpi ne, %1, %c0_i32_0 : i32
    scf.if %2 {
      %c0_55 = arith.constant 0 : index
      %c0_56 = arith.constant 0 : index
      %c0_57 = arith.constant 0 : index
      %99 = vector.load %arg3[%c0_55, %c0_56, %c0_57] : memref<1x16x32xf32, #tpu.memory_space<vmem>>, vector<1x16x32xf32>
      %100 = vector.shape_cast %99 : vector<1x16x32xf32> to vector<16x32xf32>
      %c0_58 = arith.constant 0 : index
      %c0_59 = arith.constant 0 : index
      %101 = vector.load %arg6[%c0_58, %c0_59] : memref<32x32xf32, #tpu.memory_space<vmem>>, vector<32x32xf32>
      %cst_60 = arith.constant dense<0.000000e+00> : vector<16x32xf32>
      %102 = tpu.matmul %100, %101, %cst_60 {dimension_numbers = #tpu.dot_dimension_numbers<[1], [0], [0], [1], [0, 0, 1, 1], [], []>} : vector<16x32xf32>, vector<32x32xf32>, vector<16x32xf32> -> vector<16x32xf32>
      %c0_61 = arith.constant 0 : index
      %c0_62 = arith.constant 0 : index
      %103 = vector.load %arg7[%c0_61, %c0_62] : memref<1x32xf32, #tpu.memory_space<vmem>>, vector<1x32xf32>
      %104 = vector.broadcast %103 : vector<1x32xf32> to vector<16x32xf32>
      %105 = arith.addf %102, %104 : vector<16x32xf32>
      %c0_63 = arith.constant 0 : index
      %c0_64 = arith.constant 0 : index
      %106 = vector.load %arg8[%c0_63, %c0_64] : memref<32x32xf32, #tpu.memory_space<vmem>>, vector<32x32xf32>
      %cst_65 = arith.constant dense<0.000000e+00> : vector<16x32xf32>
      %107 = tpu.matmul %100, %106, %cst_65 {dimension_numbers = #tpu.dot_dimension_numbers<[1], [0], [0], [1], [0, 0, 1, 1], [], []>} : vector<16x32xf32>, vector<32x32xf32>, vector<16x32xf32> -> vector<16x32xf32>
      %c0_66 = arith.constant 0 : index
      %c0_67 = arith.constant 0 : index
      %108 = vector.load %arg9[%c0_66, %c0_67] : memref<1x32xf32, #tpu.memory_space<vmem>>, vector<1x32xf32>
      %109 = vector.broadcast %108 : vector<1x32xf32> to vector<16x32xf32>
      %110 = arith.addf %107, %109 : vector<16x32xf32>
      %111 = vector.shape_cast %105 : vector<16x32xf32> to vector<16x4x8xf32>
      %112 = tpu.transpose %111, [1, 0, 2] : vector<16x4x8xf32> -> vector<4x16x8xf32>
      %c0_68 = arith.constant 0 : index
      %c0_69 = arith.constant 0 : index
      %c0_70 = arith.constant 0 : index
      %113 = vector.load %arg21[%c0_68, %c0_69, %c0_70] : memref<4x16x8xf32, #tpu.memory_space<vmem>>, vector<4x16x8xf32>
      tpu.vector_store %arg21[%c0_68, %c0_69, %c0_70], %112 {strides = array<i32>} : memref<4x16x8xf32, #tpu.memory_space<vmem>>, vector<4x16x8xf32>,
      %114 = vector.shape_cast %110 : vector<16x32xf32> to vector<16x4x8xf32>
      %115 = tpu.transpose %114, [1, 0, 2] : vector<16x4x8xf32> -> vector<4x16x8xf32>
      %c0_71 = arith.constant 0 : index
      %c0_72 = arith.constant 0 : index
      %c0_73 = arith.constant 0 : index
      %116 = vector.load %arg22[%c0_71, %c0_72, %c0_73] : memref<4x16x8xf32, #tpu.memory_space<vmem>>, vector<4x16x8xf32>
      tpu.vector_store %arg22[%c0_71, %c0_72, %c0_73], %115 {strides = array<i32>} : memref<4x16x8xf32, #tpu.memory_space<vmem>>, vector<4x16x8xf32>,
    } else {
    }
    %c0 = arith.constant 0 : index
    %c0_1 = arith.constant 0 : index
    %c0_2 = arith.constant 0 : index
    %3 = vector.load %arg2[%c0, %c0_1, %c0_2] : memref<1x8x32xf32, #tpu.memory_space<vmem>>, vector<1x8x32xf32>
    %4 = vector.shape_cast %3 : vector<1x8x32xf32> to vector<8x32xf32>
    %c0_3 = arith.constant 0 : index
    %c0_4 = arith.constant 0 : index
    %5 = vector.load %arg4[%c0_3, %c0_4] : memref<32x32xf32, #tpu.memory_space<vmem>>, vector<32x32xf32>
    %cst = arith.constant dense<0.000000e+00> : vector<8x32xf32>
    %6 = tpu.matmul %4, %5, %cst {dimension_numbers = #tpu.dot_dimension_numbers<[1], [0], [0], [1], [0, 0, 1, 1], [], []>} : vector<8x32xf32>, vector<32x32xf32>, vector<8x32xf32> -> vector<8x32xf32>
    %c0_5 = arith.constant 0 : index
    %c0_6 = arith.constant 0 : index
    %7 = vector.load %arg5[%c0_5, %c0_6] : memref<1x32xf32, #tpu.memory_space<vmem>>, vector<1x32xf32>
    %8 = vector.broadcast %7 : vector<1x32xf32> to vector<8x32xf32>
    %9 = arith.addf %6, %8 : vector<8x32xf32>
    %cst_7 = arith.constant 0.353553385 : f32
    %10 = vector.broadcast %cst_7 : f32 to vector<8x32xf32>
    %11 = arith.mulf %9, %10 : vector<8x32xf32>
    %12 = vector.shape_cast %11 : vector<8x32xf32> to vector<8x4x8xf32>
    %13 = tpu.transpose %12, [1, 0, 2] : vector<8x4x8xf32> -> vector<4x8x8xf32>
    %c0_8 = arith.constant 0 : index
    %c0_9 = arith.constant 0 : index
    %c0_10 = arith.constant 0 : index
    %14 = vector.load %arg21[%c0_8, %c0_9, %c0_10] : memref<4x16x8xf32, #tpu.memory_space<vmem>>, vector<4x16x8xf32>
    %cst_11 = arith.constant dense<0.000000e+00> : vector<4x8x16xf32>
    %15 = tpu.matmul %13, %14, %cst_11 {dimension_numbers = #tpu.dot_dimension_numbers<[2], [2], [1], [1], [0, 0, 0, 1, 1, 1], [0], [0]>} : vector<4x8x8xf32>, vector<4x16x8xf32>, vector<4x8x16xf32> -> vector<4x8x16xf32>
    %cst_12 = arith.constant dense<0xFF800000> : vector<4x8xf32>
    %16 = vector.multi_reduction <maximumf>, %15, %cst_12 [2] : vector<4x8x16xf32> to vector<4x8xf32>
    %17 = vector.shape_cast %16 : vector<4x8xf32> to vector<4x8x1xf32>
    %18 = vector.broadcast %17 : vector<4x8x1xf32> to vector<4x8x16xf32>
    %19 = arith.subf %15, %18 : vector<4x8x16xf32>
    %20 = math.exp %19 : vector<4x8x16xf32>
    %cst_13 = arith.constant dense<0.000000e+00> : vector<4x8xf32>
    %21 = vector.multi_reduction <add>, %20, %cst_13 [2] : vector<4x8x16xf32> to vector<4x8xf32>
    %22 = vector.shape_cast %21 : vector<4x8xf32> to vector<4x8x1xf32>
    %23 = vector.broadcast %22 : vector<4x8x1xf32> to vector<4x8x16xf32>
    %24 = arith.divf %20, %23 : vector<4x8x16xf32>
    %c0_14 = arith.constant 0 : index
    %c0_15 = arith.constant 0 : index
    %c0_16 = arith.constant 0 : index
    %25 = vector.load %arg22[%c0_14, %c0_15, %c0_16] : memref<4x16x8xf32, #tpu.memory_space<vmem>>, vector<4x16x8xf32>
    %cst_17 = arith.constant dense<0.000000e+00> : vector<4x8x8xf32>
    %26 = tpu.matmul %24, %25, %cst_17 {dimension_numbers = #tpu.dot_dimension_numbers<[2], [1], [1], [2], [0, 0, 0, 1, 1, 2], [0], [0]>} : vector<4x8x16xf32>, vector<4x16x8xf32>, vector<4x8x8xf32> -> vector<4x8x8xf32>
    %27 = tpu.transpose %26, [1, 0, 2] : vector<4x8x8xf32> -> vector<8x4x8xf32>
    %28 = vector.shape_cast %27 : vector<8x4x8xf32> to vector<8x32xf32>
    %c0_18 = arith.constant 0 : index
    %c0_19 = arith.constant 0 : index
    %29 = vector.load %arg10[%c0_18, %c0_19] : memref<32x32xf32, #tpu.memory_space<vmem>>, vector<32x32xf32>
    %cst_20 = arith.constant dense<0.000000e+00> : vector<8x32xf32>
    %30 = tpu.matmul %28, %29, %cst_20 {dimension_numbers = #tpu.dot_dimension_numbers<[1], [0], [0], [1], [0, 0, 1, 1], [], []>} : vector<8x32xf32>, vector<32x32xf32>, vector<8x32xf32> -> vector<8x32xf32>
    %c0_21 = arith.constant 0 : index
    %c0_22 = arith.constant 0 : index
    %31 = vector.load %arg11[%c0_21, %c0_22] : memref<1x32xf32, #tpu.memory_space<vmem>>, vector<1x32xf32>
    %32 = vector.broadcast %31 : vector<1x32xf32> to vector<8x32xf32>
    %33 = arith.addf %30, %32 : vector<8x32xf32>
    %34 = arith.addf %4, %33 : vector<8x32xf32>
    %cst_23 = arith.constant dense<0.000000e+00> : vector<8xf32>
    %35 = vector.multi_reduction <add>, %34, %cst_23 [1] : vector<8x32xf32> to vector<8xf32>
    %36 = vector.shape_cast %35 : vector<8xf32> to vector<8x1xf32>
    %cst_24 = arith.constant 3.200000e+01 : f32
    %37 = vector.broadcast %cst_24 : f32 to vector<8x1xf32>
    %38 = arith.divf %36, %37 : vector<8x1xf32>
    %39 = vector.broadcast %38 : vector<8x1xf32> to vector<8x32xf32>
    %40 = arith.subf %34, %39 : vector<8x32xf32>
    %41 = arith.mulf %40, %40 : vector<8x32xf32>
    %cst_25 = arith.constant dense<0.000000e+00> : vector<8xf32>
    %42 = vector.multi_reduction <add>, %41, %cst_25 [1] : vector<8x32xf32> to vector<8xf32>
    %43 = vector.shape_cast %42 : vector<8xf32> to vector<8x1xf32>
    %cst_26 = arith.constant 3.200000e+01 : f32
    %44 = vector.broadcast %cst_26 : f32 to vector<8x1xf32>
    %45 = arith.divf %43, %44 : vector<8x1xf32>
    %46 = vector.broadcast %38 : vector<8x1xf32> to vector<8x32xf32>
    %47 = arith.subf %34, %46 : vector<8x32xf32>
    %cst_27 = arith.constant 9.99999974E-6 : f32
    %48 = vector.broadcast %cst_27 : f32 to vector<8x1xf32>
    %49 = arith.addf %45, %48 : vector<8x1xf32>
    %50 = math.rsqrt %49 : vector<8x1xf32>
    %51 = vector.broadcast %50 : vector<8x1xf32> to vector<8x32xf32>
    %52 = arith.mulf %47, %51 : vector<8x32xf32>
    %c0_28 = arith.constant 0 : index
    %c0_29 = arith.constant 0 : index
    %53 = vector.load %arg16[%c0_28, %c0_29] : memref<1x32xf32, #tpu.memory_space<vmem>>, vector<1x32xf32>
    %54 = vector.broadcast %53 : vector<1x32xf32> to vector<8x32xf32>
    %55 = arith.mulf %52, %54 : vector<8x32xf32>
    %c0_30 = arith.constant 0 : index
    %c0_31 = arith.constant 0 : index
    %56 = vector.load %arg17[%c0_30, %c0_31] : memref<1x32xf32, #tpu.memory_space<vmem>>, vector<1x32xf32>
    %57 = vector.broadcast %56 : vector<1x32xf32> to vector<8x32xf32>
    %58 = arith.addf %55, %57 : vector<8x32xf32>
    %c0_32 = arith.constant 0 : index
    %c0_33 = arith.constant 0 : index
    %59 = vector.load %arg12[%c0_32, %c0_33] : memref<32x64xf32, #tpu.memory_space<vmem>>, vector<32x64xf32>
    %cst_34 = arith.constant dense<0.000000e+00> : vector<8x64xf32>
    %60 = tpu.matmul %58, %59, %cst_34 {dimension_numbers = #tpu.dot_dimension_numbers<[1], [0], [0], [1], [0, 0, 1, 1], [], []>} : vector<8x32xf32>, vector<32x64xf32>, vector<8x64xf32> -> vector<8x64xf32>
    %c0_35 = arith.constant 0 : index
    %c0_36 = arith.constant 0 : index
    %61 = vector.load %arg13[%c0_35, %c0_36] : memref<1x64xf32, #tpu.memory_space<vmem>>, vector<1x64xf32>
    %62 = vector.broadcast %61 : vector<1x64xf32> to vector<8x64xf32>
    %63 = arith.addf %60, %62 : vector<8x64xf32>
    %cst_37 = arith.constant 0.000000e+00 : f32
    %64 = vector.broadcast %cst_37 : f32 to vector<8x64xf32>
    %65 = arith.maximumf %63, %64 : vector<8x64xf32>
    %c0_38 = arith.constant 0 : index
    %c0_39 = arith.constant 0 : index
    %66 = vector.load %arg14[%c0_38, %c0_39] : memref<64x32xf32, #tpu.memory_space<vmem>>, vector<64x32xf32>
    %cst_40 = arith.constant dense<0.000000e+00> : vector<8x32xf32>
    %67 = tpu.matmul %65, %66, %cst_40 {dimension_numbers = #tpu.dot_dimension_numbers<[1], [0], [0], [1], [0, 0, 1, 1], [], []>} : vector<8x64xf32>, vector<64x32xf32>, vector<8x32xf32> -> vector<8x32xf32>
    %c0_41 = arith.constant 0 : index
    %c0_42 = arith.constant 0 : index
    %68 = vector.load %arg15[%c0_41, %c0_42] : memref<1x32xf32, #tpu.memory_space<vmem>>, vector<1x32xf32>
    %69 = vector.broadcast %68 : vector<1x32xf32> to vector<8x32xf32>
    %70 = arith.addf %67, %69 : vector<8x32xf32>
    %71 = arith.addf %58, %70 : vector<8x32xf32>
    %cst_43 = arith.constant dense<0.000000e+00> : vector<8xf32>
    %72 = vector.multi_reduction <add>, %71, %cst_43 [1] : vector<8x32xf32> to vector<8xf32>
    %73 = vector.shape_cast %72 : vector<8xf32> to vector<8x1xf32>
    %cst_44 = arith.constant 3.200000e+01 : f32
    %74 = vector.broadcast %cst_44 : f32 to vector<8x1xf32>
    %75 = arith.divf %73, %74 : vector<8x1xf32>
    %76 = vector.broadcast %75 : vector<8x1xf32> to vector<8x32xf32>
    %77 = arith.subf %71, %76 : vector<8x32xf32>
    %78 = arith.mulf %77, %77 : vector<8x32xf32>
    %cst_45 = arith.constant dense<0.000000e+00> : vector<8xf32>
    %79 = vector.multi_reduction <add>, %78, %cst_45 [1] : vector<8x32xf32> to vector<8xf32>
    %80 = vector.shape_cast %79 : vector<8xf32> to vector<8x1xf32>
    %cst_46 = arith.constant 3.200000e+01 : f32
    %81 = vector.broadcast %cst_46 : f32 to vector<8x1xf32>
    %82 = arith.divf %80, %81 : vector<8x1xf32>
    %83 = vector.broadcast %75 : vector<8x1xf32> to vector<8x32xf32>
    %84 = arith.subf %71, %83 : vector<8x32xf32>
    %cst_47 = arith.constant 9.99999974E-6 : f32
    %85 = vector.broadcast %cst_47 : f32 to vector<8x1xf32>
    %86 = arith.addf %82, %85 : vector<8x1xf32>
    %87 = math.rsqrt %86 : vector<8x1xf32>
    %88 = vector.broadcast %87 : vector<8x1xf32> to vector<8x32xf32>
    %89 = arith.mulf %84, %88 : vector<8x32xf32>
    %c0_48 = arith.constant 0 : index
    %c0_49 = arith.constant 0 : index
    %90 = vector.load %arg18[%c0_48, %c0_49] : memref<1x32xf32, #tpu.memory_space<vmem>>, vector<1x32xf32>
    %91 = vector.broadcast %90 : vector<1x32xf32> to vector<8x32xf32>
    %92 = arith.mulf %89, %91 : vector<8x32xf32>
    %c0_50 = arith.constant 0 : index
    %c0_51 = arith.constant 0 : index
    %93 = vector.load %arg19[%c0_50, %c0_51] : memref<1x32xf32, #tpu.memory_space<vmem>>, vector<1x32xf32>
    %94 = vector.broadcast %93 : vector<1x32xf32> to vector<8x32xf32>
    %95 = arith.addf %92, %94 : vector<8x32xf32>
    %c0_52 = arith.constant 0 : index
    %c0_53 = arith.constant 0 : index
    %c0_54 = arith.constant 0 : index
    %96 = vector.load %arg20[%c0_52, %c0_53, %c0_54] : memref<1x8x32xf32, #tpu.memory_space<vmem>>, vector<1x8x32xf32>
    %97 = vector.shape_cast %96 : vector<1x8x32xf32> to vector<8x32xf32>
    %98 = vector.shape_cast %95 : vector<8x32xf32> to vector<1x8x32xf32>
    tpu.vector_store %arg20[%c0_52, %c0_53, %c0_54], %98 {strides = array<i32>} : memref<1x8x32xf32, #tpu.memory_space<vmem>>, vector<1x8x32xf32>,
    return
  }
  func.func @transform_0(%arg0: i32, %arg1: i32) -> (i32, i32, i32) {
    %c0_i32 = arith.constant 0 : i32
    %c0_i32_0 = arith.constant 0 : i32
    return %arg0, %arg1, %c0_i32 : i32, i32, i32
  }
  func.func @transform_1(%arg0: i32, %arg1: i32) -> (i32, i32, i32) {
    %c0_i32 = arith.constant 0 : i32
    %c0_i32_0 = arith.constant 0 : i32
    %c0_i32_1 = arith.constant 0 : i32
    return %arg0, %c0_i32, %c0_i32_0 : i32, i32, i32
  }
  func.func @transform_2(%arg0: i32, %arg1: i32) -> (i32, i32) {
    %c0_i32 = arith.constant 0 : i32
    %c0_i32_0 = arith.constant 0 : i32
    %c0_i32_1 = arith.constant 0 : i32
    return %c0_i32, %c0_i32_0 : i32, i32
  }
  func.func @transform_3(%arg0: i32, %arg1: i32) -> (i32, i32) {
    %c0_i32 = arith.constant 0 : i32
    %c0_i32_0 = arith.constant 0 : i32
    %c0_i32_1 = arith.constant 0 : i32
    return %c0_i32, %c0_i32_0 : i32, i32
  }
  func.func @transform_4(%arg0: i32, %arg1: i32) -> (i32, i32) {
    %c0_i32 = arith.constant 0 : i32
    %c0_i32_0 = arith.constant 0 : i32
    %c0_i32_1 = arith.constant 0 : i32
    return %c0_i32, %c0_i32_0 : i32, i32
  }
  func.func @transform_5(%arg0: i32, %arg1: i32) -> (i32, i32) {
    %c0_i32 = arith.constant 0 : i32
    %c0_i32_0 = arith.constant 0 : i32
    %c0_i32_1 = arith.constant 0 : i32
    return %c0_i32, %c0_i32_0 : i32, i32
  }
  func.func @transform_6(%arg0: i32, %arg1: i32) -> (i32, i32) {
    %c0_i32 = arith.constant 0 : i32
    %c0_i32_0 = arith.constant 0 : i32
    %c0_i32_1 = arith.constant 0 : i32
    return %c0_i32, %c0_i32_0 : i32, i32
  }
  func.func @transform_7(%arg0: i32, %arg1: i32) -> (i32, i32) {
    %c0_i32 = arith.constant 0 : i32
    %c0_i32_0 = arith.constant 0 : i32
    %c0_i32_1 = arith.constant 0 : i32
    return %c0_i32, %c0_i32_0 : i32, i32
  }
  func.func @transform_8(%arg0: i32, %arg1: i32) -> (i32, i32) {
    %c0_i32 = arith.constant 0 : i32
    %c0_i32_0 = arith.constant 0 : i32
    %c0_i32_1 = arith.constant 0 : i32
    return %c0_i32, %c0_i32_0 : i32, i32
  }
  func.func @transform_9(%arg0: i32, %arg1: i32) -> (i32, i32) {
    %c0_i32 = arith.constant 0 : i32
    %c0_i32_0 = arith.constant 0 : i32
    %c0_i32_1 = arith.constant 0 : i32
    return %c0_i32, %c0_i32_0 : i32, i32
  }
  func.func @transform_10(%arg0: i32, %arg1: i32) -> (i32, i32) {
    %c0_i32 = arith.constant 0 : i32
    %c0_i32_0 = arith.constant 0 : i32
    %c0_i32_1 = arith.constant 0 : i32
    return %c0_i32, %c0_i32_0 : i32, i32
  }
  func.func @transform_11(%arg0: i32, %arg1: i32) -> (i32, i32) {
    %c0_i32 = arith.constant 0 : i32
    %c0_i32_0 = arith.constant 0 : i32
    %c0_i32_1 = arith.constant 0 : i32
    return %c0_i32, %c0_i32_0 : i32, i32
  }
  func.func @transform_12(%arg0: i32, %arg1: i32) -> (i32, i32) {
    %c0_i32 = arith.constant 0 : i32
    %c0_i32_0 = arith.constant 0 : i32
    %c0_i32_1 = arith.constant 0 : i32
    return %c0_i32, %c0_i32_0 : i32, i32
  }
  func.func @transform_13(%arg0: i32, %arg1: i32) -> (i32, i32) {
    %c0_i32 = arith.constant 0 : i32
    %c0_i32_0 = arith.constant 0 : i32
    %c0_i32_1 = arith.constant 0 : i32
    return %c0_i32, %c0_i32_0 : i32, i32
  }
  func.func @transform_14(%arg0: i32, %arg1: i32) -> (i32, i32) {
    %c0_i32 = arith.constant 0 : i32
    %c0_i32_0 = arith.constant 0 : i32
    %c0_i32_1 = arith.constant 0 : i32
    return %c0_i32, %c0_i32_0 : i32, i32
  }
  func.func @transform_15(%arg0: i32, %arg1: i32) -> (i32, i32) {
    %c0_i32 = arith.constant 0 : i32
    %c0_i32_0 = arith.constant 0 : i32
    %c0_i32_1 = arith.constant 0 : i32
    return %c0_i32, %c0_i32_0 : i32, i32
  }
  func.func @transform_16(%arg0: i32, %arg1: i32) -> (i32, i32) {
    %c0_i32 = arith.constant 0 : i32
    %c0_i32_0 = arith.constant 0 : i32
    %c0_i32_1 = arith.constant 0 : i32
    return %c0_i32, %c0_i32_0 : i32, i32
  }
  func.func @transform_17(%arg0: i32, %arg1: i32) -> (i32, i32) {
    %c0_i32 = arith.constant 0 : i32
    %c0_i32_0 = arith.constant 0 : i32
    %c0_i32_1 = arith.constant 0 : i32
    return %c0_i32, %c0_i32_0 : i32, i32
  }
  func.func @transform_18(%arg0: i32, %arg1: i32) -> (i32, i32, i32) {
    %c0_i32 = arith.constant 0 : i32
    %c0_i32_0 = arith.constant 0 : i32
    return %arg0, %arg1, %c0_i32 : i32, i32, i32
  }
}

module attributes {stable_mosaic.version = 11 : i64} {
  func.func @encoder_layer_kernel(%arg0: i32, %arg1: i32, %arg2: memref<1x8x32xf32, #tpu.memory_space<vmem>>, %arg3: memref<1x16x32xf32, #tpu.memory_space<vmem>>, %arg4: memref<32x32xf32, #tpu.memory_space<vmem>>, %arg5: memref<1x32xf32, #tpu.memory_space<vmem>>, %arg6: memref<32x32xf32, #tpu.memory_space<vmem>>, %arg7: memref<1x32xf32, #tpu.memory_space<vmem>>, %arg8: memref<32x32xf32, #tpu.memory_space<vmem>>, %arg9: memref<1x32xf32, #tpu.memory_space<vmem>>, %arg10: memref<32x32xf32, #tpu.memory_space<vmem>>, %arg11: memref<1x32xf32, #tpu.memory_space<vmem>>, %arg12: memref<32x64xf32, #tpu.memory_space<vmem>>, %arg13: memref<1x64xf32, #tpu.memory_space<vmem>>, %arg14: memref<64x32xf32, #tpu.memory_space<vmem>>, %arg15: memref<1x32xf32, #tpu.memory_space<vmem>>, %arg16: memref<1x32xf32, #tpu.memory_space<vmem>>, %arg17: memref<1x32xf32, #tpu.memory_space<vmem>>, %arg18: memref<1x32xf32, #tpu.memory_space<vmem>>, %arg19: memref<1x32xf32, #tpu.memory_space<vmem>>, %arg20: memref<1x8x32xf32, #tpu.memory_space<vmem>>, %arg21: memref<4x16x8xf32, #tpu.memory_space<vmem>>, %arg22: memref<4x16x8xf32, #tpu.memory_space<vmem>>) attributes {dimension_semantics = [#tpu.dimension_semantics<parallel>, #tpu.dimension_semantics<arbitrary>], iteration_bounds = array<i64: 2, 2>, scalar_prefetch = 0 : i64, scratch_operands = 2 : i64, tpu.core_type = #tpu.core_type<tc>, window_params = [{transform_indices = @transform_0, window_bounds = array<i64: 1, 8, 32>}, {transform_indices = @transform_1, window_bounds = array<i64: 1, 16, 32>}, {pipeline_mode = #tpu.pipeline_mode<synchronous>, transform_indices = @transform_2, window_bounds = array<i64: 32, 32>}, {pipeline_mode = #tpu.pipeline_mode<synchronous>, transform_indices = @transform_3, window_bounds = array<i64: 1, 32>}, {pipeline_mode = #tpu.pipeline_mode<synchronous>, transform_indices = @transform_4, window_bounds = array<i64: 32, 32>}, {pipeline_mode = #tpu.pipeline_mode<synchronous>, transform_indices = @transform_5, window_bounds = array<i64: 1, 32>}, {pipeline_mode = #tpu.pipeline_mode<synchronous>, transform_indices = @transform_6, window_bounds = array<i64: 32, 32>}, {pipeline_mode = #tpu.pipeline_mode<synchronous>, transform_indices = @transform_7, window_bounds = array<i64: 1, 32>}, {pipeline_mode = #tpu.pipeline_mode<synchronous>, transform_indices = @transform_8, window_bounds = array<i64: 32, 32>}, {pipeline_mode = #tpu.pipeline_mode<synchronous>, transform_indices = @transform_9, window_bounds = array<i64: 1, 32>}, {pipeline_mode = #tpu.pipeline_mode<synchronous>, transform_indices = @transform_10, window_bounds = array<i64: 32, 64>}, {pipeline_mode = #tpu.pipeline_mode<synchronous>, transform_indices = @transform_11, window_bounds = array<i64: 1, 64>}, {pipeline_mode = #tpu.pipeline_mode<synchronous>, transform_indices = @transform_12, window_bounds = array<i64: 64, 32>}, {pipeline_mode = #tpu.pipeline_mode<synchronous>, transform_indices = @transform_13, window_bounds = array<i64: 1, 32>}, {pipeline_mode = #tpu.pipeline_mode<synchronous>, transform_indices = @transform_14, window_bounds = array<i64: 1, 32>}, {pipeline_mode = #tpu.pipeline_mode<synchronous>, transform_indices = @transform_15, window_bounds = array<i64: 1, 32>}, {pipeline_mode = #tpu.pipeline_mode<synchronous>, transform_indices = @transform_16, window_bounds = array<i64: 1, 32>}, {pipeline_mode = #tpu.pipeline_mode<synchronous>, transform_indices = @transform_17, window_bounds = array<i64: 1, 32>}, {transform_indices = @transform_18, window_bounds = array<i64: 1, 8, 32>}]} {
    %c0_i32 = arith.constant 0 : i32
    %0 = arith.cmpi eq, %arg1, %c0_i32 : i32
    %1 = arith.extui %0 : i1 to i32
    %c0_i32_0 = arith.constant 0 : i32
    %2 = arith.cmpi ne, %1, %c0_i32_0 : i32
    scf.if %2 {
      %c0_55 = arith.constant 0 : index
      %c0_56 = arith.constant 0 : index
      %c0_57 = arith.constant 0 : index
      %99 = vector.load %arg3[%c0_55, %c0_56, %c0_57] : memref<1x16x32xf32, #tpu.memory_space<vmem>>, vector<1x16x32xf32>
      %100 = vector.shape_cast %99 : vector<1x16x32xf32> to vector<16x32xf32>
      %c0_58 = arith.constant 0 : index
      %c0_59 = arith.constant 0 : index
      %101 = vector.load %arg6[%c0_58, %c0_59] : memref<32x32xf32, #tpu.memory_space<vmem>>, vector<32x32xf32>
      %cst_60 = arith.constant dense<0.000000e+00> : vector<16x32xf32>
      %102 = tpu.matmul %100, %101, %cst_60 {dimension_numbers = #tpu.dot_dimension_numbers<[1], [0], [0], [1], [0, 0, 1, 1], [], []>} : vector<16x32xf32>, vector<32x32xf32>, vector<16x32xf32> -> vector<16x32xf32>
      %c0_61 = arith.constant 0 : index
      %c0_62 = arith.constant 0 : index
      %103 = vector.load %arg7[%c0_61, %c0_62] : memref<1x32xf32, #tpu.memory_space<vmem>>, vector<1x32xf32>
      %104 = vector.broadcast %103 : vector<1x32xf32> to vector<16x32xf32>
      %105 = arith.addf %102, %104 : vector<16x32xf32>
      %c0_63 = arith.constant 0 : index
      %c0_64 = arith.constant 0 : index
      %106 = vector.load %arg8[%c0_63, %c0_64] : memref<32x32xf32, #tpu.memory_space<vmem>>, vector<32x32xf32>
      %cst_65 = arith.constant dense<0.000000e+00> : vector<16x32xf32>
      %107 = tpu.matmul %100, %106, %cst_65 {dimension_numbers = #tpu.dot_dimension_numbers<[1], [0], [0], [1], [0, 0, 1, 1], [], []>} : vector<16x32xf32>, vector<32x32xf32>, vector<16x32xf32> -> vector<16x32xf32>
      %c0_66 = arith.constant 0 : index
      %c0_67 = arith.constant 0 : index
      %108 = vector.load %arg9[%c0_66, %c0_67] : memref<1x32xf32, #tpu.memory_space<vmem>>, vector<1x32xf32>
      %109 = vector.broadcast %108 : vector<1x32xf32> to vector<16x32xf32>
      %110 = arith.addf %107, %109 : vector<16x32xf32>
      %111 = vector.shape_cast %105 : vector<16x32xf32> to vector<16x4x8xf32>
      %112 = tpu.transpose %111, [1, 0, 2] : vector<16x4x8xf32> -> vector<4x16x8xf32>
      %c0_68 = arith.constant 0 : index
      %c0_69 = arith.constant 0 : index
      %c0_70 = arith.constant 0 : index
      %113 = vector.load %arg21[%c0_68, %c0_69, %c0_70] : memref<4x16x8xf32, #tpu.memory_space<vmem>>, vector<4x16x8xf32>
      tpu.vector_store %arg21[%c0_68, %c0_69, %c0_70], %112 {strides = array<i32>} : memref<4x16x8xf32, #tpu.memory_space<vmem>>, vector<4x16x8xf32>,
      %114 = vector.shape_cast %110 : vector<16x32xf32> to vector<16x4x8xf32>
      %115 = tpu.transpose %114, [1, 0, 2] : vector<16x4x8xf32> -> vector<4x16x8xf32>
      %c0_71 = arith.constant 0 : index
      %c0_72 = arith.constant 0 : index
      %c0_73 = arith.constant 0 : index
      %116 = vector.load %arg22[%c0_71, %c0_72, %c0_73] : memref<4x16x8xf32, #tpu.memory_space<vmem>>, vector<4x16x8xf32>
      tpu.vector_store %arg22[%c0_71, %c0_72, %c0_73], %115 {strides = array<i32>} : memref<4x16x8xf32, #tpu.memory_space<vmem>>, vector<4x16x8xf32>,
    } else {
    }
    %c0 = arith.constant 0 : index
    %c0_1 = arith.constant 0 : index
    %c0_2 = arith.constant 0 : index
    %3 = vector.load %arg2[%c0, %c0_1, %c0_2] : memref<1x8x32xf32, #tpu.memory_space<vmem>>, vector<1x8x32xf32>
    %4 = vector.shape_cast %3 : vector<1x8x32xf32> to vector<8x32xf32>
    %c0_3 = arith.constant 0 : index
    %c0_4 = arith.constant 0 : index
    %5 = vector.load %arg4[%c0_3, %c0_4] : memref<32x32xf32, #tpu.memory_space<vmem>>, vector<32x32xf32>
    %cst = arith.constant dense<0.000000e+00> : vector<8x32xf32>
    %6 = tpu.matmul %4, %5, %cst {dimension_numbers = #tpu.dot_dimension_numbers<[1], [0], [0], [1], [0, 0, 1, 1], [], []>} : vector<8x32xf32>, vector<32x32xf32>, vector<8x32xf32> -> vector<8x32xf32>
    %c0_5 = arith.constant 0 : index
    %c0_6 = arith.constant 0 : index
    %7 = vector.load %arg5[%c0_5, %c0_6] : memref<1x32xf32, #tpu.memory_space<vmem>>, vector<1x32xf32>
    %8 = vector.broadcast %7 : vector<1x32xf32> to vector<8x32xf32>
    %9 = arith.addf %6, %8 : vector<8x32xf32>
    %cst_7 = arith.constant 0.353553385 : f32
    %10 = vector.broadcast %cst_7 : f32 to vector<8x32xf32>
    %11 = arith.mulf %9, %10 : vector<8x32xf32>
    %12 = vector.shape_cast %11 : vector<8x32xf32> to vector<8x4x8xf32>
    %13 = tpu.transpose %12, [1, 0, 2] : vector<8x4x8xf32> -> vector<4x8x8xf32>
    %c0_8 = arith.constant 0 : index
    %c0_9 = arith.constant 0 : index
    %c0_10 = arith.constant 0 : index
    %14 = vector.load %arg21[%c0_8, %c0_9, %c0_10] : memref<4x16x8xf32, #tpu.memory_space<vmem>>, vector<4x16x8xf32>
    %cst_11 = arith.constant dense<0.000000e+00> : vector<4x8x16xf32>
    %15 = tpu.matmul %13, %14, %cst_11 {dimension_numbers = #tpu.dot_dimension_numbers<[2], [2], [1], [1], [0, 0, 0, 1, 1, 1], [0], [0]>} : vector<4x8x8xf32>, vector<4x16x8xf32>, vector<4x8x16xf32> -> vector<4x8x16xf32>
    %cst_12 = arith.constant dense<0xFF800000> : vector<4x8xf32>
    %16 = vector.multi_reduction <maximumf>, %15, %cst_12 [2] : vector<4x8x16xf32> to vector<4x8xf32>
    %17 = vector.shape_cast %16 : vector<4x8xf32> to vector<4x8x1xf32>
    %18 = vector.broadcast %17 : vector<4x8x1xf32> to vector<4x8x16xf32>
    %19 = arith.subf %15, %18 : vector<4x8x16xf32>
    %20 = math.exp %19 : vector<4x8x16xf32>
    %cst_13 = arith.constant dense<0.000000e+00> : vector<4x8xf32>
    %21 = vector.multi_reduction <add>, %20, %cst_13 [2] : vector<4x8x16xf32> to vector<4x8xf32>
    %22 = vector.shape_cast %21 : vector<4x8xf32> to vector<4x8x1xf32>
    %23 = vector.broadcast %22 : vector<4x8x1xf32> to vector<4x8x16xf32>
    %24 = arith.divf %20, %23 : vector<4x8x16xf32>
    %c0_14 = arith.constant 0 : index
    %c0_15 = arith.constant 0 : index
    %c0_16 = arith.constant 0 : index
    %25 = vector.load %arg22[%c0_14, %c0_15, %c0_16] : memref<4x16x8xf32, #tpu.memory_space<vmem>>, vector<4x16x8xf32>
    %cst_17 = arith.constant dense<0.000000e+00> : vector<4x8x8xf32>
    %26 = tpu.matmul %24, %25, %cst_17 {dimension_numbers = #tpu.dot_dimension_numbers<[2], [1], [1], [2], [0, 0, 0, 1, 1, 2], [0], [0]>} : vector<4x8x16xf32>, vector<4x16x8xf32>, vector<4x8x8xf32> -> vector<4x8x8xf32>
    %27 = tpu.transpose %26, [1, 0, 2] : vector<4x8x8xf32> -> vector<8x4x8xf32>
    %28 = vector.shape_cast %27 : vector<8x4x8xf32> to vector<8x32xf32>
    %c0_18 = arith.constant 0 : index
    %c0_19 = arith.constant 0 : index
    %29 = vector.load %arg10[%c0_18, %c0_19] : memref<32x32xf32, #tpu.memory_space<vmem>>, vector<32x32xf32>
    %cst_20 = arith.constant dense<0.000000e+00> : vector<8x32xf32>
    %30 = tpu.matmul %28, %29, %cst_20 {dimension_numbers = #tpu.dot_dimension_numbers<[1], [0], [0], [1], [0, 0, 1, 1], [], []>} : vector<8x32xf32>, vector<32x32xf32>, vector<8x32xf32> -> vector<8x32xf32>
    %c0_21 = arith.constant 0 : index
    %c0_22 = arith.constant 0 : index
    %31 = vector.load %arg11[%c0_21, %c0_22] : memref<1x32xf32, #tpu.memory_space<vmem>>, vector<1x32xf32>
    %32 = vector.broadcast %31 : vector<1x32xf32> to vector<8x32xf32>
    %33 = arith.addf %30, %32 : vector<8x32xf32>
    %34 = arith.addf %4, %33 : vector<8x32xf32>
    %cst_23 = arith.constant dense<0.000000e+00> : vector<8xf32>
    %35 = vector.multi_reduction <add>, %34, %cst_23 [1] : vector<8x32xf32> to vector<8xf32>
    %36 = vector.shape_cast %35 : vector<8xf32> to vector<8x1xf32>
    %cst_24 = arith.constant 3.200000e+01 : f32
    %37 = vector.broadcast %cst_24 : f32 to vector<8x1xf32>
    %38 = arith.divf %36, %37 : vector<8x1xf32>
    %39 = vector.broadcast %38 : vector<8x1xf32> to vector<8x32xf32>
    %40 = arith.subf %34, %39 : vector<8x32xf32>
    %41 = arith.mulf %40, %40 : vector<8x32xf32>
    %cst_25 = arith.constant dense<0.000000e+00> : vector<8xf32>
    %42 = vector.multi_reduction <add>, %41, %cst_25 [1] : vector<8x32xf32> to vector<8xf32>
    %43 = vector.shape_cast %42 : vector<8xf32> to vector<8x1xf32>
    %cst_26 = arith.constant 3.200000e+01 : f32
    %44 = vector.broadcast %cst_26 : f32 to vector<8x1xf32>
    %45 = arith.divf %43, %44 : vector<8x1xf32>
    %46 = vector.broadcast %38 : vector<8x1xf32> to vector<8x32xf32>
    %47 = arith.subf %34, %46 : vector<8x32xf32>
    %cst_27 = arith.constant 9.99999974E-6 : f32
    %48 = vector.broadcast %cst_27 : f32 to vector<8x1xf32>
    %49 = arith.addf %45, %48 : vector<8x1xf32>
    %50 = math.rsqrt %49 : vector<8x1xf32>
    %51 = vector.broadcast %50 : vector<8x1xf32> to vector<8x32xf32>
    %52 = arith.mulf %47, %51 : vector<8x32xf32>
    %c0_28 = arith.constant 0 : index
    %c0_29 = arith.constant 0 : index
    %53 = vector.load %arg16[%c0_28, %c0_29] : memref<1x32xf32, #tpu.memory_space<vmem>>, vector<1x32xf32>
    %54 = vector.broadcast %53 : vector<1x32xf32> to vector<8x32xf32>
    %55 = arith.mulf %52, %54 : vector<8x32xf32>
    %c0_30 = arith.constant 0 : index
    %c0_31 = arith.constant 0 : index
    %56 = vector.load %arg17[%c0_30, %c0_31] : memref<1x32xf32, #tpu.memory_space<vmem>>, vector<1x32xf32>
    %57 = vector.broadcast %56 : vector<1x32xf32> to vector<8x32xf32>
    %58 = arith.addf %55, %57 : vector<8x32xf32>
    %c0_32 = arith.constant 0 : index
    %c0_33 = arith.constant 0 : index
    %59 = vector.load %arg12[%c0_32, %c0_33] : memref<32x64xf32, #tpu.memory_space<vmem>>, vector<32x64xf32>
    %cst_34 = arith.constant dense<0.000000e+00> : vector<8x64xf32>
    %60 = tpu.matmul %58, %59, %cst_34 {dimension_numbers = #tpu.dot_dimension_numbers<[1], [0], [0], [1], [0, 0, 1, 1], [], []>} : vector<8x32xf32>, vector<32x64xf32>, vector<8x64xf32> -> vector<8x64xf32>
    %c0_35 = arith.constant 0 : index
    %c0_36 = arith.constant 0 : index
    %61 = vector.load %arg13[%c0_35, %c0_36] : memref<1x64xf32, #tpu.memory_space<vmem>>, vector<1x64xf32>
    %62 = vector.broadcast %61 : vector<1x64xf32> to vector<8x64xf32>
    %63 = arith.addf %60, %62 : vector<8x64xf32>
    %cst_37 = arith.constant 0.000000e+00 : f32
    %64 = vector.broadcast %cst_37 : f32 to vector<8x64xf32>
    %65 = arith.maximumf %63, %64 : vector<8x64xf32>
    %c0_38 = arith.constant 0 : index
    %c0_39 = arith.constant 0 : index
    %66 = vector.load %arg14[%c0_38, %c0_39] : memref<64x32xf32, #tpu.memory_space<vmem>>, vector<64x32xf32>
    %cst_40 = arith.constant dense<0.000000e+00> : vector<8x32xf32>
    %67 = tpu.matmul %65, %66, %cst_40 {dimension_numbers = #tpu.dot_dimension_numbers<[1], [0], [0], [1], [0, 0, 1, 1], [], []>} : vector<8x64xf32>, vector<64x32xf32>, vector<8x32xf32> -> vector<8x32xf32>
    %c0_41 = arith.constant 0 : index
    %c0_42 = arith.constant 0 : index
    %68 = vector.load %arg15[%c0_41, %c0_42] : memref<1x32xf32, #tpu.memory_space<vmem>>, vector<1x32xf32>
    %69 = vector.broadcast %68 : vector<1x32xf32> to vector<8x32xf32>
    %70 = arith.addf %67, %69 : vector<8x32xf32>
    %71 = arith.addf %58, %70 : vector<8x32xf32>
    %cst_43 = arith.constant dense<0.000000e+00> : vector<8xf32>
    %72 = vector.multi_reduction <add>, %71, %cst_43 [1] : vector<8x32xf32> to vector<8xf32>
    %73 = vector.shape_cast %72 : vector<8xf32> to vector<8x1xf32>
    %cst_44 = arith.constant 3.200000e+01 : f32
    %74 = vector.broadcast %cst_44 : f32 to vector<8x1xf32>
    %75 = arith.divf %73, %74 : vector<8x1xf32>
    %76 = vector.broadcast %75 : vector<8x1xf32> to vector<8x32xf32>
    %77 = arith.subf %71, %76 : vector<8x32xf32>
    %78 = arith.mulf %77, %77 : vector<8x32xf32>
    %cst_45 = arith.constant dense<0.000000e+00> : vector<8xf32>
    %79 = vector.multi_reduction <add>, %78, %cst_45 [1] : vector<8x32xf32> to vector<8xf32>
    %80 = vector.shape_cast %79 : vector<8xf32> to vector<8x1xf32>
    %cst_46 = arith.constant 3.200000e+01 : f32
    %81 = vector.broadcast %cst_46 : f32 to vector<8x1xf32>
    %82 = arith.divf %80, %81 : vector<8x1xf32>
    %83 = vector.broadcast %75 : vector<8x1xf32> to vector<8x32xf32>
    %84 = arith.subf %71, %83 : vector<8x32xf32>
    %cst_47 = arith.constant 9.99999974E-6 : f32
    %85 = vector.broadcast %cst_47 : f32 to vector<8x1xf32>
    %86 = arith.addf %82, %85 : vector<8x1xf32>
    %87 = math.rsqrt %86 : vector<8x1xf32>
    %88 = vector.broadcast %87 : vector<8x1xf32> to vector<8x32xf32>
    %89 = arith.mulf %84, %88 : vector<8x32xf32>
    %c0_48 = arith.constant 0 : index
    %c0_49 = arith.constant 0 : index
    %90 = vector.load %arg18[%c0_48, %c0_49] : memref<1x32xf32, #tpu.memory_space<vmem>>, vector<1x32xf32>
    %91 = vector.broadcast %90 : vector<1x32xf32> to vector<8x32xf32>
    %92 = arith.mulf %89, %91 : vector<8x32xf32>
    %c0_50 = arith.constant 0 : index
    %c0_51 = arith.constant 0 : index
    %93 = vector.load %arg19[%c0_50, %c0_51] : memref<1x32xf32, #tpu.memory_space<vmem>>, vector<1x32xf32>
    %94 = vector.broadcast %93 : vector<1x32xf32> to vector<8x32xf32>
    %95 = arith.addf %92, %94 : vector<8x32xf32>
    %c0_52 = arith.constant 0 : index
    %c0_53 = arith.constant 0 : index
    %c0_54 = arith.constant 0 : index
    %96 = vector.load %arg20[%c0_52, %c0_53, %c0_54] : memref<1x8x32xf32, #tpu.memory_space<vmem>>, vector<1x8x32xf32>
    %97 = vector.shape_cast %96 : vector<1x8x32xf32> to vector<8x32xf32>
    %98 = vector.shape_cast %95 : vector<8x32xf32> to vector<1x8x32xf32>
    tpu.vector_store %arg20[%c0_52, %c0_53, %c0_54], %98 {strides = array<i32>} : memref<1x8x32xf32, #tpu.memory_space<vmem>>, vector<1x8x32xf32>,
    return
  }
  func.func @transform_0(%arg0: i32, %arg1: i32) -> (i32, i32, i32) {
    %c0_i32 = arith.constant 0 : i32
    %c0_i32_0 = arith.constant 0 : i32
    return %arg0, %arg1, %c0_i32 : i32, i32, i32
  }
  func.func @transform_1(%arg0: i32, %arg1: i32) -> (i32, i32, i32) {
    %c0_i32 = arith.constant 0 : i32
    %c0_i32_0 = arith.constant 0 : i32
    %c0_i32_1 = arith.constant 0 : i32
    return %arg0, %c0_i32, %c0_i32_0 : i32, i32, i32
  }
  func.func @transform_2(%arg0: i32, %arg1: i32) -> (i32, i32) {
    %c0_i32 = arith.constant 0 : i32
    %c0_i32_0 = arith.constant 0 : i32
    %c0_i32_1 = arith.constant 0 : i32
    return %c0_i32, %c0_i32_0 : i32, i32
  }
  func.func @transform_3(%arg0: i32, %arg1: i32) -> (i32, i32) {
    %c0_i32 = arith.constant 0 : i32
    %c0_i32_0 = arith.constant 0 : i32
    %c0_i32_1 = arith.constant 0 : i32
    return %c0_i32, %c0_i32_0 : i32, i32
  }
  func.func @transform_4(%arg0: i32, %arg1: i32) -> (i32, i32) {
    %c0_i32 = arith.constant 0 : i32
    %c0_i32_0 = arith.constant 0 : i32
    %c0_i32_1 = arith.constant 0 : i32
    return %c0_i32, %c0_i32_0 : i32, i32
  }
  func.func @transform_5(%arg0: i32, %arg1: i32) -> (i32, i32) {
    %c0_i32 = arith.constant 0 : i32
    %c0_i32_0 = arith.constant 0 : i32
    %c0_i32_1 = arith.constant 0 : i32
    return %c0_i32, %c0_i32_0 : i32, i32
  }
  func.func @transform_6(%arg0: i32, %arg1: i32) -> (i32, i32) {
    %c0_i32 = arith.constant 0 : i32
    %c0_i32_0 = arith.constant 0 : i32
    %c0_i32_1 = arith.constant 0 : i32
    return %c0_i32, %c0_i32_0 : i32, i32
  }
  func.func @transform_7(%arg0: i32, %arg1: i32) -> (i32, i32) {
    %c0_i32 = arith.constant 0 : i32
    %c0_i32_0 = arith.constant 0 : i32
    %c0_i32_1 = arith.constant 0 : i32
    return %c0_i32, %c0_i32_0 : i32, i32
  }
  func.func @transform_8(%arg0: i32, %arg1: i32) -> (i32, i32) {
    %c0_i32 = arith.constant 0 : i32
    %c0_i32_0 = arith.constant 0 : i32
    %c0_i32_1 = arith.constant 0 : i32
    return %c0_i32, %c0_i32_0 : i32, i32
  }
  func.func @transform_9(%arg0: i32, %arg1: i32) -> (i32, i32) {
    %c0_i32 = arith.constant 0 : i32
    %c0_i32_0 = arith.constant 0 : i32
    %c0_i32_1 = arith.constant 0 : i32
    return %c0_i32, %c0_i32_0 : i32, i32
  }
  func.func @transform_10(%arg0: i32, %arg1: i32) -> (i32, i32) {
    %c0_i32 = arith.constant 0 : i32
    %c0_i32_0 = arith.constant 0 : i32
    %c0_i32_1 = arith.constant 0 : i32
    return %c0_i32, %c0_i32_0 : i32, i32
  }
  func.func @transform_11(%arg0: i32, %arg1: i32) -> (i32, i32) {
    %c0_i32 = arith.constant 0 : i32
    %c0_i32_0 = arith.constant 0 : i32
    %c0_i32_1 = arith.constant 0 : i32
    return %c0_i32, %c0_i32_0 : i32, i32
  }
  func.func @transform_12(%arg0: i32, %arg1: i32) -> (i32, i32) {
    %c0_i32 = arith.constant 0 : i32
    %c0_i32_0 = arith.constant 0 : i32
    %c0_i32_1 = arith.constant 0 : i32
    return %c0_i32, %c0_i32_0 : i32, i32
  }
  func.func @transform_13(%arg0: i32, %arg1: i32) -> (i32, i32) {
    %c0_i32 = arith.constant 0 : i32
    %c0_i32_0 = arith.constant 0 : i32
    %c0_i32_1 = arith.constant 0 : i32
    return %c0_i32, %c0_i32_0 : i32, i32
  }
  func.func @transform_14(%arg0: i32, %arg1: i32) -> (i32, i32) {
    %c0_i32 = arith.constant 0 : i32
    %c0_i32_0 = arith.constant 0 : i32
    %c0_i32_1 = arith.constant 0 : i32
    return %c0_i32, %c0_i32_0 : i32, i32
  }
  func.func @transform_15(%arg0: i32, %arg1: i32) -> (i32, i32) {
    %c0_i32 = arith.constant 0 : i32
    %c0_i32_0 = arith.constant 0 : i32
    %c0_i32_1 = arith.constant 0 : i32
    return %c0_i32, %c0_i32_0 : i32, i32
  }
  func.func @transform_16(%arg0: i32, %arg1: i32) -> (i32, i32) {
    %c0_i32 = arith.constant 0 : i32
    %c0_i32_0 = arith.constant 0 : i32
    %c0_i32_1 = arith.constant 0 : i32
    return %c0_i32, %c0_i32_0 : i32, i32
  }
  func.func @transform_17(%arg0: i32, %arg1: i32) -> (i32, i32) {
    %c0_i32 = arith.constant 0 : i32
    %c0_i32_0 = arith.constant 0 : i32
    %c0_i32_1 = arith.constant 0 : i32
    return %c0_i32, %c0_i32_0 : i32, i32
  }
  func.func @transform_18(%arg0: i32, %arg1: i32) -> (i32, i32, i32) {
    %c0_i32 = arith.constant 0 : i32
    %c0_i32_0 = arith.constant 0 : i32
    return %arg0, %arg1, %c0_i32 : i32, i32, i32
  }
}

</mosaic_0001>

<bundles_post_ra>
// kernel: tpu_custom_call.1
= control target key start
LH: loop header
LB: loop body
LE: loop exit
PB: predicated region body
PF: predicated region fallthrough
CT: control target
= control target key end

     0   :  { %s4400_s0 = inlined_call_operand.vmem [shape: f32[2,16,32], index: 0, kind: input, shape index: {}]   ;;  %s4401_s1 = inlined_call_operand.vmem [shape: f32[2,16,32], index: 1, kind: input, shape index: {}]   ;;  %s4402_s2 = inlined_call_operand.vmem [shape: f32[32,32], index: 2, kind: input, shape index: {}]   ;;  %s4403_s3 = inlined_call_operand.vmem [shape: f32[1,32], index: 3, kind: input, shape index: {}]   ;;  %s4404_s4 = inlined_call_operand.hbm [shape: f32[32,32], index: 4, kind: input, shape index: {}]   ;;  %s4405_s5 = inlined_call_operand.vmem [shape: f32[1,32], index: 5, kind: input, shape index: {}]   ;;  %s4406_s6 = inlined_call_operand.hbm [shape: f32[32,32], index: 6, kind: input, shape index: {}]   ;;  %s4407_s7 = inlined_call_operand.vmem [shape: f32[1,32], index: 7, kind: input, shape index: {}]   ;;  %s4408_s8 = inlined_call_operand.hbm [shape: f32[32,32], index: 8, kind: input, shape index: {}]   ;;  %s4409_s9 = inlined_call_operand.vmem [shape: f32[1,32], index: 9, kind: input, shape index: {}]   ;;  %s4410_s10 = inlined_call_operand.hbm [shape: f32[32,64], index: 10, kind: input, shape index: {}]   ;;  %s4411_s11 = inlined_call_operand.vmem [shape: f32[1,64], index: 11, kind: input, shape index: {}]   ;;  %s4412_s12 = inlined_call_operand.vmem [shape: f32[64,32], index: 12, kind: input, shape index: {}]   ;;  %s4413_s13 = inlined_call_operand.vmem [shape: f32[1,32], index: 13, kind: input, shape index: {}]   ;;  %s4414_s14 = inlined_call_operand.vmem [shape: f32[1,32], index: 14, kind: input, shape index: {}]   ;;  %s4415_s15 = inlined_call_operand.vmem [shape: f32[1,32], index: 15, kind: input, shape index: {}]   ;;  %s4416_s16 = inlined_call_operand.vmem [shape: f32[1,32], index: 16, kind: input, shape index: {}]   ;;  %s4417_s17 = inlined_call_operand.vmem [shape: f32[1,32], index: 17, kind: input, shape index: {}]   ;;  %s4418_s18 = inlined_call_operand.hbm [shape: f32[2,16,32], index: 18, kind: output, shape index: {}]  }
   0x1   :  { %4437 = sst [smem:[#allocation27_spill]] %s4400_s0 }
   0x2   :  { %4438 = sst [smem:[#allocation28_spill]] %s4401_s1 }
   0x3   :  { %4439 = sst [smem:[#allocation29_spill]] %s4402_s2 }
   0x4   :  { %4440 = sst [smem:[#allocation30_spill]] %s4411_s11 }
   0x5   :  { %4441 = sst [smem:[#allocation31_spill]] %s4413_s13 }
   0x6   :  { %4442 = sst [smem:[#allocation32_spill]] %s4415_s15 }
   0x7   :  { %4443 = sst [smem:[#allocation33_spill]] %s4416_s16 }
   0x8   :  { %4444 = sst [smem:[#allocation34_spill]] %s4417_s17 }
   0x9   :  { %4445 = sst [smem:[#allocation35_spill]] %s4418_s18 }
   0xa   :  { %23 = vsyncpa [#allocation5], 0 }
   0xb   :  { %24 = vsyncpa [#allocation8], 0 }
   0xc   :  { %25 = vsyncpa [#allocation11], 0 }
   0xd   :  { %26 = vsyncpa [#allocation6], 0 }
   0xe   :  { %28 = vsyncpa [#allocation6 + $0x1], 0  ;;  %s3809_s27 = smov 0   ;;  %s3811_s28 = smov 0  }
   0xf   :  { %s3813_s29 = smov 0   ;;  %s3815_s30 = smov 0  }
  0x10   :  { %s3817_s0 = smov 0   ;;  %s3819_s19 = smov 0  }
  0x11   :  { %s3821_s1 = smov 0   ;;  %s3823_s20 = smov 0  }
  0x12 LB: > { %4446 = sst [smem:[#allocation17_spill]] %s3661_s27  ;;  %s2986_s21 = sadd.s32 4294967295, %s3689_s20   ;;  %s3689_s20 = sphi %s3823_s20, %s34_s20   ;;  %s3685_s1 = sphi %s3821_s1, %s4488_s1   ;;  %s3681_s19 = sphi %s3819_s19, %s4487_s19   ;;  %s3677_s0 = sphi %s3817_s0, %s4486_s0   ;;  %s3673_s30 = sphi %s3815_s30, %s4485_s30   ;;  %s3669_s29 = sphi %s3813_s29, %s4484_s29   ;;  %s3665_s28 = sphi %s3811_s28, %s4490_s28   ;;  %s3661_s27 = sphi %s3809_s27, %s4489_s27  }
  0x13   : > { %4447 = sst [smem:[#allocation18_spill]] %s3669_s29  ;;  %s2987_s22 = sadd.s32 4294967294, %s3689_s20  }
  0x14   : > { %4448 = sst [smem:[#allocation19_spill]] %s3681_s19  ;;  %s43_s2 = sadd.s32 1, %s3681_s19 }
  0x15   : > { %4449 = sst [smem:[#allocation20_spill]] %s3685_s1  ;;  %s46_s23 = sadd.s32 1, %s3685_s1 }
  0x16   : > { %4450 = sst [smem:[#allocation21_spill]] %s3689_s20  ;;  %p44_p0 = scmp.ge.s32.totalorder %s43_s2, 2 }
  0x17   : > { %s445_s24 = sadd.s32 1, %s3669_s29  ;;  %p455_p1 = scmp.ne.s32.totalorder %s3669_s29, %s3665_s28 }
  0x18   : > { %p456_p2 = scmp.eq.s32.totalorder %s2986_s21, 3  ;;  %s4492_s2 = smov (%p44_p0, %s43_s2), 0 }
  0x19   : > { %4451 = sst [smem:[#allocation22_spill]] %s4492_s2  ;;  %s4494_s23 = smov (!%p44_p0, %s46_s23), %s3685_s1 }
  0x1a   : > { %s441_s25 = ssub.s32 %s3681_s19, %s4492_s2  ;;  %p3861_p3 = por %p456_p2, %p455_p1 }
  0x1b   : > { %p48_p4 = scmp.ge.s32.totalorder %s4494_s23, 2  ;;  %p461_p5 = scmp.ne.s32.totalorder %s3665_s28, %s3661_s27 }
  0x1c   : > { %s4452_s26 = scalar_select %p3861_p3, 1, 0 }
  0x1d   : > { %p462_p6 = scmp.eq.s32.totalorder %s2987_s22, 3  ;;  %p2988_p7 = scmp.ge.s32.totalorder %s3689_s20, 1 }
  0x1e   : > { %4453 = sst [smem:[#allocation23_spill]] %s4452_s26  ;;  %s4496_s23 = smov (%p48_p4, %s4494_s23), 0 }
  0x1f   : > { %4454 = sst [smem:[#allocation24_spill]] %s4496_s23  ;;  %p3870_p8 = por %p462_p6, %p461_p5 }
  0x20   : > { %p469_p9 = scmp.lt.s32.totalorder %s3689_s20, 5  ;;  %s440_s17 = ssub.s32 %s3685_s1, %s4496_s23 }
  0x21   : > { %s4455_s18 = scalar_select %p3870_p8, 1, 0 }
  0x22   : > { %s442_s16 = sor.u32 %s441_s25, %s440_s17  ;;  %p3877_p10 = pnand %p2988_p7, %p469_p9 }
  0x23   : > { %4456 = sst [smem:[#allocation25_spill]] %s4455_s18  ;;  %p443_p11 = scmp.eq.s32.totalorder %s442_s16, 0 }
  0x24   : > { %s4457_s2 = scalar_select %p3877_p10, 1, 0 }
  0x25   : > { %p3881_p12 = scmp.eq.s32.totalorder %s2986_s21, 0  ;;  %p3339_p13 = pneg %p3877_p10 }
  0x26   : > { %s3888_s22 = scalar_select %p443_p11, %s3669_s29, %s445_s24  }
  0x27   : > { %s4458_s19 = scalar_select %p3881_p12, 1, 0 }
  0x28   : > { %4459 = sst [smem:[#allocation26_spill]] %s3888_s22  ;;  %p3892_p0 = pnand %p3881_p12, %p3339_p13 }
  0x29   : > { %s3691_s17 = smov [#allocation7]   ;;  %s3471_s21 = scalar_lea.hbm %s4406_s6, 512 }
  0x2a   : > { %s503_s25 = sshll.u32 %s3691_s17, 4  ;;  %p3472_p1 = scmp.ne.s32.totalorder %s4406_s6, %s3471_s21  ;;  %s504_s25 = int_to_ptr.vmem [resolvable:$true] %s503_s25 }
  0x2b   : > { %p3904_p2 = pneg %p3892_p0  ;;  %p3478_p6 = scmp.lt.u32.totalorder %s3471_s21, %s4406_s6 }
  0x2d   : > { %p3474_p4 = pnand %p3904_p2, %p3472_p1 }
  0x2f   : > { %p3475_p5 = pneg %p3474_p4 }
  0x31   : > { %p3480_p7 = pnand %p3478_p6, %p3475_p5 }
  0x33   : > { %3483 = shalt.err (!%p3480_p7)
}
  0x34   : > { %s3484_s23 = scalar_lea.vmem %s504_s25, 512  ;;  %p3492_p8 = scmp.lt.s32.totalorder %s504_s25, %s504_s25 }
  0x35   : > { %p3485_p9 = scmp.ne.s32.totalorder %s504_s25, %s3484_s23  ;;  %p3493_p3 = scmp.lt.s32.totalorder %s3484_s23, %s3484_s23 }
  0x37   : > { %p3487_p11 = pnand %p3485_p9, %p3904_p2  ;;  %p3494_p12 = por %p3493_p3, %p3492_p8 }
  0x39   : > { %p3488_p13 = pneg %p3487_p11 }
  0x3b   : > { %p3495_p10 = pnand %p3494_p12, %p3488_p13 }
  0x3d   : > { %3498 = shalt.err (!%p3495_p10)
}
  0x3e   : > { %s3692_s27 = smov 128   ;;  %s3693_s1 = smov 8  }
  0x3f   : > { %3345 = dma.hbm_to_vmem [thread:$0]  (!%p3892_p0), %s4406_s6, 512, %s504_s25, [#allocation8], %s3692_s27, %s3692_s27, %s3693_s1  }
  0x40   : > { %s3694_s21 = smov [#allocation4]   ;;  %s3695_s29 = smov [#allocation9]  }
  0x41   : > { %s487_s17 = sshll.u32 %s3694_s21, 4  ;;  %s519_s20 = sshll.u32 %s3695_s29, 4  ;;  %s488_s17 = int_to_ptr.vmem [resolvable:$true] %s487_s17  ;;  %s3923_s20 = int_to_ptr.vmem [resolvable:$true] %s519_s20 }
  0x42   : > { %s3499_s13 = scalar_lea.hbm %s4404_s4, 512 }
  0x43   : > { %p3500_p3 = scmp.ne.s32.totalorder %s4404_s4, %s3499_s13  ;;  %p3506_p12 = scmp.lt.u32.totalorder %s3499_s13, %s4404_s4 }
  0x45   : > { %p3502_p8 = pnand %p3500_p3, %p3904_p2 }
  0x47   : > { %p3503_p10 = pneg %p3502_p8 }
  0x49   : > { %p3508_p1 = pnand %p3506_p12, %p3503_p10 }
  0x4b   : > { %3511 = shalt.err (!%p3508_p1)
}
  0x4c   : > { %s3512_s29 = scalar_lea.vmem %s488_s17, 512  ;;  %p3520_p7 = scmp.lt.s32.totalorder %s488_s17, %s488_s17 }
  0x4d   : > { %p3513_p4 = scmp.ne.s32.totalorder %s488_s17, %s3512_s29  ;;  %p3521_p9 = scmp.lt.s32.totalorder %s3512_s29, %s3512_s29 }
  0x4f   : > { %p3515_p5 = pnand %p3513_p4, %p3904_p2  ;;  %p3522_p11 = por %p3521_p9, %p3520_p7 }
  0x51   : > { %p3516_p6 = pneg %p3515_p5 }
  0x53   : > { %p3523_p13 = pnand %p3522_p11, %p3516_p6 }
  0x55   : > { %3526 = shalt.err (!%p3523_p13)
}
  0x56   : > { %3342 = dma.hbm_to_vmem [thread:$0]  (!%p3892_p0), %s4404_s4, 512, %s488_s17, [#allocation5], %s3692_s27, %s3692_s27, %s3693_s1  }
  0x57   : > { %s3527_s16 = scalar_lea.hbm %s4408_s8, 512 }
  0x58   : > { %p3528_p3 = scmp.ne.s32.totalorder %s4408_s8, %s3527_s16  ;;  %p3534_p12 = scmp.lt.u32.totalorder %s3527_s16, %s4408_s8 }
  0x5a   : > { %p3530_p8 = pnand %p3528_p3, %p3904_p2 }
  0x5c   : > { %p3531_p10 = pneg %p3530_p8 }
  0x5e   : > { %p3536_p1 = pnand %p3534_p12, %p3531_p10 }
  0x60   : > { %3539 = shalt.err (!%p3536_p1)
}
  0x61   : > { %s3540_s17 = scalar_lea.vmem %s3923_s20, 512  ;;  %p3548_p7 = scmp.lt.s32.totalorder %s3923_s20, %s3923_s20 }
  0x62   : > { %p3541_p4 = scmp.ne.s32.totalorder %s3923_s20, %s3540_s17  ;;  %p3549_p9 = scmp.lt.s32.totalorder %s3540_s17, %s3540_s17 }
  0x64   : > { %p3543_p5 = pnand %p3541_p4, %p3904_p2  ;;  %p3550_p11 = por %p3549_p9, %p3548_p7 }
  0x66   : > { %p3544_p6 = pneg %p3543_p5 }
  0x68   : > { %p3551_p13 = pnand %p3550_p11, %p3544_p6 }
  0x6a   : > { %3554 = shalt.err (!%p3551_p13)
}
  0x6b   : > { %3348 = dma.hbm_to_vmem [thread:$0]  (!%p3892_p0), %s4408_s8, 512, %s3923_s20, [#allocation8], %s3692_s27, %s3692_s27, %s3693_s1  }
  0x6c   : > { %s3696_s13 = smov [#allocation10]   ;;  %s3555_s21 = scalar_lea.hbm %s4410_s10, 512 }
  0x6d   : > { %s535_s15 = sshll.u32 %s3696_s13, 4  ;;  %p3556_p3 = scmp.ne.s32.totalorder %s4410_s10, %s3555_s21  ;;  %s536_s15 = int_to_ptr.vmem [resolvable:$true] %s535_s15 }
  0x6e   : > { %p3562_p12 = scmp.lt.u32.totalorder %s3555_s21, %s4410_s10 }
  0x6f   : > { %p3558_p8 = pnand %p3556_p3, %p3904_p2 }
  0x71   : > { %p3559_p10 = pneg %p3558_p8 }
  0x73   : > { %p3564_p1 = pnand %p3562_p12, %p3559_p10 }
  0x75   : > { %3567 = shalt.err (!%p3564_p1)
}
  0x76   : > { %s3568_s20 = scalar_lea.vmem %s536_s15, 512  ;;  %p3576_p7 = scmp.lt.s32.totalorder %s536_s15, %s536_s15 }
  0x77   : > { %p3569_p4 = scmp.ne.s32.totalorder %s536_s15, %s3568_s20  ;;  %p3577_p9 = scmp.lt.s32.totalorder %s3568_s20, %s3568_s20 }
  0x79   : > { %p3571_p5 = pnand %p3569_p4, %p3904_p2  ;;  %p3578_p11 = por %p3577_p9, %p3576_p7 }
  0x7b   : > { %p3572_p6 = pneg %p3571_p5 }
  0x7d   : > { %p3579_p13 = pnand %p3578_p11, %p3572_p6 }
  0x7f   : > { %3582 = shalt.err (!%p3579_p13)
}
  0x80   : > { %3351 = dma.hbm_to_vmem [thread:$0]  (!%p3892_p0), %s4410_s10, 512, %s536_s15, [#allocation11], %s3692_s27, %s3692_s27, %s3693_s1  }
  0x81   : > { %p4462_p3 = scmp.ne.s32.totalorder %s4457_s2, 0 }
  0x82   : > { %p4463_p2 = scmp.ne.s32.totalorder (!%p4462_p3), %s4458_s19, 0 }
  0x83   : > { %591 = sbr.rel (%p4462_p3) target bundleno = 3086 (0xc0e), region = 92 }
  0x8a   : > { %3644 = dma.done.wait (%p4463_p2), [#allocation5], 512  }
  0x8b   : > { %3646 = vsyncadd (%p4463_p2), [#allocation5], 4294966784 }
  0x8c   : > { %3648 = dma.done.wait (%p4463_p2), [#allocation8], 1024  }
  0x8d   : > { %3650 = vsyncadd (%p4463_p2), [#allocation8], 4294966272 }
  0x8e   : > { %3652 = dma.done.wait (%p4463_p2), [#allocation11], 512  }
  0x8f   : > { %3654 = vsyncadd (%p4463_p2), [#allocation11], 4294966784  ;;  %s4436_s18 = sand.u32 1, %s3665_s28   ;;  %p665_p0 = scmp.lt.s32.totalorder %s3677_s0, 1 }
  0x90   : > { %s4011_s2 = sshll.u32 %s4436_s18, 3  ;;  %p667_p8 = scmp.lt.s32.totalorder %s3673_s30, 1 }
  0x91   : > { %s666_s24 = scalar_select %p665_p0, %s3677_s0, 1 }
  0x92   : > { %s668_s27 = scalar_select %p667_p8, %s3673_s30, 1 }
  0x93   : > { %s3000_s1 = sshll.u32 %s666_s24, 1  ;;  %s3056_s13 = sshll.u32 %s666_s24, 4 }
  0x94   : > { %s670_s15 = sadd.s32 %s3000_s1, %s668_s27  ;;  %s4464_s16 = sld [smem:[#allocation28_spill]] }
  0x95   : > { %s3001_s23 = sshll.u32 %s670_s15, 3  ;;  %s4465_s17 = sld [smem:[#allocation27_spill]] }
  0x96   : > { %s664_s29 = scalar_lea.vmem [#allocation12], %s4011_s2  ;;  %p3004_p10 = scmp.ne.s32.totalorder %s3673_s30, 0 }
  0x97   : > { %v684_v0 = vld [vmem:[#allocation4] sm:$0xff] (!%p3004_p10)  ;;  %v685_v1 = vld [vmem:[#allocation4 + $0x8] sm:$0xff] (!%p3004_p10)  ;;  %v686_v2 = vld [vmem:[#allocation4 + $0x10] sm:$0xff] (!%p3004_p10)  ;;  %vm695_vm0 = vcmask (!%p3004_p10), 261120   ;;  %s3697_s27 = smov (!%p3004_p10), 112   ;;  %s3698_s1 = smov (!%p3004_p10), 120   ;;  %v888_v26 = vlaneseq (!%p3004_p10) }
  0x98   : > { %681 = sbr.rel (%p3004_p10) target bundleno = 544 (0x220), region = 112  ;;  %v3247_v3 = vpack.c.bf16 (!%p3004_p10), %v685_v1, %v684_v0  ;;  %v687_v4 = vld [vmem:[#allocation4 + $0x18] sm:$0xff] (!%p3004_p10)  ;;  %v777_v6 = vld [vmem:[#allocation7] sm:$0xff] (!%p3004_p10)  ;;  %v778_v8 = vld [vmem:[#allocation7 + $0x8] sm:$0xff] (!%p3004_p10)  ;;  %s3699_s19 = smov (!%p3004_p10), 104   ;;  %vm1155_vm1 = vcmask (!%p3004_p10), 64512  }
  0x99   : > { %v3251_v7 = vpack.c.bf16 (!%p3004_p10), %v687_v4, %v686_v2  ;;  %v779_v9 = vld [vmem:[#allocation7 + $0x10] sm:$0xff] (!%p3004_p10)  ;;  %v3255_v10 = vpack.c.bf16 (!%p3004_p10), %v778_v8, %v777_v6  ;;  %v780_v11 = vld [vmem:[#allocation7 + $0x18] sm:$0xff] (!%p3004_p10)  ;;  %v3005_v14 = vld [vmem:[%s4405_s5] ss:$0 sm:$0xff] (!%p3004_p10)  ;;  %v3700_v24 = vmov (!%p3004_p10), 1983009808  }
  0x9a   : > { %s677_s21 = scalar_lea.vmem %s4464_s16, %s3056_s13  ;;  %3248 = vmatprep.subr.bf16.mxu0 (!%p3004_p10), %v3247_v3  ;;  %v3259_v12 = vpack.c.bf16 (!%p3004_p10), %v780_v11, %v779_v9  ;;  %v3008_v20 = vld [vmem:[%s4407_s7] ss:$0 sm:$0xff] (!%p3004_p10)  ;;  %v886_v25 = vunpack.c.l.s4 (!%p3004_p10), %v3700_v24  ;;  %v3701_v27 = vmov (!%p3004_p10), 1934713408   ;;  %v889_v30 = vshrl.u32 (!%p3004_p10), %v888_v26, 7 }
  0x9b   : > { %s4022_s20 = scalar_lea.vmem %s4465_s17, %s3001_s23  ;;  %v682_v5 = vld [vmem:[%s677_s21] sm:$0xff] (!%p3004_p10)  ;;  %3250 = vmatpush3.bf16.msra.mxu0 (!%p3004_p10), %v3247_v3  ;;  %3256 = vmatprep.subr.bf16.mxu1 (!%p3004_p10), %v3255_v10  ;;  %v683_v13 = vld [vmem:[%s677_s21 + $0x8] sm:$0xff] (!%p3004_p10)  ;;  %v918_v28 = vunpack.c.l.s4 (!%p3004_p10), %v3701_v27 }
  0x9c   : > { %3125 = vmatprep.mubr.msk.f32.mxu0 (!%p3004_p10), %vm695_vm0, %v682_v5  ;;  %3136 = vmatprep.mubr.msk.f32.mxu1 (!%p3004_p10), %vm695_vm0, %v682_v5  ;;  %v887_v29 = vunpack.c.0.s8 (!%p3004_p10), %v886_v25 }
  0x9d   : > { %3252 = vmatprep.subr.bf16.mxu0 (!%p3004_p10), %v3251_v7  ;;  %3258 = vmatpush3.bf16.msra.mxu1 (!%p3004_p10), %v3255_v10  ;;  %v919_v33 = vunpack.c.0.s8 (!%p3004_p10), %v918_v28 }
  0x9e   : > { %3260 = vmatprep.subr.bf16.mxu1 (!%p3004_p10), %v3259_v12  ;;  %v4051_v34 = vsub.s32 (!%p3004_p10), %v887_v29, %v889_v30 }
  0x9f   : > { %3254 = vmatpush3.bf16.msra.mxu0 %v3251_v7  ;;  %v4053_v41 = vsub.s32 %v919_v33, %v889_v30 }
  0xa1   : > { %3262 = vmatpush3.bf16.msra.mxu1 %v3259_v12 }
  0xa2   : > { %3126 = vmatmul.mubr.msk.f32.vlgmr.msra.gmra.mrb[0].mxu0 %vm695_vm0, %v683_v13 }
  0xa4   : > { %3137 = vmatmul.mubr.msk.f32.vlgmr.msra.gmra.mrb[0].mxu1 %vm695_vm0, %v683_v13 }
 0x175   : > { %v3127_v15 = vpop.f32.mrb[0].mxu0 }
 0x176   : > { %v774_v16 = vadd.f32 %v3127_v15, %v3005_v14  ;;  %v768_v17 = vpop.f32.mrb[1].mxu0 }
 0x177   : > { %v3138_v18 = vpop.f32.mrb[0].mxu1  ;;  %v4036_v21 = vadd.f32 %v3005_v14, %v768_v17 }
 0x178   : > { %873 = vrot.lane.b32.xlu1 %v774_v16, %s3697_s27  ;;  %867 = vrot.lane.b32.xlu0 %v774_v16, %s3698_s1  ;;  %v854_v19 = vpop.f32.mrb[1].mxu1  ;;  %v4038_v22 = vadd.f32 %v3138_v18, %v3008_v20 }
 0x179   : > { %v4043_v23 = vadd.f32 %v3008_v20, %v854_v19 }
 0x17c   : > { %879 = vrot.lane.b32.xlu1 %v774_v16, %s3699_s19  ;;  %865 = vrot.lane.b32.xlu0 %v4036_v21, %s3698_s1 }
 0x180   : > { %1168 = vrot.lane.b32.xlu1 %v4038_v22, %s3698_s1  ;;  %877 = vrot.lane.b32.xlu0 %v4036_v21, %s3699_s19 }
 0x184   : > { %1174 = vrot.lane.b32.xlu1 %v4038_v22, %s3697_s27  ;;  %1166 = vrot.lane.b32.xlu0 %v4043_v23, %s3698_s1 }
 0x188   : > { %871 = vrot.lane.b32.xlu1 %v4036_v21, %s3697_s27  ;;  %1172 = vrot.lane.b32.xlu0 %v4043_v23, %s3697_s27 }
 0x18c   : > { %1180 = vrot.lane.b32.xlu1 %v4038_v22, %s3699_s19  ;;  %1178 = vrot.lane.b32.xlu0 %v4043_v23, %s3699_s19 }
 0x1ea   : > { %v874_v31 = vpop.permute.xlu1 %873  ;;  %v868_v32 = vpop.permute.xlu0 %867 }
 0x1eb   : > { %v951_v35 = vcombine.low %v774_v16, %v874_v31  ;;  %v952_v36 = vcombine.high %v774_v16, %v874_v31 }
 0x1ed   : > { %v959_v42 = vrot.slane %v951_v35, %v4051_v34  ;;  %v966_v43 = vrot.slane %v952_v36, %v4051_v34 }
 0x1ee   : > { %v880_v37 = vpop.permute.xlu1 %879  ;;  %v866_v38 = vpop.permute.xlu0 %865 }
 0x1ef   : > { %v967_v39 = vcombine.low %v868_v32, %v880_v37  ;;  %v968_v40 = vcombine.high %v868_v32, %v880_v37 }
 0x1f1   : > { %v975_v44 = vrot.slane %v967_v39, %v4051_v34  ;;  %v982_v45 = vrot.slane %v968_v40, %v4051_v34 }
 0x1f2   : > { %v4059_v46 = vpop.permute.xlu1 %1168  ;;  %v878_v47 = vpop.permute.xlu0 %877 }
 0x1f3   : > { %v983_v48 = vcombine.low %v959_v42, %v975_v44  ;;  %v984_v49 = vcombine.high %v959_v42, %v975_v44  ;;  %v999_v50 = vcombine.low %v966_v43, %v982_v45  ;;  %v1000_v51 = vcombine.high %v966_v43, %v982_v45 }
 0x1f4   : > { %v899_v56 = vcombine.low %v866_v38, %v878_v47  ;;  %v900_v57 = vcombine.high %v866_v38, %v878_v47 }
 0x1f5   : > { %v991_v52 = vrot.slane %v983_v48, %v4053_v41  ;;  %v998_v53 = vrot.slane %v984_v49, %v4053_v41  ;;  %v1007_v54 = vrot.slane %v999_v50, %v4053_v41  ;;  %v1014_v55 = vrot.slane %v1000_v51, %v4053_v41 }
 0x1f6   : > { %v1175_v58 = vpop.permute.xlu1 %1174  ;;  %v1167_v59 = vpop.permute.xlu0 %1166  ;;  %v907_v6 = vrot.slane %v899_v56, %v4051_v34  ;;  %v914_v7 = vrot.slane %v900_v57, %v4051_v34 }
 0x1f7   : > { %v1087_v60 = vcombine.low %v991_v52, %v998_v53  ;;  %v3013_v61 = vcombine.high %v991_v52, %v998_v53  ;;  %v1103_v62 = vcombine.low %v1007_v54, %v1014_v55  ;;  %v3014_v63 = vcombine.high %v1007_v54, %v1014_v55 }
 0x1f8   : > { %v1252_v0 = vcombine.low %v4038_v22, %v1175_v58  ;;  %v1253_v1 = vcombine.high %v4038_v22, %v1175_v58 }
 0x1f9   : > { %v1094_v2 = vrot.slane %v1087_v60, %v4051_v34  ;;  %v1102_v3 = vrot.slane %v3013_v61, %v4051_v34  ;;  %v1110_v4 = vrot.slane %v1103_v62, %v4051_v34  ;;  %v1118_v5 = vrot.slane %v3014_v63, %v4051_v34 }
 0x1fa   : > { %v1260_v8 = vrot.slane %v1252_v0, %v4051_v34  ;;  %v1267_v9 = vrot.slane %v1253_v1, %v4051_v34  ;;  %v872_v10 = vpop.permute.xlu1 %871  ;;  %v1173_v11 = vpop.permute.xlu0 %1172 }
 0x1fb   : > { %v1119_v12 = vcombine.low %v1094_v2, %v1102_v3  ;;  %v1120_v13 = vcombine.high %v1094_v2, %v1102_v3  ;;  %v1135_v14 = vcombine.low %v1110_v4, %v1118_v5  ;;  %v1136_v15 = vcombine.high %v1110_v4, %v1118_v5 }
 0x1fc   : > { %v883_v16 = vcombine.low %v4036_v21, %v872_v10  ;;  %v884_v17 = vcombine.high %v4036_v21, %v872_v10  ;;  %v1184_v18 = vcombine.low %v4043_v23, %v1173_v11  ;;  %v1185_v19 = vcombine.high %v4043_v23, %v1173_v11 }
 0x1fd   : > { %v1127_v20 = vrot.slane %v1119_v12, %v4053_v41  ;;  %v1134_v22 = vrot.slane %v1120_v13, %v4053_v41  ;;  %v1143_v24 = vrot.slane %v1135_v14, %v4053_v41  ;;  %v1150_v25 = vrot.slane %v1136_v15, %v4053_v41 }
 0x1fe   : > { %v891_v26 = vrot.slane %v883_v16, %v4051_v34  ;;  %v898_v27 = vrot.slane %v884_v17, %v4051_v34  ;;  %v4086_v28 = vrot.slane %v1184_v18, %v4051_v34  ;;  %v4089_v21 = vrot.slane %v1185_v19, %v4051_v34  ;;  %v1181_v29 = vpop.permute.xlu1 %1180  ;;  %v1179_v23 = vpop.permute.xlu0 %1178 }
 0x1ff   : > { %v1151_v30 = vcombine.low %v1127_v20, %v1143_v24  ;;  %v1152_v31 = vcombine.high %v1127_v20, %v1143_v24  ;;  %v1153_v32 = vcombine.low %v1134_v22, %v1150_v25  ;;  %v1154_v33 = vcombine.high %v1134_v22, %v1150_v25 }
 0x200   : > { %v915_v35 = vcombine.low %v891_v26, %v907_v6  ;;  %v916_v36 = vcombine.high %v891_v26, %v907_v6  ;;  %v931_v37 = vcombine.low %v898_v27, %v914_v7  ;;  %v932_v38 = vcombine.high %v898_v27, %v914_v7 }
 0x201   : > { %1157 = vst.msk [vmem:[#allocation2 + $0x8] sm:$0xff] %vm1155_vm1, %v1151_v30  ;;  %1159 = vst.msk [vmem:[#allocation2 + $0x18] sm:$0xff] %vm1155_vm1, %v1152_v31  ;;  %v1268_v39 = vcombine.low %v4059_v46, %v1181_v29  ;;  %v1269_v40 = vcombine.high %v4059_v46, %v1181_v29  ;;  %v1200_v42 = vcombine.low %v1167_v59, %v1179_v23 }
 0x202   : > { %1161 = vst.msk [vmem:[#allocation2 + $0x28] sm:$0xff] %vm1155_vm1, %v1153_v32  ;;  %1163 = vst.msk [vmem:[#allocation2 + $0x38] sm:$0xff] %vm1155_vm1, %v1154_v33  ;;  %v1201_v43 = vcombine.high %v1167_v59, %v1179_v23  ;;  %v923_v44 = vrot.slane %v915_v35, %v4053_v41  ;;  %v930_v45 = vrot.slane %v916_v36, %v4053_v41 }
 0x203   : > { %v939_v47 = vrot.slane %v931_v37, %v4053_v41  ;;  %v946_v48 = vrot.slane %v932_v38, %v4053_v41  ;;  %v1276_v49 = vrot.slane %v1268_v39, %v4051_v34  ;;  %v1283_v50 = vrot.slane %v1269_v40, %v4051_v34 }
 0x204   : > { %v1208_v51 = vrot.slane %v1200_v42, %v4051_v34  ;;  %v1215_v52 = vrot.slane %v1201_v43, %v4051_v34  ;;  %v1019_v53 = vcombine.low %v923_v44, %v930_v45  ;;  %v3011_v46 = vcombine.high %v923_v44, %v930_v45 }
 0x205   : > { %v1035_v54 = vcombine.low %v939_v47, %v946_v48  ;;  %v3012_v55 = vcombine.high %v939_v47, %v946_v48  ;;  %v1284_v56 = vcombine.low %v1260_v8, %v1276_v49  ;;  %v1285_v57 = vcombine.high %v1260_v8, %v1276_v49 }
 0x206   : > { %v1300_v58 = vcombine.low %v1267_v9, %v1283_v50  ;;  %v1301_v59 = vcombine.high %v1267_v9, %v1283_v50  ;;  %v1026_v60 = vrot.slane %v1019_v53, %v4051_v34  ;;  %v1034_v61 = vrot.slane %v3011_v46, %v4051_v34 }
 0x207   : > { %v1042_v62 = vrot.slane %v1035_v54, %v4051_v34  ;;  %v1050_v63 = vrot.slane %v3012_v55, %v4051_v34  ;;  %v1292_v0 = vrot.slane %v1284_v56, %v4053_v41  ;;  %v1299_v1 = vrot.slane %v1285_v57, %v4053_v41 }
 0x208   : > { %v1308_v2 = vrot.slane %v1300_v58, %v4053_v41  ;;  %v1315_v3 = vrot.slane %v1301_v59, %v4053_v41  ;;  %v1051_v4 = vcombine.low %v1026_v60, %v1034_v61  ;;  %v1052_v5 = vcombine.high %v1026_v60, %v1034_v61 }
 0x209   : > { %v1067_v6 = vcombine.low %v1042_v62, %v1050_v63  ;;  %v1068_v7 = vcombine.high %v1042_v62, %v1050_v63  ;;  %v1388_v8 = vcombine.low %v1292_v0, %v1299_v1  ;;  %v3017_v9 = vcombine.high %v1292_v0, %v1299_v1 }
 0x20a   : > { %v1404_v10 = vcombine.low %v1308_v2, %v1315_v3  ;;  %v3018_v11 = vcombine.high %v1308_v2, %v1315_v3  ;;  %v1059_v12 = vrot.slane %v1051_v4, %v4053_v41  ;;  %v1066_v13 = vrot.slane %v1052_v5, %v4053_v41 }
 0x20b   : > { %v1075_v14 = vrot.slane %v1067_v6, %v4053_v41  ;;  %v1082_v15 = vrot.slane %v1068_v7, %v4053_v41  ;;  %v1395_v16 = vrot.slane %v1388_v8, %v4051_v34  ;;  %v1403_v17 = vrot.slane %v3017_v9, %v4051_v34 }
 0x20c   : > { %v1411_v18 = vrot.slane %v1404_v10, %v4051_v34  ;;  %v1419_v19 = vrot.slane %v3018_v11, %v4051_v34  ;;  %v1216_v30 = vcombine.low %v4086_v28, %v1208_v51  ;;  %v1217_v31 = vcombine.high %v4086_v28, %v1208_v51 }
 0x20d   : > { %v1083_v20 = vcombine.low %v1059_v12, %v1075_v14  ;;  %v1084_v22 = vcombine.high %v1059_v12, %v1075_v14  ;;  %v1085_v24 = vcombine.low %v1066_v13, %v1082_v15  ;;  %v1086_v25 = vcombine.high %v1066_v13, %v1082_v15 }
 0x20e   : > { %v1420_v26 = vcombine.low %v1395_v16, %v1403_v17  ;;  %v1421_v27 = vcombine.high %v1395_v16, %v1403_v17  ;;  %v1436_v29 = vcombine.low %v1411_v18, %v1419_v19  ;;  %v1437_v23 = vcombine.high %v1411_v18, %v1419_v19 }
 0x20f   : > { %1156 = vst.msk [vmem:[#allocation2] sm:$0xff] %vm1155_vm1, %v1083_v20  ;;  %1158 = vst.msk [vmem:[#allocation2 + $0x10] sm:$0xff] %vm1155_vm1, %v1084_v22  ;;  %v1232_v32 = vcombine.low %v4089_v21, %v1215_v52  ;;  %v1233_v33 = vcombine.high %v4089_v21, %v1215_v52  ;;  %v1224_v39 = vrot.slane %v1216_v30, %v4053_v41 }
 0x210   : > { %1160 = vst.msk [vmem:[#allocation2 + $0x20] sm:$0xff] %vm1155_vm1, %v1085_v24  ;;  %1162 = vst.msk [vmem:[#allocation2 + $0x30] sm:$0xff] %vm1155_vm1, %v1086_v25  ;;  %v1428_v35 = vrot.slane %v1420_v26, %v4053_v41  ;;  %v1435_v36 = vrot.slane %v1421_v27, %v4053_v41  ;;  %v1444_v37 = vrot.slane %v1436_v29, %v4053_v41 }
 0x211   : > { %v1451_v38 = vrot.slane %v1437_v23, %v4053_v41  ;;  %v1231_v40 = vrot.slane %v1217_v31, %v4053_v41  ;;  %v1240_v42 = vrot.slane %v1232_v32, %v4053_v41  ;;  %v1247_v28 = vrot.slane %v1233_v33, %v4053_v41 }
 0x212   : > { %v1452_v43 = vcombine.low %v1428_v35, %v1444_v37  ;;  %v1453_v44 = vcombine.high %v1428_v35, %v1444_v37 }
 0x213   : > { %v1454_v45 = vcombine.low %v1435_v36, %v1451_v38  ;;  %v1455_v21 = vcombine.high %v1435_v36, %v1451_v38  ;;  %v1320_v47 = vcombine.low %v1224_v39, %v1231_v40  ;;  %v3015_v48 = vcombine.high %v1224_v39, %v1231_v40 }
 0x214   : > { %v1336_v49 = vcombine.low %v1240_v42, %v1247_v28  ;;  %v3016_v50 = vcombine.high %v1240_v42, %v1247_v28  ;;  %1457 = vst.msk [vmem:[#allocation3 + $0x8] sm:$0xff] %vm1155_vm1, %v1452_v43  ;;  %1459 = vst.msk [vmem:[#allocation3 + $0x18] sm:$0xff] %vm1155_vm1, %v1453_v44 }
 0x215   : > { %1461 = vst.msk [vmem:[#allocation3 + $0x28] sm:$0xff] %vm1155_vm1, %v1454_v45  ;;  %1463 = vst.msk [vmem:[#allocation3 + $0x38] sm:$0xff] %vm1155_vm1, %v1455_v21  ;;  %v1327_v51 = vrot.slane %v1320_v47, %v4051_v34  ;;  %v1335_v52 = vrot.slane %v3015_v48, %v4051_v34 }
 0x216   : > { %v1343_v53 = vrot.slane %v1336_v49, %v4051_v34  ;;  %v1351_v46 = vrot.slane %v3016_v50, %v4051_v34 }
 0x217   : > { %v1352_v54 = vcombine.low %v1327_v51, %v1335_v52  ;;  %v1353_v55 = vcombine.high %v1327_v51, %v1335_v52 }
 0x218   : > { %v1368_v56 = vcombine.low %v1343_v53, %v1351_v46  ;;  %v1369_v57 = vcombine.high %v1343_v53, %v1351_v46 }
 0x219   : > { %v1360_v58 = vrot.slane %v1352_v54, %v4053_v41  ;;  %v1367_v59 = vrot.slane %v1353_v55, %v4053_v41 }
 0x21a   : > { %v1376_v60 = vrot.slane %v1368_v56, %v4053_v41  ;;  %v1383_v61 = vrot.slane %v1369_v57, %v4053_v41 }
 0x21c   : > { %v1384_v62 = vcombine.low %v1360_v58, %v1376_v60  ;;  %v1385_v63 = vcombine.high %v1360_v58, %v1376_v60  ;;  %v1386_v0 = vcombine.low %v1367_v59, %v1383_v61  ;;  %v1387_v1 = vcombine.high %v1367_v59, %v1383_v61 }
 0x21e   : > { %1456 = vst.msk [vmem:[#allocation3] sm:$0xff] %vm1155_vm1, %v1384_v62  ;;  %1458 = vst.msk [vmem:[#allocation3 + $0x10] sm:$0xff] %vm1155_vm1, %v1385_v63 }
 0x21f   : > { %1460 = vst.msk [vmem:[#allocation3 + $0x20] sm:$0xff] %vm1155_vm1, %v1386_v0  ;;  %1462 = vst.msk [vmem:[#allocation3 + $0x30] sm:$0xff] %vm1155_vm1, %v1387_v1 }
 0x220 PF: > { %s4466_s21 = sld [smem:[#allocation29_spill]]  ;;  %v3702_v3 = vmov 0.0|0.0   ;;  %vm3703_vm2 = vmmov 0   ;;  %v3704_v6 = vmov 0.0   ;;  %v4173_v8 = vld [vmem:[%s4022_s20] sm:$0xff]  ;;  %vm1476_vm3 = vcmask 261120  }
 0x221   : > { %3263 = vmatprep.subr.bf16.mxu1 %v3702_v3  ;;  %3147 = vmatprep.mubr.msk.f32.mxu1 %vm3703_vm2, %v3704_v6  ;;  %v3019_v9 = vld [vmem:[%s4403_s3] ss:$0 sm:$0xff]  ;;  %v1698_v15 = vld [vmem:[#allocation2 + $0x8] sm:$0xff]  ;;  %v1699_v16 = vld [vmem:[#allocation2 + $0x10] sm:$0xff]  ;;  %vm1705_vm4 = vcmask 64512   ;;  %s3705_s20 = smov 104   ;;  %v1566_v25 = vlaneseq }
 0x222   : > { %3273 = vmatprep.subr.bf16.mxu0 %v3702_v3  ;;  %3161 = vmatprep.mubr.msk.f32.mxu0 %vm3703_vm2, %v3704_v6  ;;  %v1697_v14 = vld [vmem:[#allocation2] sm:$0xff]  ;;  %v1700_v18 = vld [vmem:[#allocation2 + $0x18] sm:$0xff]  ;;  %s3706_s13 = smov 120   ;;  %vm4185_vm5 = vmpackc.low %vm1705_vm4, %vm1705_vm4  ;;  %s3707_s15 = smov 112   ;;  %v3708_v22 = vmov 1983009808  }
 0x223   : > { %v3270_v17 = vpack.c.bf16 %v1698_v15, %v1697_v14  ;;  %v3274_v20 = vpack.c.bf16 %v1700_v18, %v1699_v16  ;;  %v1564_v24 = vunpack.c.l.s4 %v3708_v22  ;;  %v3709_v26 = vmov 1934713408   ;;  %v1701_v60 = vld [vmem:[#allocation2 + $0x20] sm:$0xff]  ;;  %v1702_v63 = vld [vmem:[#allocation2 + $0x28] sm:$0xff]  ;;  %v1703_v0 = vld [vmem:[#allocation2 + $0x30] sm:$0xff]  ;;  %s3710_s19 = smov 16  }
 0x224   : > { %v1596_v27 = vunpack.c.l.s4 %v3709_v26  ;;  %v1567_v23 = vshrl.u32 %v1566_v25, 7  ;;  %v1704_v1 = vld [vmem:[#allocation2 + $0x38] sm:$0xff]  ;;  %vm2022_vm6 = vcmask 130048   ;;  %s3711_s26 = smov 8   ;;  %s3712_s16 = smov 24   ;;  %vm2517_vm7 = vcmask 195584  }
 0x225   : > { %3276 = vmatpush3.bf16.xpose.msk.msra.mxu0 %vm4185_vm5, %v3274_v20  ;;  %v1565_v29 = vunpack.c.0.s8 %v1564_v24  ;;  %s4469_s11 = sld [smem:[#allocation32_spill]]  ;;  %vm2734_vm8 = vcmask 523264   ;;  %s4471_s23 = sld [smem:[#allocation31_spill]] }
 0x226   : > { %v1465_v34 = vld [vmem:[%s4466_s21] sm:$0xff]  ;;  %v1466_v41 = vld [vmem:[%s4466_s21 + $0x8] sm:$0xff]  ;;  %v1467_v2 = vld [vmem:[%s4466_s21 + $0x10] sm:$0xff]  ;;  %3281 = vmatprep.subr.bf16.mxu0 %v3702_v3  ;;  %v1597_v32 = vunpack.c.0.s8 %v1596_v27  ;;  %s3052_s22 = sshll.u32 %s3677_s0, 1  ;;  %s4472_s25 = sld [smem:[#allocation23_spill]] }
 0x227   : > { %v3264_v4 = vpack.c.bf16 %v1466_v41, %v1465_v34  ;;  %v1468_v5 = vld [vmem:[%s4466_s21 + $0x18] sm:$0xff]  ;;  %v4195_v33 = vsub.s32 %v1565_v29, %v1567_v23  ;;  %s2851_s17 = sadd.s32 %s3673_s30, %s3052_s22  ;;  %s4473_s27 = sld [smem:[#allocation33_spill]] }
 0x228   : > { %v3267_v7 = vpack.c.bf16 %v1468_v5, %v1467_v2  ;;  %v4197_v40 = vsub.s32 %v1597_v32, %v1567_v23  ;;  %v3278_v2 = vpack.c.bf16 %v1702_v63, %v1701_v60  ;;  %s4475_s0 = sld [smem:[#allocation35_spill]]  ;;  %s4477_s30 = sand.u32 1, %s3665_s28  }
 0x229   : > { %3265 = vmatpush3.bf16.msra.mxu1 %v3264_v4  ;;  %v3282_v4 = vpack.c.bf16 %v1704_v1, %v1703_v0  ;;  %s2840_s22 = scalar_lea.sflag [#allocation6], %s4477_s30 }
 0x22a   : > { %3266 = vmatprep.subr.bf16.mxu1 %v3702_v3 }
 0x22c   : > { %p4478_p1 = scmp.ne.s32.totalorder %s4472_s25, 0 }
 0x22d   : > { %3268 = vmatpush3.bf16.msra.mxu1 %v3267_v7 }
 0x22e   : > { %3269 = vmatprep.subr.bf16.mxu1 %v3702_v3 }
 0x230   : > { %3148 = vmatmul.mubr.msk.f32.vlgmr.msra.gmra.mrb[0].mxu1 %vm1476_vm3, %v4173_v8 }
 0x231   : > { %3154 = vmatprep.mubr.msk.f32.mxu1 %vm3703_vm2, %v3704_v6 }
 0x236   : > { %3272 = vmatpush3.bf16.xpose.msk.msra.mxu1 %vm4185_vm5, %v3270_v17 }
 0x237   : > { %3277 = vmatprep.subr.bf16.mxu1 %v3702_v3 }
 0x303   : > { %v1546_v10 = vpop.f32.mrb[0].mxu1 }
 0x304   : > { %v1547_v11 = vadd.f32 %v3019_v9, %v1546_v10  ;;  %v3149_v12 = vpop.f32.mrb[1].mxu1 }
 0x306   : > { %v1550_v13 = vmul.f32 0.35355338, %v1547_v11 }
 0x308   : > { %1558 = vrot.lane.b32.xlu1 %v1550_v13, %s3705_s20  ;;  %1552 = vrot.lane.b32.xlu0 %v1550_v13, %s3706_s13  ;;  %s4474_s13 = sld [smem:[#allocation34_spill]] }
 0x30c   : > { %1555 = vrot.lane.b32.xlu0 %v1550_v13, %s3707_s15  ;;  %s3053_s15 = sshll.u32 %s2851_s17, 7 }
 0x30d   : > { %s4342_s18 = scalar_lea.hbm %s4475_s0, %s3053_s15 }
 0x37a   : > { %v1559_v30 = vpop.permute.xlu1 %1558  ;;  %v1553_v31 = vpop.permute.xlu0 %1552 }
 0x37b   : > { %v1577_v35 = vcombine.low %v1553_v31, %v1559_v30  ;;  %v1578_v36 = vcombine.high %v1553_v31, %v1559_v30 }
 0x37d   : > { %v1585_v42 = vrot.slane %v1577_v35, %v4195_v33  ;;  %v1592_v28 = vrot.slane %v1578_v36, %v4195_v33 }
 0x37e   : > { %v1556_v37 = vpop.permute.xlu0 %1555 }
 0x37f   : > { %v1561_v38 = vcombine.low %v1550_v13, %v1556_v37  ;;  %v1562_v39 = vcombine.high %v1550_v13, %v1556_v37 }
 0x381   : > { %v1569_v43 = vrot.slane %v1561_v38, %v4195_v33  ;;  %v1576_v44 = vrot.slane %v1562_v39, %v4195_v33 }
 0x383   : > { %v1593_v45 = vcombine.low %v1569_v43, %v1585_v42  ;;  %v1594_v21 = vcombine.high %v1569_v43, %v1585_v42  ;;  %v1609_v47 = vcombine.low %v1576_v44, %v1592_v28  ;;  %v1610_v48 = vcombine.high %v1576_v44, %v1592_v28 }
 0x385   : > { %v1601_v49 = vrot.slane %v1593_v45, %v4197_v40  ;;  %v1608_v50 = vrot.slane %v1594_v21, %v4197_v40  ;;  %v1617_v51 = vrot.slane %v1609_v47, %v4197_v40  ;;  %v1624_v52 = vrot.slane %v1610_v48, %v4197_v40 }
 0x387   : > { %v1629_v53 = vcombine.low %v1601_v49, %v1608_v50  ;;  %v3021_v46 = vcombine.high %v1601_v49, %v1608_v50  ;;  %v1645_v54 = vcombine.low %v1617_v51, %v1624_v52  ;;  %v3022_v55 = vcombine.high %v1617_v51, %v1624_v52  ;;  %v2067_v52 = vld [vmem:[#allocation3] sm:$0xff] }
 0x389   : > { %v1636_v56 = vrot.slane %v1629_v53, %v4195_v33  ;;  %v1644_v57 = vrot.slane %v3021_v46, %v4195_v33  ;;  %v1652_v58 = vrot.slane %v1645_v54, %v4195_v33  ;;  %v1660_v59 = vrot.slane %v3022_v55, %v4195_v33  ;;  %v2068_v53 = vld [vmem:[#allocation3 + $0x8] sm:$0xff]  ;;  %v2071_v54 = vld [vmem:[#allocation3 + $0x20] sm:$0xff] }
 0x38a   : > { %v3286_v46 = vpack.c.bf16 %v2068_v53, %v2067_v52  ;;  %v2072_v55 = vld [vmem:[#allocation3 + $0x28] sm:$0xff] }
 0x38b   : > { %v1661_v61 = vcombine.low %v1636_v56, %v1644_v57  ;;  %v1677_v62 = vcombine.low %v1652_v58, %v1660_v59  ;;  %v1662_v5 = vcombine.high %v1636_v56, %v1644_v57  ;;  %v1678_v7 = vcombine.high %v1652_v58, %v1660_v59 }
 0x38c   : > { %v3292_v56 = vpack.c.bf16 %v2072_v55, %v2071_v54 }
 0x38d   : > { %v1669_v34 = vrot.slane %v1661_v61, %v4197_v40  ;;  %v1685_v41 = vrot.slane %v1677_v62, %v4197_v40  ;;  %v1676_v11 = vrot.slane %v1662_v5, %v4197_v40  ;;  %v1692_v12 = vrot.slane %v1678_v7, %v4197_v40  ;;  %v2069_v61 = vld [vmem:[#allocation3 + $0x10] sm:$0xff]  ;;  %v2070_v62 = vld [vmem:[#allocation3 + $0x18] sm:$0xff] }
 0x38e   : > { %v3289_v0 = vpack.c.bf16 %v2070_v62, %v2069_v61 }
 0x38f   : > { %v1693_v9 = vcombine.low %v1669_v34, %v1685_v41  ;;  %v1694_v10 = vcombine.high %v1669_v34, %v1685_v41  ;;  %v1695_v13 = vcombine.low %v1676_v11, %v1692_v12  ;;  %v1696_v14 = vcombine.high %v1676_v11, %v1692_v12  ;;  %v2073_v34 = vld [vmem:[#allocation3 + $0x30] sm:$0xff]  ;;  %v2074_v41 = vld [vmem:[#allocation3 + $0x38] sm:$0xff]  ;;  %v2519_v12 = vld [vmem:[#allocation9] sm:$0xff] }
 0x391   : > { %3155 = vmatmul.mubr.msk.f32.vlgmr.msra.gmra.mrb[2].mxu1 %vm1705_vm4, %v1693_v9  ;;  %3162 = vmatmul.mubr.msk.f32.vlgmr.msra.gmra.mrb[0].mxu0 %vm1705_vm4, %v1694_v10 }
 0x392   : > { %3280 = vmatpush3.bf16.xpose.msk.msra.mxu1 %vm4185_vm5, %v3278_v2  ;;  %3284 = vmatpush3.bf16.xpose.msk.msra.mxu0 %vm4185_vm5, %v3282_v4  ;;  %v3295_v4 = vpack.c.bf16 %v2074_v41, %v2073_v34 }
 0x393   : > { %3168 = vmatprep.mubr.msk.f32.mxu1 %vm3703_vm2, %v3704_v6  ;;  %3175 = vmatprep.mubr.msk.f32.mxu0 %vm3703_vm2, %v3704_v6 }
 0x394   : > { %3285 = vmatprep.subr.bf16.mxu1 %v3702_v3  ;;  %3291 = vmatprep.subr.bf16.mxu0 %v3702_v3 }
 0x399   : > { %3169 = vmatmul.mubr.msk.f32.vlgmr.msra.gmra.mrb[4].mxu1 %vm1705_vm4, %v1695_v13  ;;  %3176 = vmatmul.mubr.msk.f32.vlgmr.msra.gmra.mrb[2].mxu0 %vm1705_vm4, %v1696_v14  ;;  %v2520_v13 = vld [vmem:[#allocation9 + $0x8] sm:$0xff] }
 0x39a   : > { %3182 = vmatprep.mubr.msk.f32.mxu1 %vm3703_vm2, %v3704_v6  ;;  %3196 = vmatprep.mubr.msk.f32.mxu0 %vm3703_vm2, %v3704_v6  ;;  %v3298_v14 = vpack.c.bf16 %v2520_v13, %v2519_v12 }
 0x39b   : > { %3287 = vmatpush3.bf16.msra.mxu1 %v3286_v46  ;;  %3293 = vmatpush3.bf16.msra.mxu0 %v3292_v56 }
 0x39c   : > { %3288 = vmatprep.subr.bf16.mxu1 %v3702_v3  ;;  %3297 = vmatprep.subr.bf16.mxu0 %v3702_v3 }
 0x464   : > { %v1781_v15 = vpop.f32.mrb[2].mxu1  ;;  %v1860_v16 = vpop.f32.mrb[0].mxu0 }
 0x465   : > { %v3156_v17 = vpop.f32.mrb[3].mxu1  ;;  %v3163_v18 = vpop.f32.mrb[1].mxu0  ;;  %v2026_v19 = vsel %vm2022_vm6, %v1860_v16, -inf  ;;  %v2023_v20 = vsel %vm2022_vm6, %v1781_v15, -inf }
 0x466   : > { %2027 = vmax.xlane.f32.xlu0 %v2026_v19  ;;  %2024 = vmax.xlane.f32.xlu1 %v2023_v20 }
 0x46c   : > { %v1939_v22 = vpop.f32.mrb[4].mxu1  ;;  %v2018_v24 = vpop.f32.mrb[2].mxu0 }
 0x46d   : > { %v3170_v25 = vpop.f32.mrb[5].mxu1  ;;  %v3177_v26 = vpop.f32.mrb[3].mxu0  ;;  %v2032_v27 = vsel %vm2022_vm6, %v2018_v24, -inf  ;;  %v2029_v29 = vsel %vm2022_vm6, %v1939_v22, -inf }
 0x46e   : > { %2033 = vmax.xlane.f32.xlu1 %v2032_v27  ;;  %2030 = vmax.xlane.f32.xlu0 %v2029_v29 }
 0x4f3   : > { %v2028_v23 = vpop.xlane.xlu0 %2027  ;;  %v2025_v30 = vpop.xlane.xlu1 %2024 }
 0x4f4   : > { %v2036_v31 = vsub.f32 %v1860_v16, %v2028_v23  ;;  %v2035_v32 = vsub.f32 %v1781_v15, %v2025_v30 }
 0x4f6   : > { %v2041_v35 = vmul.f32 1.442695, %v2036_v31  ;;  %v2039_v36 = vmul.f32 1.442695, %v2035_v32 }
 0x4f8   : > { %3451 = vpow2.f32 %v2041_v35 }
 0x4f9   : > { %3453 = vpow2.f32 %v2039_v36 }
 0x4fb   : > { %v2034_v37 = vpop.xlane.xlu1 %2033  ;;  %v2031_v38 = vpop.xlane.xlu0 %2030 }
 0x4fc   : > { %v2038_v39 = vsub.f32 %v2018_v24, %v2034_v37  ;;  %v2037_v42 = vsub.f32 %v1939_v22, %v2031_v38 }
 0x4fe   : > { %v2045_v28 = vmul.f32 1.442695, %v2038_v39  ;;  %v2043_v43 = vmul.f32 1.442695, %v2037_v42  ;;  %v2521_v39 = vld [vmem:[#allocation9 + $0x10] sm:$0xff]  ;;  %v2522_v42 = vld [vmem:[#allocation9 + $0x18] sm:$0xff] }
 0x500   : > { %3455 = vpow2.f32 %v2045_v28 }
 0x501   : > { %3457 = vpow2.f32 %v2043_v43 }
 0x502   : > { %v3452_v44 = vpop.eup %3451 }
 0x503   : > { %v3454_v45 = vpop.eup %3453  ;;  %v2050_v21 = vsel %vm2022_vm6, %v3452_v44, 0.0 }
 0x504   : > { %2051 = vadd.xlane.f32.xlu1 %v2050_v21  ;;  %v2047_v47 = vsel %vm2022_vm6, %v3454_v45, 0.0  ;;  %v3301_v21 = vpack.c.bf16 %v2522_v42, %v2521_v39  ;;  %v3043_v39 = vld [vmem:[%s4414_s14] ss:$0 sm:$0xff] }
 0x505   : > { %2048 = vadd.xlane.f32.xlu0 %v2047_v47 }
 0x50a   : > { %v3456_v48 = vpop.eup %3455 }
 0x50b   : > { %v3458_v49 = vpop.eup %3457  ;;  %v2056_v50 = vsel %vm2022_vm6, %v3456_v48, 0.0 }
 0x50c   : > { %2057 = vadd.xlane.f32.xlu1 %v2056_v50  ;;  %v2053_v51 = vsel %vm2022_vm6, %v3458_v49, 0.0 }
 0x50d   : > { %2054 = vadd.xlane.f32.xlu0 %v2053_v51 }
 0x591   : > { %v2052_v57 = vpop.xlane.xlu1 %2051 }
 0x592   : > { %v2049_v58 = vpop.xlane.xlu0 %2048 }
 0x593   : > { %3459 = vrcp.f32 %v2049_v58 }
 0x594   : > { %3461 = vrcp.f32 %v2052_v57 }
 0x599   : > { %v2058_v59 = vpop.xlane.xlu1 %2057 }
 0x59a   : > { %3463 = vrcp.f32 %v2058_v59  ;;  %v2055_v60 = vpop.xlane.xlu0 %2054 }
 0x59b   : > { %3465 = vrcp.f32 %v2055_v60 }
 0x59d   : > { %v3460_v63 = vpop.eup %3459 }
 0x59e   : > { %v2060_v1 = vmul.f32 %v3460_v63, %v3454_v45  ;;  %v3462_v2 = vpop.eup %3461 }
 0x59f   : > { %v2062_v5 = vmul.f32 %v3462_v2, %v3452_v44 }
 0x5a0   : > { %3183 = vmatmul.mubr.msk.f32.vlgmr.msra.gmra.mrb[6].mxu1 %vm2022_vm6, %v2060_v1 }
 0x5a1   : > { %3290 = vmatpush3.bf16.msra.mxu1 %v3289_v0  ;;  %3189 = vmatprep.mubr.msk.f32.mxu1 %vm3703_vm2, %v3704_v6 }
 0x5a2   : > { %3294 = vmatprep.subr.bf16.mxu1 %v3702_v3 }
 0x5a4   : > { %v3464_v7 = vpop.eup %3463  ;;  %3190 = vmatmul.mubr.msk.f32.vlgmr.msra.gmra.mrb[8].mxu1 %vm2022_vm6, %v2062_v5 }
 0x5a5   : > { %v3466_v9 = vpop.eup %3465  ;;  %v2066_v10 = vmul.f32 %v3464_v7, %v3456_v48  ;;  %3296 = vmatpush3.bf16.msra.mxu1 %v3295_v4  ;;  %3203 = vmatprep.mubr.msk.f32.mxu1 %vm3703_vm2, %v3704_v6 }
 0x5a6   : > { %v2064_v11 = vmul.f32 %v3466_v9, %v3458_v49  ;;  %3303 = vmatprep.subr.bf16.mxu1 %v3702_v3 }
 0x5a8   : > { %3197 = vmatmul.mubr.msk.f32.vlgmr.msra.gmra.mrb[4].mxu0 %vm2022_vm6, %v2064_v11  ;;  %3204 = vmatmul.mubr.msk.f32.vlgmr.msra.gmra.mrb[10].mxu1 %vm2022_vm6, %v2066_v10 }
 0x5a9   : > { %3214 = vmatprep.mubr.msk.f32.mxu0 %vm3703_vm2, %v3704_v6  ;;  %3225 = vmatprep.mubr.msk.f32.mxu1 %vm3703_vm2, %v3704_v6 }
 0x5aa   : > { %3299 = vmatpush3.bf16.msra.mxu0 %v3298_v14 }
 0x5ab   : > { %3300 = vmatprep.subr.bf16.mxu0 %v3702_v3 }
 0x5ae   : > { %3302 = vmatpush3.bf16.msra.mxu0 %v3301_v21 }
 0x5af   : > { %3309 = vmatprep.subr.bf16.mxu0 %v3702_v3 }
 0x673   : > { %v2144_v15 = vpop.f32.mrb[6].mxu1 }
 0x674   : > { %v3184_v16 = vpop.f32.mrb[7].mxu1 }
 0x677   : > { %v2217_v17 = vpop.f32.mrb[8].mxu1 }
 0x678   : > { %v3191_v18 = vpop.f32.mrb[9].mxu1 }
 0x679   : > { %v2635_v18 = vld [vmem:[#allocation10 + $0x8] sm:$0xff] }
 0x67b   : > { %v2290_v19 = vpop.f32.mrb[4].mxu0  ;;  %v2363_v20 = vpop.f32.mrb[10].mxu1 }
 0x67c   : > { %v2367_v22 = vcombine.low %v2144_v15, %v2290_v19  ;;  %v2368_v24 = vcombine.high %v2144_v15, %v2290_v19  ;;  %v3198_v25 = vpop.f32.mrb[5].mxu0  ;;  %v2383_v26 = vcombine.low %v2217_v17, %v2363_v20  ;;  %v2384_v27 = vcombine.high %v2217_v17, %v2363_v20  ;;  %v3205_v29 = vpop.f32.mrb[11].mxu1  ;;  %v2636_v20 = vld [vmem:[#allocation10 + $0x10] sm:$0xff] }
 0x67d   : > { %v2720_v25 = vld [vmem:[%s4412_s12 + $0x8] sm:$0xff]  ;;  %v2722_v29 = vld [vmem:[%s4412_s12 + $0x18] sm:$0xff] }
 0x67e   : > { %v2375_v23 = vrot.slane %v2367_v22, %v4195_v33  ;;  %v2382_v30 = vrot.slane %v2368_v24, %v4195_v33  ;;  %v2391_v31 = vrot.slane %v2383_v26, %v4195_v33  ;;  %v2398_v32 = vrot.slane %v2384_v27, %v4195_v33  ;;  %v2637_v22 = vld [vmem:[#allocation10 + $0x18] sm:$0xff]  ;;  %v2721_v26 = vld [vmem:[%s4412_s12 + $0x10] sm:$0xff] }
 0x67f   : > { %v3307_v24 = vpack.c.bf16 %v2637_v22, %v2636_v20 }
 0x680   : > { %v2399_v35 = vcombine.low %v2375_v23, %v2391_v31  ;;  %v2400_v36 = vcombine.high %v2375_v23, %v2391_v31  ;;  %v2415_v37 = vcombine.low %v2382_v30, %v2398_v32  ;;  %v2416_v38 = vcombine.high %v2382_v30, %v2398_v32  ;;  %v2723_v30 = vld [vmem:[%s4412_s12 + $0x20] sm:$0xff]  ;;  %v2724_v31 = vld [vmem:[%s4412_s12 + $0x28] sm:$0xff] }
 0x681   : > { %v3313_v23 = vpack.c.bf16 %v2722_v29, %v2721_v26  ;;  %v3316_v32 = vpack.c.bf16 %v2724_v31, %v2723_v30 }
 0x682   : > { %v2407_v28 = vrot.slane %v2399_v35, %v4197_v40  ;;  %v2414_v43 = vrot.slane %v2400_v36, %v4197_v40  ;;  %v2423_v44 = vrot.slane %v2415_v37, %v4197_v40  ;;  %v2430_v45 = vrot.slane %v2416_v38, %v4197_v40 }
 0x684   : > { %v2435_v47 = vcombine.low %v2407_v28, %v2414_v43  ;;  %v3039_v48 = vcombine.high %v2407_v28, %v2414_v43  ;;  %v2451_v49 = vcombine.low %v2423_v44, %v2430_v45  ;;  %v3040_v50 = vcombine.high %v2423_v44, %v2430_v45  ;;  %v3044_v28 = vld [vmem:[%s4469_s11] ss:$0 sm:$0xff]  ;;  %v2726_v45 = vld [vmem:[%s4412_s12 + $0x38] sm:$0xff]  ;;  %s3713_s11 = smov [#allocation12]  }
 0x685   : > { %s3587_s24 = sshll.u32 %s3713_s11, 4  ;;  %s3588_s24 = int_to_ptr.vmem [resolvable:$false] %s3587_s24 }
 0x686   : > { %v2442_v51 = vrot.slane %v2435_v47, %v4195_v33  ;;  %v2450_v52 = vrot.slane %v3039_v48, %v4195_v33  ;;  %v2458_v53 = vrot.slane %v2451_v49, %v4195_v33  ;;  %v2466_v46 = vrot.slane %v3040_v50, %v4195_v33 }
 0x688   : > { %v2468_v54 = vcombine.high %v2442_v51, %v2450_v52  ;;  %v2484_v55 = vcombine.high %v2458_v53, %v2466_v46  ;;  %v2467_v56 = vcombine.low %v2442_v51, %v2450_v52  ;;  %v2483_v57 = vcombine.low %v2458_v53, %v2466_v46  ;;  %v3047_v52 = vld [vmem:[%s4471_s23] ss:$0 sm:$0xff]  ;;  %s4476_s23 = smov %s4475_s0 }
 0x68a   : > { %v2482_v58 = vrot.slane %v2468_v54, %v4197_v40  ;;  %v2498_v59 = vrot.slane %v2484_v55, %v4197_v40  ;;  %v2475_v60 = vrot.slane %v2467_v56, %v4197_v40  ;;  %v2491_v61 = vrot.slane %v2483_v57, %v4197_v40  ;;  %v3041_v40 = vld [vmem:[%s4409_s9] ss:$0 sm:$0xff] }
 0x68c   : > { %v2501_v62 = vcombine.low %v2482_v58, %v2498_v59  ;;  %v2500_v63 = vcombine.high %v2475_v60, %v2491_v61  ;;  %v2502_v0 = vcombine.high %v2482_v58, %v2498_v59  ;;  %v2499_v1 = vcombine.low %v2475_v60, %v2491_v61 }
 0x68e   : > { %2508 = vrot.lane.b32.xlu1 %v2501_v62, %s3710_s19  ;;  %2504 = vrot.lane.b32.xlu0 %v2500_v63, %s3711_s26  ;;  %s4470_s19 = sld [smem:[#allocation30_spill]] }
 0x692   : > { %2512 = vrot.lane.b32.xlu1 %v2502_v0, %s3712_s16 }
 0x694   : > { %v3045_v47 = vld [vmem:[%s4470_s19] ss:$0 sm:$0xff]  ;;  %s2855_s19 = sshll.u32 %s664_s29, 4  ;;  %s4344_s19 = int_to_ptr.vmem [resolvable:$true] %s2855_s19 }
 0x695   : > { %s3583_s17 = scalar_lea.vmem %s4344_s19, 128  ;;  %p3590_p6 = scmp.lt.s32.totalorder %s4344_s19, %s3588_s24 }
 0x696   : > { %p3584_p12 = scmp.ne.s32.totalorder %s4344_s19, %s3583_s17 }
 0x698   : > { %p3585_p4 = pnand %p3584_p12, %p4478_p1 }
 0x69a   : > { %p3586_p5 = pneg %p3585_p4 }
 0x700   : > { %v2509_v33 = vpop.permute.xlu1 %2508  ;;  %v2505_v34 = vpop.permute.xlu0 %2504 }
 0x701   : > { %v2515_v41 = vsel %vm1705_vm4, %v2499_v1, %v2505_v34 }
 0x702   : > { %v2516_v4 = vsel %vm2022_vm6, %v2515_v41, %v2509_v33  ;;  %v3049_v33 = vld [vmem:[%s4473_s27] ss:$0 sm:$0xff]  ;;  %s3589_s27 = scalar_lea.vmem %s3588_s24, 256 }
 0x703   : > { %v3050_v41 = vld [vmem:[%s4474_s13] ss:$0 sm:$0xff]  ;;  %p3591_p7 = scmp.lt.s32.totalorder %s3589_s27, %s3583_s17 }
 0x704   : > { %v2513_v2 = vpop.permute.xlu1 %2512 }
 0x705   : > { %v2518_v5 = vsel %vm2517_vm7, %v2516_v4, %v2513_v2  ;;  %p3592_p9 = por %p3591_p7, %p3590_p6 }
 0x706   : > { %3215 = vmatmul.mubr.msk.f32.vlgmr.msra.gmra.mrb[6].mxu0 %vm1476_vm3, %v2518_v5 }
 0x707   : > { %3244 = vmatprep.mubr.msk.f32.mxu0 %vm3703_vm2, %v3704_v6  ;;  %v2634_v6 = vld [vmem:[#allocation10] sm:$0xff]  ;;  %p3593_p11 = pnand %p3592_p9, %p3586_p5 }
 0x708   : > { %v3304_v19 = vpack.c.bf16 %v2635_v18, %v2634_v6 }
 0x70a   : > { %3305 = vmatpush3.bf16.msra.mxu1 %v3304_v19 }
 0x70b   : > { %3306 = vmatprep.subr.bf16.mxu1 %v3702_v3 }
 0x70e   : > { %3308 = vmatpush3.bf16.msra.mxu1 %v3307_v24 }
 0x7d9   : > { %v2599_v7 = vpop.f32.mrb[6].mxu0 }
 0x7da   : > { %v2600_v9 = vadd.f32 %v3041_v40, %v2599_v7  ;;  %v3216_v10 = vpop.f32.mrb[7].mxu0 }
 0x7dc   : > { %v2603_v11 = vadd.f32 %v2600_v9, %v4173_v8  ;;  %v2719_v8 = vld [vmem:[%s4412_s12] sm:$0xff] }
 0x7dd   : > { %v3310_v27 = vpack.c.bf16 %v2720_v25, %v2719_v8 }
 0x7de   : > { %v2604_v12 = vsel %vm1476_vm3, %v2603_v11, 0.0 }
 0x7df   : > { %2605 = vadd.xlane.f32.xlu0 %v2604_v12  ;;  %3311 = vmatpush3.bf16.msra.mxu0 %v3310_v27 }
 0x7e0   : > { %3312 = vmatprep.subr.bf16.mxu0 %v3702_v3 }
 0x7e3   : > { %3314 = vmatpush3.bf16.msra.mxu0 %v3313_v23 }
 0x7e4   : > { %3315 = vmatprep.subr.bf16.mxu0 %v3702_v3 }
 0x7e7   : > { %3317 = vmatpush3.bf16.msra.mxu0 %v3316_v32 }
 0x7e8   : > { %3318 = vmatprep.subr.bf16.mxu0 %v3702_v3  ;;  %v2725_v3 = vld [vmem:[%s4412_s12 + $0x30] sm:$0xff] }
 0x7e9   : > { %v3319_v21 = vpack.c.bf16 %v2726_v45, %v2725_v3 }
 0x7eb   : > { %3320 = vmatpush3.bf16.msra.mxu0 %v3319_v21 }
 0x86c   : > { %v2606_v13 = vpop.xlane.xlu0 %2605 }
 0x86d   : > { %v2608_v14 = vmul.f32 0.03125, %v2606_v13 }
 0x86f   : > { %v2609_v15 = vsub.f32 %v2603_v11, %v2608_v14 }
 0x871   : > { %v2610_v16 = vmul.f32 %v2609_v15, %v2609_v15 }
 0x873   : > { %v2611_v17 = vsel %vm1476_vm3, %v2610_v16, 0.0 }
 0x874   : > { %2612 = vadd.xlane.f32.xlu1 %v2611_v17 }
 0x901   : > { %v2613_v35 = vpop.xlane.xlu1 %2612 }
 0x902   : > { %v2614_v36 = vmul.f32 0.03125, %v2613_v35 }
 0x904   : > { %v2615_v37 = vadd.f32 1e-05, %v2614_v36 }
 0x906   : > { %3467 = vrsqrt.f32 %v2615_v37 }
 0x910   : > { %v3468_v38 = vpop.eup %3467 }
 0x911   : > { %v2617_v42 = vmul.f32 %v3468_v38, %v2609_v15 }
 0x913   : > { %v2625_v43 = vmul.f32 %v3043_v39, %v2617_v42 }
 0x915   : > { %v2633_v44 = vadd.f32 %v3044_v28, %v2625_v43 }
 0x917   : > { %3226 = vmatmul.mubr.msk.f32.vlgmr.msra.gmra.mrb[12].mxu1 %vm1476_vm3, %v2633_v44 }
 0x9ea   : > { %v2714_v48 = vpop.f32.mrb[12].mxu1 }
 0x9eb   : > { %v2715_v49 = vadd.f32 %v3045_v47, %v2714_v48  ;;  %v3227_v50 = vpop.f32.mrb[13].mxu1 }
 0x9ed   : > { %v2718_v51 = vmax.f32 %v2715_v49, 0.0 }
 0x9ef   : > { %3245 = vmatmul.mubr.msk.f32.vlgmr.msra.gmra.mrb[8].mxu0 %vm2734_vm8, %v2718_v51 }
 0xac2   : > { %v2804_v53 = vpop.f32.mrb[8].mxu0 }
 0xac3   : > { %v2805_v46 = vadd.f32 %v3047_v52, %v2804_v53  ;;  %v3246_v54 = vpop.f32.mrb[9].mxu0 }
 0xac5   : > { %v2808_v55 = vadd.f32 %v2805_v46, %v2633_v44 }
 0xac7   : > { %v2809_v56 = vsel %vm1476_vm3, %v2808_v55, 0.0 }
 0xac8   : > { %2810 = vadd.xlane.f32.xlu0 %v2809_v56 }
 0xb55   : > { %v2811_v57 = vpop.xlane.xlu0 %2810 }
 0xb56   : > { %v2812_v58 = vmul.f32 0.03125, %v2811_v57 }
 0xb58   : > { %v2813_v59 = vsub.f32 %v2808_v55, %v2812_v58 }
 0xb5a   : > { %v2814_v60 = vmul.f32 %v2813_v59, %v2813_v59 }
 0xb5c   : > { %v2815_v61 = vsel %vm1476_vm3, %v2814_v60, 0.0 }
 0xb5d   : > { %2816 = vadd.xlane.f32.xlu0 %v2815_v61 }
 0xbea   : > { %v2817_v62 = vpop.xlane.xlu0 %2816 }
 0xbeb   : > { %v2818_v63 = vmul.f32 0.03125, %v2817_v62 }
 0xbed   : > { %v2819_v0 = vadd.f32 1e-05, %v2818_v63 }
 0xbef   : > { %3469 = vrsqrt.f32 %v2819_v0 }
 0xbf9   : > { %v3470_v1 = vpop.eup %3469 }
 0xbfa   : > { %v2821_v34 = vmul.f32 %v3470_v1, %v2813_v59 }
 0xbfc   : > { %v2829_v2 = vmul.f32 %v3049_v33, %v2821_v34 }
 0xbfe   : > { %v2837_v4 = vadd.f32 %v3050_v41, %v2829_v2 }
 0xc00   : > { %2838 = vst.msk [vmem:[%s664_s29] sm:$0xff] %vm1476_vm3, %v2837_v4 }
 0xc01   : > { %3596 = shalt.err (!%p3593_p11)
}
 0xc02   : > { %s3597_s2 = scalar_lea.hbm %s4342_s18, 128  ;;  %s3601_s20 = scalar_lea.hbm %s4476_s23, 512 }
 0xc03   : > { %p3598_p13 = scmp.ne.s32.totalorder %s4342_s18, %s3597_s2  ;;  %p3602_p0 = scmp.lt.u32.totalorder %s4342_s18, %s4476_s23 }
 0xc04   : > { %p3603_p8 = scmp.lt.u32.totalorder %s3601_s20, %s3597_s2  ;;  %p3605_p12 = scmp.lt.u32.totalorder %s3597_s2, %s4342_s18 }
 0xc05   : > { %p3599_p3 = pnand %p3598_p13, %p4478_p1 }
 0xc06   : > { %p3604_p10 = por %p3603_p8, %p3602_p0 }
 0xc07   : > { %p3600_p2 = pneg %p3599_p3 }
 0xc08   : > { %p3606_p4 = por %p3605_p12, %p3604_p10 }
 0xc0a   : > { %p3607_p5 = pnand %p3606_p4, %p3600_p2 }
 0xc0c   : > { %3610 = shalt.err (!%p3607_p5)
}
 0xc0d   : > { %3337 = dma.vmem_to_hbm [thread:$0]  (%p4478_p1), %s4344_s19, 128, %s4342_s18, %s2840_s22  }
 0xc0e PF: > { %s4479_s26 = sld [smem:[#allocation21_spill]]  ;;  %s4480_s16 = sld [smem:[#allocation17_spill]] }
 0xc0f   : > { %s4481_s0 = sld [smem:[#allocation25_spill]] }
 0xc14   : > { %p3364_p6 = scmp.ge.s32.totalorder %s4479_s26, 2  ;;  %s2867_s30 = sand.u32 1, %s4480_s16  }
 0xc15   : > { %p4482_p7 = scmp.ne.s32.totalorder %s4481_s0, 0  ;;  %s2868_s17 = scalar_lea.sflag [#allocation6], %s2867_s30 }
 0xc17   : > { %p3353_p9 = pnand %p3364_p6, %p4482_p7 }
 0xc19   : > { %3656 = dma.done.wait (!%p3353_p9), %s2868_s17, 128  }
 0xc1a   : > { %3658 = vsyncadd (!%p3353_p9), %s2868_s17, 4294967168  ;;  %s34_s20 = sadd.s32 1, %s4479_s26   ;;  %s4483_s11 = sld [smem:[#allocation18_spill]] }
 0xc1b   : > { %p31_p11 = scmp.ge.s32.totalorder %s34_s20, 6   ;;  %s4484_s29 = sld [smem:[#allocation26_spill]] }
 0xc1c   : > { %s4485_s30 = sld [smem:[#allocation19_spill]]  ;;  %s4486_s0 = sld [smem:[#allocation20_spill]] }
 0xc1d   : > { %s4487_s19 = sld [smem:[#allocation22_spill]]  ;;  %s4488_s1 = sld [smem:[#allocation24_spill]] }
 0xc1e   : > { %s4489_s27 = smov %s3665_s28  ;;  %33 = sbr.rel (!%p31_p11) target bundleno = 18 (0x12), region = 151 }
 0xc20   : > { %s4490_s28 = smov %s4483_s11 }
 0xc25   :  { %2873 = vsyncpa [#allocation5], 1 }
 0xc26   :  { %2875 = vsyncpa [#allocation5 + $0x1], 1 }
 0xc27   :  { %2876 = vsyncpa [#allocation8], 1 }
 0xc28   :  { %2877 = vsyncpa [#allocation11], 1 }
 0xc29   :  { %2878 = vsyncpa [#allocation6], 1 }
 0xc2a   :  { %2880 = vsyncpa [#allocation6 + $0x1], 1 }

// kernel: tpu_custom_call.1
= control target key start
LH: loop header
LB: loop body
LE: loop exit
PB: predicated region body
PF: predicated region fallthrough
CT: control target
= control target key end

     0   :  { %s4400_s0 = inlined_call_operand.vmem [shape: f32[2,16,32], index: 0, kind: input, shape index: {}]   ;;  %s4401_s1 = inlined_call_operand.vmem [shape: f32[2,16,32], index: 1, kind: input, shape index: {}]   ;;  %s4402_s2 = inlined_call_operand.vmem [shape: f32[32,32], index: 2, kind: input, shape index: {}]   ;;  %s4403_s3 = inlined_call_operand.vmem [shape: f32[1,32], index: 3, kind: input, shape index: {}]   ;;  %s4404_s4 = inlined_call_operand.hbm [shape: f32[32,32], index: 4, kind: input, shape index: {}]   ;;  %s4405_s5 = inlined_call_operand.vmem [shape: f32[1,32], index: 5, kind: input, shape index: {}]   ;;  %s4406_s6 = inlined_call_operand.hbm [shape: f32[32,32], index: 6, kind: input, shape index: {}]   ;;  %s4407_s7 = inlined_call_operand.vmem [shape: f32[1,32], index: 7, kind: input, shape index: {}]   ;;  %s4408_s8 = inlined_call_operand.hbm [shape: f32[32,32], index: 8, kind: input, shape index: {}]   ;;  %s4409_s9 = inlined_call_operand.vmem [shape: f32[1,32], index: 9, kind: input, shape index: {}]   ;;  %s4410_s10 = inlined_call_operand.hbm [shape: f32[32,64], index: 10, kind: input, shape index: {}]   ;;  %s4411_s11 = inlined_call_operand.vmem [shape: f32[1,64], index: 11, kind: input, shape index: {}]   ;;  %s4412_s12 = inlined_call_operand.vmem [shape: f32[64,32], index: 12, kind: input, shape index: {}]   ;;  %s4413_s13 = inlined_call_operand.vmem [shape: f32[1,32], index: 13, kind: input, shape index: {}]   ;;  %s4414_s14 = inlined_call_operand.vmem [shape: f32[1,32], index: 14, kind: input, shape index: {}]   ;;  %s4415_s15 = inlined_call_operand.vmem [shape: f32[1,32], index: 15, kind: input, shape index: {}]   ;;  %s4416_s16 = inlined_call_operand.vmem [shape: f32[1,32], index: 16, kind: input, shape index: {}]   ;;  %s4417_s17 = inlined_call_operand.vmem [shape: f32[1,32], index: 17, kind: input, shape index: {}]   ;;  %s4418_s18 = inlined_call_operand.hbm [shape: f32[2,16,32], index: 18, kind: output, shape index: {}]  }
   0x1   :  { %4437 = sst [smem:[#allocation27_spill]] %s4400_s0 }
   0x2   :  { %4438 = sst [smem:[#allocation28_spill]] %s4401_s1 }
   0x3   :  { %4439 = sst [smem:[#allocation29_spill]] %s4402_s2 }
   0x4   :  { %4440 = sst [smem:[#allocation30_spill]] %s4411_s11 }
   0x5   :  { %4441 = sst [smem:[#allocation31_spill]] %s4413_s13 }
   0x6   :  { %4442 = sst [smem:[#allocation32_spill]] %s4415_s15 }
   0x7   :  { %4443 = sst [smem:[#allocation33_spill]] %s4416_s16 }
   0x8   :  { %4444 = sst [smem:[#allocation34_spill]] %s4417_s17 }
   0x9   :  { %4445 = sst [smem:[#allocation35_spill]] %s4418_s18 }
   0xa   :  { %23 = vsyncpa [#allocation5], 0 }
   0xb   :  { %24 = vsyncpa [#allocation8], 0 }
   0xc   :  { %25 = vsyncpa [#allocation11], 0 }
   0xd   :  { %26 = vsyncpa [#allocation6], 0 }
   0xe   :  { %28 = vsyncpa [#allocation6 + $0x1], 0  ;;  %s3809_s27 = smov 0   ;;  %s3811_s28 = smov 0  }
   0xf   :  { %s3813_s29 = smov 0   ;;  %s3815_s30 = smov 0  }
  0x10   :  { %s3817_s0 = smov 0   ;;  %s3819_s19 = smov 0  }
  0x11   :  { %s3821_s1 = smov 0   ;;  %s3823_s20 = smov 0  }
  0x12 LB: > { %4446 = sst [smem:[#allocation17_spill]] %s3661_s27  ;;  %s2986_s21 = sadd.s32 4294967295, %s3689_s20   ;;  %s3689_s20 = sphi %s3823_s20, %s34_s20   ;;  %s3685_s1 = sphi %s3821_s1, %s4488_s1   ;;  %s3681_s19 = sphi %s3819_s19, %s4487_s19   ;;  %s3677_s0 = sphi %s3817_s0, %s4486_s0   ;;  %s3673_s30 = sphi %s3815_s30, %s4485_s30   ;;  %s3669_s29 = sphi %s3813_s29, %s4484_s29   ;;  %s3665_s28 = sphi %s3811_s28, %s4490_s28   ;;  %s3661_s27 = sphi %s3809_s27, %s4489_s27  }
  0x13   : > { %4447 = sst [smem:[#allocation18_spill]] %s3669_s29  ;;  %s2987_s22 = sadd.s32 4294967294, %s3689_s20  }
  0x14   : > { %4448 = sst [smem:[#allocation19_spill]] %s3681_s19  ;;  %s43_s2 = sadd.s32 1, %s3681_s19 }
  0x15   : > { %4449 = sst [smem:[#allocation20_spill]] %s3685_s1  ;;  %s46_s23 = sadd.s32 1, %s3685_s1 }
  0x16   : > { %4450 = sst [smem:[#allocation21_spill]] %s3689_s20  ;;  %p44_p0 = scmp.ge.s32.totalorder %s43_s2, 2 }
  0x17   : > { %s445_s24 = sadd.s32 1, %s3669_s29  ;;  %p455_p1 = scmp.ne.s32.totalorder %s3669_s29, %s3665_s28 }
  0x18   : > { %p456_p2 = scmp.eq.s32.totalorder %s2986_s21, 3  ;;  %s4492_s2 = smov (%p44_p0, %s43_s2), 0 }
  0x19   : > { %4451 = sst [smem:[#allocation22_spill]] %s4492_s2  ;;  %s4494_s23 = smov (!%p44_p0, %s46_s23), %s3685_s1 }
  0x1a   : > { %s441_s25 = ssub.s32 %s3681_s19, %s4492_s2  ;;  %p3861_p3 = por %p456_p2, %p455_p1 }
  0x1b   : > { %p48_p4 = scmp.ge.s32.totalorder %s4494_s23, 2  ;;  %p461_p5 = scmp.ne.s32.totalorder %s3665_s28, %s3661_s27 }
  0x1c   : > { %s4452_s26 = scalar_select %p3861_p3, 1, 0 }
  0x1d   : > { %p462_p6 = scmp.eq.s32.totalorder %s2987_s22, 3  ;;  %p2988_p7 = scmp.ge.s32.totalorder %s3689_s20, 1 }
  0x1e   : > { %4453 = sst [smem:[#allocation23_spill]] %s4452_s26  ;;  %s4496_s23 = smov (%p48_p4, %s4494_s23), 0 }
  0x1f   : > { %4454 = sst [smem:[#allocation24_spill]] %s4496_s23  ;;  %p3870_p8 = por %p462_p6, %p461_p5 }
  0x20   : > { %p469_p9 = scmp.lt.s32.totalorder %s3689_s20, 5  ;;  %s440_s17 = ssub.s32 %s3685_s1, %s4496_s23 }
  0x21   : > { %s4455_s18 = scalar_select %p3870_p8, 1, 0 }
  0x22   : > { %s442_s16 = sor.u32 %s441_s25, %s440_s17  ;;  %p3877_p10 = pnand %p2988_p7, %p469_p9 }
  0x23   : > { %4456 = sst [smem:[#allocation25_spill]] %s4455_s18  ;;  %p443_p11 = scmp.eq.s32.totalorder %s442_s16, 0 }
  0x24   : > { %s4457_s2 = scalar_select %p3877_p10, 1, 0 }
  0x25   : > { %p3881_p12 = scmp.eq.s32.totalorder %s2986_s21, 0  ;;  %p3339_p13 = pneg %p3877_p10 }
  0x26   : > { %s3888_s22 = scalar_select %p443_p11, %s3669_s29, %s445_s24  }
  0x27   : > { %s4458_s19 = scalar_select %p3881_p12, 1, 0 }
  0x28   : > { %4459 = sst [smem:[#allocation26_spill]] %s3888_s22  ;;  %p3892_p0 = pnand %p3881_p12, %p3339_p13 }
  0x29   : > { %s3691_s17 = smov [#allocation7]   ;;  %s3471_s21 = scalar_lea.hbm %s4406_s6, 512 }
  0x2a   : > { %s503_s25 = sshll.u32 %s3691_s17, 4  ;;  %p3472_p1 = scmp.ne.s32.totalorder %s4406_s6, %s3471_s21  ;;  %s504_s25 = int_to_ptr.vmem [resolvable:$true] %s503_s25 }
  0x2b   : > { %p3904_p2 = pneg %p3892_p0  ;;  %p3478_p6 = scmp.lt.u32.totalorder %s3471_s21, %s4406_s6 }
  0x2d   : > { %p3474_p4 = pnand %p3904_p2, %p3472_p1 }
  0x2f   : > { %p3475_p5 = pneg %p3474_p4 }
  0x31   : > { %p3480_p7 = pnand %p3478_p6, %p3475_p5 }
  0x33   : > { %3483 = shalt.err (!%p3480_p7)
}
  0x34   : > { %s3484_s23 = scalar_lea.vmem %s504_s25, 512  ;;  %p3492_p8 = scmp.lt.s32.totalorder %s504_s25, %s504_s25 }
  0x35   : > { %p3485_p9 = scmp.ne.s32.totalorder %s504_s25, %s3484_s23  ;;  %p3493_p3 = scmp.lt.s32.totalorder %s3484_s23, %s3484_s23 }
  0x37   : > { %p3487_p11 = pnand %p3485_p9, %p3904_p2  ;;  %p3494_p12 = por %p3493_p3, %p3492_p8 }
  0x39   : > { %p3488_p13 = pneg %p3487_p11 }
  0x3b   : > { %p3495_p10 = pnand %p3494_p12, %p3488_p13 }
  0x3d   : > { %3498 = shalt.err (!%p3495_p10)
}
  0x3e   : > { %s3692_s27 = smov 128   ;;  %s3693_s1 = smov 8  }
  0x3f   : > { %3345 = dma.hbm_to_vmem [thread:$0]  (!%p3892_p0), %s4406_s6, 512, %s504_s25, [#allocation8], %s3692_s27, %s3692_s27, %s3693_s1  }
  0x40   : > { %s3694_s21 = smov [#allocation4]   ;;  %s3695_s29 = smov [#allocation9]  }
  0x41   : > { %s487_s17 = sshll.u32 %s3694_s21, 4  ;;  %s519_s20 = sshll.u32 %s3695_s29, 4  ;;  %s488_s17 = int_to_ptr.vmem [resolvable:$true] %s487_s17  ;;  %s3923_s20 = int_to_ptr.vmem [resolvable:$true] %s519_s20 }
  0x42   : > { %s3499_s13 = scalar_lea.hbm %s4404_s4, 512 }
  0x43   : > { %p3500_p3 = scmp.ne.s32.totalorder %s4404_s4, %s3499_s13  ;;  %p3506_p12 = scmp.lt.u32.totalorder %s3499_s13, %s4404_s4 }
  0x45   : > { %p3502_p8 = pnand %p3500_p3, %p3904_p2 }
  0x47   : > { %p3503_p10 = pneg %p3502_p8 }
  0x49   : > { %p3508_p1 = pnand %p3506_p12, %p3503_p10 }
  0x4b   : > { %3511 = shalt.err (!%p3508_p1)
}
  0x4c   : > { %s3512_s29 = scalar_lea.vmem %s488_s17, 512  ;;  %p3520_p7 = scmp.lt.s32.totalorder %s488_s17, %s488_s17 }
  0x4d   : > { %p3513_p4 = scmp.ne.s32.totalorder %s488_s17, %s3512_s29  ;;  %p3521_p9 = scmp.lt.s32.totalorder %s3512_s29, %s3512_s29 }
  0x4f   : > { %p3515_p5 = pnand %p3513_p4, %p3904_p2  ;;  %p3522_p11 = por %p3521_p9, %p3520_p7 }
  0x51   : > { %p3516_p6 = pneg %p3515_p5 }
  0x53   : > { %p3523_p13 = pnand %p3522_p11, %p3516_p6 }
  0x55   : > { %3526 = shalt.err (!%p3523_p13)
}
  0x56   : > { %3342 = dma.hbm_to_vmem [thread:$0]  (!%p3892_p0), %s4404_s4, 512, %s488_s17, [#allocation5], %s3692_s27, %s3692_s27, %s3693_s1  }
  0x57   : > { %s3527_s16 = scalar_lea.hbm %s4408_s8, 512 }
  0x58   : > { %p3528_p3 = scmp.ne.s32.totalorder %s4408_s8, %s3527_s16  ;;  %p3534_p12 = scmp.lt.u32.totalorder %s3527_s16, %s4408_s8 }
  0x5a   : > { %p3530_p8 = pnand %p3528_p3, %p3904_p2 }
  0x5c   : > { %p3531_p10 = pneg %p3530_p8 }
  0x5e   : > { %p3536_p1 = pnand %p3534_p12, %p3531_p10 }
  0x60   : > { %3539 = shalt.err (!%p3536_p1)
}
  0x61   : > { %s3540_s17 = scalar_lea.vmem %s3923_s20, 512  ;;  %p3548_p7 = scmp.lt.s32.totalorder %s3923_s20, %s3923_s20 }
  0x62   : > { %p3541_p4 = scmp.ne.s32.totalorder %s3923_s20, %s3540_s17  ;;  %p3549_p9 = scmp.lt.s32.totalorder %s3540_s17, %s3540_s17 }
  0x64   : > { %p3543_p5 = pnand %p3541_p4, %p3904_p2  ;;  %p3550_p11 = por %p3549_p9, %p3548_p7 }
  0x66   : > { %p3544_p6 = pneg %p3543_p5 }
  0x68   : > { %p3551_p13 = pnand %p3550_p11, %p3544_p6 }
  0x6a   : > { %3554 = shalt.err (!%p3551_p13)
}
  0x6b   : > { %3348 = dma.hbm_to_vmem [thread:$0]  (!%p3892_p0), %s4408_s8, 512, %s3923_s20, [#allocation8], %s3692_s27, %s3692_s27, %s3693_s1  }
  0x6c   : > { %s3696_s13 = smov [#allocation10]   ;;  %s3555_s21 = scalar_lea.hbm %s4410_s10, 512 }
  0x6d   : > { %s535_s15 = sshll.u32 %s3696_s13, 4  ;;  %p3556_p3 = scmp.ne.s32.totalorder %s4410_s10, %s3555_s21  ;;  %s536_s15 = int_to_ptr.vmem [resolvable:$true] %s535_s15 }
  0x6e   : > { %p3562_p12 = scmp.lt.u32.totalorder %s3555_s21, %s4410_s10 }
  0x6f   : > { %p3558_p8 = pnand %p3556_p3, %p3904_p2 }
  0x71   : > { %p3559_p10 = pneg %p3558_p8 }
  0x73   : > { %p3564_p1 = pnand %p3562_p12, %p3559_p10 }
  0x75   : > { %3567 = shalt.err (!%p3564_p1)
}
  0x76   : > { %s3568_s20 = scalar_lea.vmem %s536_s15, 512  ;;  %p3576_p7 = scmp.lt.s32.totalorder %s536_s15, %s536_s15 }
  0x77   : > { %p3569_p4 = scmp.ne.s32.totalorder %s536_s15, %s3568_s20  ;;  %p3577_p9 = scmp.lt.s32.totalorder %s3568_s20, %s3568_s20 }
  0x79   : > { %p3571_p5 = pnand %p3569_p4, %p3904_p2  ;;  %p3578_p11 = por %p3577_p9, %p3576_p7 }
  0x7b   : > { %p3572_p6 = pneg %p3571_p5 }
  0x7d   : > { %p3579_p13 = pnand %p3578_p11, %p3572_p6 }
  0x7f   : > { %3582 = shalt.err (!%p3579_p13)
}
  0x80   : > { %3351 = dma.hbm_to_vmem [thread:$0]  (!%p3892_p0), %s4410_s10, 512, %s536_s15, [#allocation11], %s3692_s27, %s3692_s27, %s3693_s1  }
  0x81   : > { %p4462_p3 = scmp.ne.s32.totalorder %s4457_s2, 0 }
  0x82   : > { %p4463_p2 = scmp.ne.s32.totalorder (!%p4462_p3), %s4458_s19, 0 }
  0x83   : > { %591 = sbr.rel (%p4462_p3) target bundleno = 3086 (0xc0e), region = 92 }
  0x8a   : > { %3644 = dma.done.wait (%p4463_p2), [#allocation5], 512  }
  0x8b   : > { %3646 = vsyncadd (%p4463_p2), [#allocation5], 4294966784 }
  0x8c   : > { %3648 = dma.done.wait (%p4463_p2), [#allocation8], 1024  }
  0x8d   : > { %3650 = vsyncadd (%p4463_p2), [#allocation8], 4294966272 }
  0x8e   : > { %3652 = dma.done.wait (%p4463_p2), [#allocation11], 512  }
  0x8f   : > { %3654 = vsyncadd (%p4463_p2), [#allocation11], 4294966784  ;;  %s4436_s18 = sand.u32 1, %s3665_s28   ;;  %p665_p0 = scmp.lt.s32.totalorder %s3677_s0, 1 }
  0x90   : > { %s4011_s2 = sshll.u32 %s4436_s18, 3  ;;  %p667_p8 = scmp.lt.s32.totalorder %s3673_s30, 1 }
  0x91   : > { %s666_s24 = scalar_select %p665_p0, %s3677_s0, 1 }
  0x92   : > { %s668_s27 = scalar_select %p667_p8, %s3673_s30, 1 }
  0x93   : > { %s3000_s1 = sshll.u32 %s666_s24, 1  ;;  %s3056_s13 = sshll.u32 %s666_s24, 4 }
  0x94   : > { %s670_s15 = sadd.s32 %s3000_s1, %s668_s27  ;;  %s4464_s16 = sld [smem:[#allocation28_spill]] }
  0x95   : > { %s3001_s23 = sshll.u32 %s670_s15, 3  ;;  %s4465_s17 = sld [smem:[#allocation27_spill]] }
  0x96   : > { %s664_s29 = scalar_lea.vmem [#allocation12], %s4011_s2  ;;  %p3004_p10 = scmp.ne.s32.totalorder %s3673_s30, 0 }
  0x97   : > { %v684_v0 = vld [vmem:[#allocation4] sm:$0xff] (!%p3004_p10)  ;;  %v685_v1 = vld [vmem:[#allocation4 + $0x8] sm:$0xff] (!%p3004_p10)  ;;  %v686_v2 = vld [vmem:[#allocation4 + $0x10] sm:$0xff] (!%p3004_p10)  ;;  %vm695_vm0 = vcmask (!%p3004_p10), 261120   ;;  %s3697_s27 = smov (!%p3004_p10), 112   ;;  %s3698_s1 = smov (!%p3004_p10), 120   ;;  %v888_v26 = vlaneseq (!%p3004_p10) }
  0x98   : > { %681 = sbr.rel (%p3004_p10) target bundleno = 544 (0x220), region = 112  ;;  %v3247_v3 = vpack.c.bf16 (!%p3004_p10), %v685_v1, %v684_v0  ;;  %v687_v4 = vld [vmem:[#allocation4 + $0x18] sm:$0xff] (!%p3004_p10)  ;;  %v777_v6 = vld [vmem:[#allocation7] sm:$0xff] (!%p3004_p10)  ;;  %v778_v8 = vld [vmem:[#allocation7 + $0x8] sm:$0xff] (!%p3004_p10)  ;;  %s3699_s19 = smov (!%p3004_p10), 104   ;;  %vm1155_vm1 = vcmask (!%p3004_p10), 64512  }
  0x99   : > { %v3251_v7 = vpack.c.bf16 (!%p3004_p10), %v687_v4, %v686_v2  ;;  %v779_v9 = vld [vmem:[#allocation7 + $0x10] sm:$0xff] (!%p3004_p10)  ;;  %v3255_v10 = vpack.c.bf16 (!%p3004_p10), %v778_v8, %v777_v6  ;;  %v780_v11 = vld [vmem:[#allocation7 + $0x18] sm:$0xff] (!%p3004_p10)  ;;  %v3005_v14 = vld [vmem:[%s4405_s5] ss:$0 sm:$0xff] (!%p3004_p10)  ;;  %v3700_v24 = vmov (!%p3004_p10), 1983009808  }
  0x9a   : > { %s677_s21 = scalar_lea.vmem %s4464_s16, %s3056_s13  ;;  %3248 = vmatprep.subr.bf16.mxu0 (!%p3004_p10), %v3247_v3  ;;  %v3259_v12 = vpack.c.bf16 (!%p3004_p10), %v780_v11, %v779_v9  ;;  %v3008_v20 = vld [vmem:[%s4407_s7] ss:$0 sm:$0xff] (!%p3004_p10)  ;;  %v886_v25 = vunpack.c.l.s4 (!%p3004_p10), %v3700_v24  ;;  %v3701_v27 = vmov (!%p3004_p10), 1934713408   ;;  %v889_v30 = vshrl.u32 (!%p3004_p10), %v888_v26, 7 }
  0x9b   : > { %s4022_s20 = scalar_lea.vmem %s4465_s17, %s3001_s23  ;;  %v682_v5 = vld [vmem:[%s677_s21] sm:$0xff] (!%p3004_p10)  ;;  %3250 = vmatpush3.bf16.msra.mxu0 (!%p3004_p10), %v3247_v3  ;;  %3256 = vmatprep.subr.bf16.mxu1 (!%p3004_p10), %v3255_v10  ;;  %v683_v13 = vld [vmem:[%s677_s21 + $0x8] sm:$0xff] (!%p3004_p10)  ;;  %v918_v28 = vunpack.c.l.s4 (!%p3004_p10), %v3701_v27 }
  0x9c   : > { %3125 = vmatprep.mubr.msk.f32.mxu0 (!%p3004_p10), %vm695_vm0, %v682_v5  ;;  %3136 = vmatprep.mubr.msk.f32.mxu1 (!%p3004_p10), %vm695_vm0, %v682_v5  ;;  %v887_v29 = vunpack.c.0.s8 (!%p3004_p10), %v886_v25 }
  0x9d   : > { %3252 = vmatprep.subr.bf16.mxu0 (!%p3004_p10), %v3251_v7  ;;  %3258 = vmatpush3.bf16.msra.mxu1 (!%p3004_p10), %v3255_v10  ;;  %v919_v33 = vunpack.c.0.s8 (!%p3004_p10), %v918_v28 }
  0x9e   : > { %3260 = vmatprep.subr.bf16.mxu1 (!%p3004_p10), %v3259_v12  ;;  %v4051_v34 = vsub.s32 (!%p3004_p10), %v887_v29, %v889_v30 }
  0x9f   : > { %3254 = vmatpush3.bf16.msra.mxu0 %v3251_v7  ;;  %v4053_v41 = vsub.s32 %v919_v33, %v889_v30 }
  0xa1   : > { %3262 = vmatpush3.bf16.msra.mxu1 %v3259_v12 }
  0xa2   : > { %3126 = vmatmul.mubr.msk.f32.vlgmr.msra.gmra.mrb[0].mxu0 %vm695_vm0, %v683_v13 }
  0xa4   : > { %3137 = vmatmul.mubr.msk.f32.vlgmr.msra.gmra.mrb[0].mxu1 %vm695_vm0, %v683_v13 }
 0x175   : > { %v3127_v15 = vpop.f32.mrb[0].mxu0 }
 0x176   : > { %v774_v16 = vadd.f32 %v3127_v15, %v3005_v14  ;;  %v768_v17 = vpop.f32.mrb[1].mxu0 }
 0x177   : > { %v3138_v18 = vpop.f32.mrb[0].mxu1  ;;  %v4036_v21 = vadd.f32 %v3005_v14, %v768_v17 }
 0x178   : > { %873 = vrot.lane.b32.xlu1 %v774_v16, %s3697_s27  ;;  %867 = vrot.lane.b32.xlu0 %v774_v16, %s3698_s1  ;;  %v854_v19 = vpop.f32.mrb[1].mxu1  ;;  %v4038_v22 = vadd.f32 %v3138_v18, %v3008_v20 }
 0x179   : > { %v4043_v23 = vadd.f32 %v3008_v20, %v854_v19 }
 0x17c   : > { %879 = vrot.lane.b32.xlu1 %v774_v16, %s3699_s19  ;;  %865 = vrot.lane.b32.xlu0 %v4036_v21, %s3698_s1 }
 0x180   : > { %1168 = vrot.lane.b32.xlu1 %v4038_v22, %s3698_s1  ;;  %877 = vrot.lane.b32.xlu0 %v4036_v21, %s3699_s19 }
 0x184   : > { %1174 = vrot.lane.b32.xlu1 %v4038_v22, %s3697_s27  ;;  %1166 = vrot.lane.b32.xlu0 %v4043_v23, %s3698_s1 }
 0x188   : > { %871 = vrot.lane.b32.xlu1 %v4036_v21, %s3697_s27  ;;  %1172 = vrot.lane.b32.xlu0 %v4043_v23, %s3697_s27 }
 0x18c   : > { %1180 = vrot.lane.b32.xlu1 %v4038_v22, %s3699_s19  ;;  %1178 = vrot.lane.b32.xlu0 %v4043_v23, %s3699_s19 }
 0x1ea   : > { %v874_v31 = vpop.permute.xlu1 %873  ;;  %v868_v32 = vpop.permute.xlu0 %867 }
 0x1eb   : > { %v951_v35 = vcombine.low %v774_v16, %v874_v31  ;;  %v952_v36 = vcombine.high %v774_v16, %v874_v31 }
 0x1ed   : > { %v959_v42 = vrot.slane %v951_v35, %v4051_v34  ;;  %v966_v43 = vrot.slane %v952_v36, %v4051_v34 }
 0x1ee   : > { %v880_v37 = vpop.permute.xlu1 %879  ;;  %v866_v38 = vpop.permute.xlu0 %865 }
 0x1ef   : > { %v967_v39 = vcombine.low %v868_v32, %v880_v37  ;;  %v968_v40 = vcombine.high %v868_v32, %v880_v37 }
 0x1f1   : > { %v975_v44 = vrot.slane %v967_v39, %v4051_v34  ;;  %v982_v45 = vrot.slane %v968_v40, %v4051_v34 }
 0x1f2   : > { %v4059_v46 = vpop.permute.xlu1 %1168  ;;  %v878_v47 = vpop.permute.xlu0 %877 }
 0x1f3   : > { %v983_v48 = vcombine.low %v959_v42, %v975_v44  ;;  %v984_v49 = vcombine.high %v959_v42, %v975_v44  ;;  %v999_v50 = vcombine.low %v966_v43, %v982_v45  ;;  %v1000_v51 = vcombine.high %v966_v43, %v982_v45 }
 0x1f4   : > { %v899_v56 = vcombine.low %v866_v38, %v878_v47  ;;  %v900_v57 = vcombine.high %v866_v38, %v878_v47 }
 0x1f5   : > { %v991_v52 = vrot.slane %v983_v48, %v4053_v41  ;;  %v998_v53 = vrot.slane %v984_v49, %v4053_v41  ;;  %v1007_v54 = vrot.slane %v999_v50, %v4053_v41  ;;  %v1014_v55 = vrot.slane %v1000_v51, %v4053_v41 }
 0x1f6   : > { %v1175_v58 = vpop.permute.xlu1 %1174  ;;  %v1167_v59 = vpop.permute.xlu0 %1166  ;;  %v907_v6 = vrot.slane %v899_v56, %v4051_v34  ;;  %v914_v7 = vrot.slane %v900_v57, %v4051_v34 }
 0x1f7   : > { %v1087_v60 = vcombine.low %v991_v52, %v998_v53  ;;  %v3013_v61 = vcombine.high %v991_v52, %v998_v53  ;;  %v1103_v62 = vcombine.low %v1007_v54, %v1014_v55  ;;  %v3014_v63 = vcombine.high %v1007_v54, %v1014_v55 }
 0x1f8   : > { %v1252_v0 = vcombine.low %v4038_v22, %v1175_v58  ;;  %v1253_v1 = vcombine.high %v4038_v22, %v1175_v58 }
 0x1f9   : > { %v1094_v2 = vrot.slane %v1087_v60, %v4051_v34  ;;  %v1102_v3 = vrot.slane %v3013_v61, %v4051_v34  ;;  %v1110_v4 = vrot.slane %v1103_v62, %v4051_v34  ;;  %v1118_v5 = vrot.slane %v3014_v63, %v4051_v34 }
 0x1fa   : > { %v1260_v8 = vrot.slane %v1252_v0, %v4051_v34  ;;  %v1267_v9 = vrot.slane %v1253_v1, %v4051_v34  ;;  %v872_v10 = vpop.permute.xlu1 %871  ;;  %v1173_v11 = vpop.permute.xlu0 %1172 }
 0x1fb   : > { %v1119_v12 = vcombine.low %v1094_v2, %v1102_v3  ;;  %v1120_v13 = vcombine.high %v1094_v2, %v1102_v3  ;;  %v1135_v14 = vcombine.low %v1110_v4, %v1118_v5  ;;  %v1136_v15 = vcombine.high %v1110_v4, %v1118_v5 }
 0x1fc   : > { %v883_v16 = vcombine.low %v4036_v21, %v872_v10  ;;  %v884_v17 = vcombine.high %v4036_v21, %v872_v10  ;;  %v1184_v18 = vcombine.low %v4043_v23, %v1173_v11  ;;  %v1185_v19 = vcombine.high %v4043_v23, %v1173_v11 }
 0x1fd   : > { %v1127_v20 = vrot.slane %v1119_v12, %v4053_v41  ;;  %v1134_v22 = vrot.slane %v1120_v13, %v4053_v41  ;;  %v1143_v24 = vrot.slane %v1135_v14, %v4053_v41  ;;  %v1150_v25 = vrot.slane %v1136_v15, %v4053_v41 }
 0x1fe   : > { %v891_v26 = vrot.slane %v883_v16, %v4051_v34  ;;  %v898_v27 = vrot.slane %v884_v17, %v4051_v34  ;;  %v4086_v28 = vrot.slane %v1184_v18, %v4051_v34  ;;  %v4089_v21 = vrot.slane %v1185_v19, %v4051_v34  ;;  %v1181_v29 = vpop.permute.xlu1 %1180  ;;  %v1179_v23 = vpop.permute.xlu0 %1178 }
 0x1ff   : > { %v1151_v30 = vcombine.low %v1127_v20, %v1143_v24  ;;  %v1152_v31 = vcombine.high %v1127_v20, %v1143_v24  ;;  %v1153_v32 = vcombine.low %v1134_v22, %v1150_v25  ;;  %v1154_v33 = vcombine.high %v1134_v22, %v1150_v25 }
 0x200   : > { %v915_v35 = vcombine.low %v891_v26, %v907_v6  ;;  %v916_v36 = vcombine.high %v891_v26, %v907_v6  ;;  %v931_v37 = vcombine.low %v898_v27, %v914_v7  ;;  %v932_v38 = vcombine.high %v898_v27, %v914_v7 }
 0x201   : > { %1157 = vst.msk [vmem:[#allocation2 + $0x8] sm:$0xff] %vm1155_vm1, %v1151_v30  ;;  %1159 = vst.msk [vmem:[#allocation2 + $0x18] sm:$0xff] %vm1155_vm1, %v1152_v31  ;;  %v1268_v39 = vcombine.low %v4059_v46, %v1181_v29  ;;  %v1269_v40 = vcombine.high %v4059_v46, %v1181_v29  ;;  %v1200_v42 = vcombine.low %v1167_v59, %v1179_v23 }
 0x202   : > { %1161 = vst.msk [vmem:[#allocation2 + $0x28] sm:$0xff] %vm1155_vm1, %v1153_v32  ;;  %1163 = vst.msk [vmem:[#allocation2 + $0x38] sm:$0xff] %vm1155_vm1, %v1154_v33  ;;  %v1201_v43 = vcombine.high %v1167_v59, %v1179_v23  ;;  %v923_v44 = vrot.slane %v915_v35, %v4053_v41  ;;  %v930_v45 = vrot.slane %v916_v36, %v4053_v41 }
 0x203   : > { %v939_v47 = vrot.slane %v931_v37, %v4053_v41  ;;  %v946_v48 = vrot.slane %v932_v38, %v4053_v41  ;;  %v1276_v49 = vrot.slane %v1268_v39, %v4051_v34  ;;  %v1283_v50 = vrot.slane %v1269_v40, %v4051_v34 }
 0x204   : > { %v1208_v51 = vrot.slane %v1200_v42, %v4051_v34  ;;  %v1215_v52 = vrot.slane %v1201_v43, %v4051_v34  ;;  %v1019_v53 = vcombine.low %v923_v44, %v930_v45  ;;  %v3011_v46 = vcombine.high %v923_v44, %v930_v45 }
 0x205   : > { %v1035_v54 = vcombine.low %v939_v47, %v946_v48  ;;  %v3012_v55 = vcombine.high %v939_v47, %v946_v48  ;;  %v1284_v56 = vcombine.low %v1260_v8, %v1276_v49  ;;  %v1285_v57 = vcombine.high %v1260_v8, %v1276_v49 }
 0x206   : > { %v1300_v58 = vcombine.low %v1267_v9, %v1283_v50  ;;  %v1301_v59 = vcombine.high %v1267_v9, %v1283_v50  ;;  %v1026_v60 = vrot.slane %v1019_v53, %v4051_v34  ;;  %v1034_v61 = vrot.slane %v3011_v46, %v4051_v34 }
 0x207   : > { %v1042_v62 = vrot.slane %v1035_v54, %v4051_v34  ;;  %v1050_v63 = vrot.slane %v3012_v55, %v4051_v34  ;;  %v1292_v0 = vrot.slane %v1284_v56, %v4053_v41  ;;  %v1299_v1 = vrot.slane %v1285_v57, %v4053_v41 }
 0x208   : > { %v1308_v2 = vrot.slane %v1300_v58, %v4053_v41  ;;  %v1315_v3 = vrot.slane %v1301_v59, %v4053_v41  ;;  %v1051_v4 = vcombine.low %v1026_v60, %v1034_v61  ;;  %v1052_v5 = vcombine.high %v1026_v60, %v1034_v61 }
 0x209   : > { %v1067_v6 = vcombine.low %v1042_v62, %v1050_v63  ;;  %v1068_v7 = vcombine.high %v1042_v62, %v1050_v63  ;;  %v1388_v8 = vcombine.low %v1292_v0, %v1299_v1  ;;  %v3017_v9 = vcombine.high %v1292_v0, %v1299_v1 }
 0x20a   : > { %v1404_v10 = vcombine.low %v1308_v2, %v1315_v3  ;;  %v3018_v11 = vcombine.high %v1308_v2, %v1315_v3  ;;  %v1059_v12 = vrot.slane %v1051_v4, %v4053_v41  ;;  %v1066_v13 = vrot.slane %v1052_v5, %v4053_v41 }
 0x20b   : > { %v1075_v14 = vrot.slane %v1067_v6, %v4053_v41  ;;  %v1082_v15 = vrot.slane %v1068_v7, %v4053_v41  ;;  %v1395_v16 = vrot.slane %v1388_v8, %v4051_v34  ;;  %v1403_v17 = vrot.slane %v3017_v9, %v4051_v34 }
 0x20c   : > { %v1411_v18 = vrot.slane %v1404_v10, %v4051_v34  ;;  %v1419_v19 = vrot.slane %v3018_v11, %v4051_v34  ;;  %v1216_v30 = vcombine.low %v4086_v28, %v1208_v51  ;;  %v1217_v31 = vcombine.high %v4086_v28, %v1208_v51 }
 0x20d   : > { %v1083_v20 = vcombine.low %v1059_v12, %v1075_v14  ;;  %v1084_v22 = vcombine.high %v1059_v12, %v1075_v14  ;;  %v1085_v24 = vcombine.low %v1066_v13, %v1082_v15  ;;  %v1086_v25 = vcombine.high %v1066_v13, %v1082_v15 }
 0x20e   : > { %v1420_v26 = vcombine.low %v1395_v16, %v1403_v17  ;;  %v1421_v27 = vcombine.high %v1395_v16, %v1403_v17  ;;  %v1436_v29 = vcombine.low %v1411_v18, %v1419_v19  ;;  %v1437_v23 = vcombine.high %v1411_v18, %v1419_v19 }
 0x20f   : > { %1156 = vst.msk [vmem:[#allocation2] sm:$0xff] %vm1155_vm1, %v1083_v20  ;;  %1158 = vst.msk [vmem:[#allocation2 + $0x10] sm:$0xff] %vm1155_vm1, %v1084_v22  ;;  %v1232_v32 = vcombine.low %v4089_v21, %v1215_v52  ;;  %v1233_v33 = vcombine.high %v4089_v21, %v1215_v52  ;;  %v1224_v39 = vrot.slane %v1216_v30, %v4053_v41 }
 0x210   : > { %1160 = vst.msk [vmem:[#allocation2 + $0x20] sm:$0xff] %vm1155_vm1, %v1085_v24  ;;  %1162 = vst.msk [vmem:[#allocation2 + $0x30] sm:$0xff] %vm1155_vm1, %v1086_v25  ;;  %v1428_v35 = vrot.slane %v1420_v26, %v4053_v41  ;;  %v1435_v36 = vrot.slane %v1421_v27, %v4053_v41  ;;  %v1444_v37 = vrot.slane %v1436_v29, %v4053_v41 }
 0x211   : > { %v1451_v38 = vrot.slane %v1437_v23, %v4053_v41  ;;  %v1231_v40 = vrot.slane %v1217_v31, %v4053_v41  ;;  %v1240_v42 = vrot.slane %v1232_v32, %v4053_v41  ;;  %v1247_v28 = vrot.slane %v1233_v33, %v4053_v41 }
 0x212   : > { %v1452_v43 = vcombine.low %v1428_v35, %v1444_v37  ;;  %v1453_v44 = vcombine.high %v1428_v35, %v1444_v37 }
 0x213   : > { %v1454_v45 = vcombine.low %v1435_v36, %v1451_v38  ;;  %v1455_v21 = vcombine.high %v1435_v36, %v1451_v38  ;;  %v1320_v47 = vcombine.low %v1224_v39, %v1231_v40  ;;  %v3015_v48 = vcombine.high %v1224_v39, %v1231_v40 }
 0x214   : > { %v1336_v49 = vcombine.low %v1240_v42, %v1247_v28  ;;  %v3016_v50 = vcombine.high %v1240_v42, %v1247_v28  ;;  %1457 = vst.msk [vmem:[#allocation3 + $0x8] sm:$0xff] %vm1155_vm1, %v1452_v43  ;;  %1459 = vst.msk [vmem:[#allocation3 + $0x18] sm:$0xff] %vm1155_vm1, %v1453_v44 }
 0x215   : > { %1461 = vst.msk [vmem:[#allocation3 + $0x28] sm:$0xff] %vm1155_vm1, %v1454_v45  ;;  %1463 = vst.msk [vmem:[#allocation3 + $0x38] sm:$0xff] %vm1155_vm1, %v1455_v21  ;;  %v1327_v51 = vrot.slane %v1320_v47, %v4051_v34  ;;  %v1335_v52 = vrot.slane %v3015_v48, %v4051_v34 }
 0x216   : > { %v1343_v53 = vrot.slane %v1336_v49, %v4051_v34  ;;  %v1351_v46 = vrot.slane %v3016_v50, %v4051_v34 }
 0x217   : > { %v1352_v54 = vcombine.low %v1327_v51, %v1335_v52  ;;  %v1353_v55 = vcombine.high %v1327_v51, %v1335_v52 }
 0x218   : > { %v1368_v56 = vcombine.low %v1343_v53, %v1351_v46  ;;  %v1369_v57 = vcombine.high %v1343_v53, %v1351_v46 }
 0x219   : > { %v1360_v58 = vrot.slane %v1352_v54, %v4053_v41  ;;  %v1367_v59 = vrot.slane %v1353_v55, %v4053_v41 }
 0x21a   : > { %v1376_v60 = vrot.slane %v1368_v56, %v4053_v41  ;;  %v1383_v61 = vrot.slane %v1369_v57, %v4053_v41 }
 0x21c   : > { %v1384_v62 = vcombine.low %v1360_v58, %v1376_v60  ;;  %v1385_v63 = vcombine.high %v1360_v58, %v1376_v60  ;;  %v1386_v0 = vcombine.low %v1367_v59, %v1383_v61  ;;  %v1387_v1 = vcombine.high %v1367_v59, %v1383_v61 }
 0x21e   : > { %1456 = vst.msk [vmem:[#allocation3] sm:$0xff] %vm1155_vm1, %v1384_v62  ;;  %1458 = vst.msk [vmem:[#allocation3 + $0x10] sm:$0xff] %vm1155_vm1, %v1385_v63 }
 0x21f   : > { %1460 = vst.msk [vmem:[#allocation3 + $0x20] sm:$0xff] %vm1155_vm1, %v1386_v0  ;;  %1462 = vst.msk [vmem:[#allocation3 + $0x30] sm:$0xff] %vm1155_vm1, %v1387_v1 }
 0x220 PF: > { %s4466_s21 = sld [smem:[#allocation29_spill]]  ;;  %v3702_v3 = vmov 0.0|0.0   ;;  %vm3703_vm2 = vmmov 0   ;;  %v3704_v6 = vmov 0.0   ;;  %v4173_v8 = vld [vmem:[%s4022_s20] sm:$0xff]  ;;  %vm1476_vm3 = vcmask 261120  }
 0x221   : > { %3263 = vmatprep.subr.bf16.mxu1 %v3702_v3  ;;  %3147 = vmatprep.mubr.msk.f32.mxu1 %vm3703_vm2, %v3704_v6  ;;  %v3019_v9 = vld [vmem:[%s4403_s3] ss:$0 sm:$0xff]  ;;  %v1698_v15 = vld [vmem:[#allocation2 + $0x8] sm:$0xff]  ;;  %v1699_v16 = vld [vmem:[#allocation2 + $0x10] sm:$0xff]  ;;  %vm1705_vm4 = vcmask 64512   ;;  %s3705_s20 = smov 104   ;;  %v1566_v25 = vlaneseq }
 0x222   : > { %3273 = vmatprep.subr.bf16.mxu0 %v3702_v3  ;;  %3161 = vmatprep.mubr.msk.f32.mxu0 %vm3703_vm2, %v3704_v6  ;;  %v1697_v14 = vld [vmem:[#allocation2] sm:$0xff]  ;;  %v1700_v18 = vld [vmem:[#allocation2 + $0x18] sm:$0xff]  ;;  %s3706_s13 = smov 120   ;;  %vm4185_vm5 = vmpackc.low %vm1705_vm4, %vm1705_vm4  ;;  %s3707_s15 = smov 112   ;;  %v3708_v22 = vmov 1983009808  }
 0x223   : > { %v3270_v17 = vpack.c.bf16 %v1698_v15, %v1697_v14  ;;  %v3274_v20 = vpack.c.bf16 %v1700_v18, %v1699_v16  ;;  %v1564_v24 = vunpack.c.l.s4 %v3708_v22  ;;  %v3709_v26 = vmov 1934713408   ;;  %v1701_v60 = vld [vmem:[#allocation2 + $0x20] sm:$0xff]  ;;  %v1702_v63 = vld [vmem:[#allocation2 + $0x28] sm:$0xff]  ;;  %v1703_v0 = vld [vmem:[#allocation2 + $0x30] sm:$0xff]  ;;  %s3710_s19 = smov 16  }
 0x224   : > { %v1596_v27 = vunpack.c.l.s4 %v3709_v26  ;;  %v1567_v23 = vshrl.u32 %v1566_v25, 7  ;;  %v1704_v1 = vld [vmem:[#allocation2 + $0x38] sm:$0xff]  ;;  %vm2022_vm6 = vcmask 130048   ;;  %s3711_s26 = smov 8   ;;  %s3712_s16 = smov 24   ;;  %vm2517_vm7 = vcmask 195584  }
 0x225   : > { %3276 = vmatpush3.bf16.xpose.msk.msra.mxu0 %vm4185_vm5, %v3274_v20  ;;  %v1565_v29 = vunpack.c.0.s8 %v1564_v24  ;;  %s4469_s11 = sld [smem:[#allocation32_spill]]  ;;  %vm2734_vm8 = vcmask 523264   ;;  %s4471_s23 = sld [smem:[#allocation31_spill]] }
 0x226   : > { %v1465_v34 = vld [vmem:[%s4466_s21] sm:$0xff]  ;;  %v1466_v41 = vld [vmem:[%s4466_s21 + $0x8] sm:$0xff]  ;;  %v1467_v2 = vld [vmem:[%s4466_s21 + $0x10] sm:$0xff]  ;;  %3281 = vmatprep.subr.bf16.mxu0 %v3702_v3  ;;  %v1597_v32 = vunpack.c.0.s8 %v1596_v27  ;;  %s3052_s22 = sshll.u32 %s3677_s0, 1  ;;  %s4472_s25 = sld [smem:[#allocation23_spill]] }
 0x227   : > { %v3264_v4 = vpack.c.bf16 %v1466_v41, %v1465_v34  ;;  %v1468_v5 = vld [vmem:[%s4466_s21 + $0x18] sm:$0xff]  ;;  %v4195_v33 = vsub.s32 %v1565_v29, %v1567_v23  ;;  %s2851_s17 = sadd.s32 %s3673_s30, %s3052_s22  ;;  %s4473_s27 = sld [smem:[#allocation33_spill]] }
 0x228   : > { %v3267_v7 = vpack.c.bf16 %v1468_v5, %v1467_v2  ;;  %v4197_v40 = vsub.s32 %v1597_v32, %v1567_v23  ;;  %v3278_v2 = vpack.c.bf16 %v1702_v63, %v1701_v60  ;;  %s4475_s0 = sld [smem:[#allocation35_spill]]  ;;  %s4477_s30 = sand.u32 1, %s3665_s28  }
 0x229   : > { %3265 = vmatpush3.bf16.msra.mxu1 %v3264_v4  ;;  %v3282_v4 = vpack.c.bf16 %v1704_v1, %v1703_v0  ;;  %s2840_s22 = scalar_lea.sflag [#allocation6], %s4477_s30 }
 0x22a   : > { %3266 = vmatprep.subr.bf16.mxu1 %v3702_v3 }
 0x22c   : > { %p4478_p1 = scmp.ne.s32.totalorder %s4472_s25, 0 }
 0x22d   : > { %3268 = vmatpush3.bf16.msra.mxu1 %v3267_v7 }
 0x22e   : > { %3269 = vmatprep.subr.bf16.mxu1 %v3702_v3 }
 0x230   : > { %3148 = vmatmul.mubr.msk.f32.vlgmr.msra.gmra.mrb[0].mxu1 %vm1476_vm3, %v4173_v8 }
 0x231   : > { %3154 = vmatprep.mubr.msk.f32.mxu1 %vm3703_vm2, %v3704_v6 }
 0x236   : > { %3272 = vmatpush3.bf16.xpose.msk.msra.mxu1 %vm4185_vm5, %v3270_v17 }
 0x237   : > { %3277 = vmatprep.subr.bf16.mxu1 %v3702_v3 }
 0x303   : > { %v1546_v10 = vpop.f32.mrb[0].mxu1 }
 0x304   : > { %v1547_v11 = vadd.f32 %v3019_v9, %v1546_v10  ;;  %v3149_v12 = vpop.f32.mrb[1].mxu1 }
 0x306   : > { %v1550_v13 = vmul.f32 0.35355338, %v1547_v11 }
 0x308   : > { %1558 = vrot.lane.b32.xlu1 %v1550_v13, %s3705_s20  ;;  %1552 = vrot.lane.b32.xlu0 %v1550_v13, %s3706_s13  ;;  %s4474_s13 = sld [smem:[#allocation34_spill]] }
 0x30c   : > { %1555 = vrot.lane.b32.xlu0 %v1550_v13, %s3707_s15  ;;  %s3053_s15 = sshll.u32 %s2851_s17, 7 }
 0x30d   : > { %s4342_s18 = scalar_lea.hbm %s4475_s0, %s3053_s15 }
 0x37a   : > { %v1559_v30 = vpop.permute.xlu1 %1558  ;;  %v1553_v31 = vpop.permute.xlu0 %1552 }
 0x37b   : > { %v1577_v35 = vcombine.low %v1553_v31, %v1559_v30  ;;  %v1578_v36 = vcombine.high %v1553_v31, %v1559_v30 }
 0x37d   : > { %v1585_v42 = vrot.slane %v1577_v35, %v4195_v33  ;;  %v1592_v28 = vrot.slane %v1578_v36, %v4195_v33 }
 0x37e   : > { %v1556_v37 = vpop.permute.xlu0 %1555 }
 0x37f   : > { %v1561_v38 = vcombine.low %v1550_v13, %v1556_v37  ;;  %v1562_v39 = vcombine.high %v1550_v13, %v1556_v37 }
 0x381   : > { %v1569_v43 = vrot.slane %v1561_v38, %v4195_v33  ;;  %v1576_v44 = vrot.slane %v1562_v39, %v4195_v33 }
 0x383   : > { %v1593_v45 = vcombine.low %v1569_v43, %v1585_v42  ;;  %v1594_v21 = vcombine.high %v1569_v43, %v1585_v42  ;;  %v1609_v47 = vcombine.low %v1576_v44, %v1592_v28  ;;  %v1610_v48 = vcombine.high %v1576_v44, %v1592_v28 }
 0x385   : > { %v1601_v49 = vrot.slane %v1593_v45, %v4197_v40  ;;  %v1608_v50 = vrot.slane %v1594_v21, %v4197_v40  ;;  %v1617_v51 = vrot.slane %v1609_v47, %v4197_v40  ;;  %v1624_v52 = vrot.slane %v1610_v48, %v4197_v40 }
 0x387   : > { %v1629_v53 = vcombine.low %v1601_v49, %v1608_v50  ;;  %v3021_v46 = vcombine.high %v1601_v49, %v1608_v50  ;;  %v1645_v54 = vcombine.low %v1617_v51, %v1624_v52  ;;  %v3022_v55 = vcombine.high %v1617_v51, %v1624_v52  ;;  %v2067_v52 = vld [vmem:[#allocation3] sm:$0xff] }
 0x389   : > { %v1636_v56 = vrot.slane %v1629_v53, %v4195_v33  ;;  %v1644_v57 = vrot.slane %v3021_v46, %v4195_v33  ;;  %v1652_v58 = vrot.slane %v1645_v54, %v4195_v33  ;;  %v1660_v59 = vrot.slane %v3022_v55, %v4195_v33  ;;  %v2068_v53 = vld [vmem:[#allocation3 + $0x8] sm:$0xff]  ;;  %v2071_v54 = vld [vmem:[#allocation3 + $0x20] sm:$0xff] }
 0x38a   : > { %v3286_v46 = vpack.c.bf16 %v2068_v53, %v2067_v52  ;;  %v2072_v55 = vld [vmem:[#allocation3 + $0x28] sm:$0xff] }
 0x38b   : > { %v1661_v61 = vcombine.low %v1636_v56, %v1644_v57  ;;  %v1677_v62 = vcombine.low %v1652_v58, %v1660_v59  ;;  %v1662_v5 = vcombine.high %v1636_v56, %v1644_v57  ;;  %v1678_v7 = vcombine.high %v1652_v58, %v1660_v59 }
 0x38c   : > { %v3292_v56 = vpack.c.bf16 %v2072_v55, %v2071_v54 }
 0x38d   : > { %v1669_v34 = vrot.slane %v1661_v61, %v4197_v40  ;;  %v1685_v41 = vrot.slane %v1677_v62, %v4197_v40  ;;  %v1676_v11 = vrot.slane %v1662_v5, %v4197_v40  ;;  %v1692_v12 = vrot.slane %v1678_v7, %v4197_v40  ;;  %v2069_v61 = vld [vmem:[#allocation3 + $0x10] sm:$0xff]  ;;  %v2070_v62 = vld [vmem:[#allocation3 + $0x18] sm:$0xff] }
 0x38e   : > { %v3289_v0 = vpack.c.bf16 %v2070_v62, %v2069_v61 }
 0x38f   : > { %v1693_v9 = vcombine.low %v1669_v34, %v1685_v41  ;;  %v1694_v10 = vcombine.high %v1669_v34, %v1685_v41  ;;  %v1695_v13 = vcombine.low %v1676_v11, %v1692_v12  ;;  %v1696_v14 = vcombine.high %v1676_v11, %v1692_v12  ;;  %v2073_v34 = vld [vmem:[#allocation3 + $0x30] sm:$0xff]  ;;  %v2074_v41 = vld [vmem:[#allocation3 + $0x38] sm:$0xff]  ;;  %v2519_v12 = vld [vmem:[#allocation9] sm:$0xff] }
 0x391   : > { %3155 = vmatmul.mubr.msk.f32.vlgmr.msra.gmra.mrb[2].mxu1 %vm1705_vm4, %v1693_v9  ;;  %3162 = vmatmul.mubr.msk.f32.vlgmr.msra.gmra.mrb[0].mxu0 %vm1705_vm4, %v1694_v10 }
 0x392   : > { %3280 = vmatpush3.bf16.xpose.msk.msra.mxu1 %vm4185_vm5, %v3278_v2  ;;  %3284 = vmatpush3.bf16.xpose.msk.msra.mxu0 %vm4185_vm5, %v3282_v4  ;;  %v3295_v4 = vpack.c.bf16 %v2074_v41, %v2073_v34 }
 0x393   : > { %3168 = vmatprep.mubr.msk.f32.mxu1 %vm3703_vm2, %v3704_v6  ;;  %3175 = vmatprep.mubr.msk.f32.mxu0 %vm3703_vm2, %v3704_v6 }
 0x394   : > { %3285 = vmatprep.subr.bf16.mxu1 %v3702_v3  ;;  %3291 = vmatprep.subr.bf16.mxu0 %v3702_v3 }
 0x399   : > { %3169 = vmatmul.mubr.msk.f32.vlgmr.msra.gmra.mrb[4].mxu1 %vm1705_vm4, %v1695_v13  ;;  %3176 = vmatmul.mubr.msk.f32.vlgmr.msra.gmra.mrb[2].mxu0 %vm1705_vm4, %v1696_v14  ;;  %v2520_v13 = vld [vmem:[#allocation9 + $0x8] sm:$0xff] }
 0x39a   : > { %3182 = vmatprep.mubr.msk.f32.mxu1 %vm3703_vm2, %v3704_v6  ;;  %3196 = vmatprep.mubr.msk.f32.mxu0 %vm3703_vm2, %v3704_v6  ;;  %v3298_v14 = vpack.c.bf16 %v2520_v13, %v2519_v12 }
 0x39b   : > { %3287 = vmatpush3.bf16.msra.mxu1 %v3286_v46  ;;  %3293 = vmatpush3.bf16.msra.mxu0 %v3292_v56 }
 0x39c   : > { %3288 = vmatprep.subr.bf16.mxu1 %v3702_v3  ;;  %3297 = vmatprep.subr.bf16.mxu0 %v3702_v3 }
 0x464   : > { %v1781_v15 = vpop.f32.mrb[2].mxu1  ;;  %v1860_v16 = vpop.f32.mrb[0].mxu0 }
 0x465   : > { %v3156_v17 = vpop.f32.mrb[3].mxu1  ;;  %v3163_v18 = vpop.f32.mrb[1].mxu0  ;;  %v2026_v19 = vsel %vm2022_vm6, %v1860_v16, -inf  ;;  %v2023_v20 = vsel %vm2022_vm6, %v1781_v15, -inf }
 0x466   : > { %2027 = vmax.xlane.f32.xlu0 %v2026_v19  ;;  %2024 = vmax.xlane.f32.xlu1 %v2023_v20 }
 0x46c   : > { %v1939_v22 = vpop.f32.mrb[4].mxu1  ;;  %v2018_v24 = vpop.f32.mrb[2].mxu0 }
 0x46d   : > { %v3170_v25 = vpop.f32.mrb[5].mxu1  ;;  %v3177_v26 = vpop.f32.mrb[3].mxu0  ;;  %v2032_v27 = vsel %vm2022_vm6, %v2018_v24, -inf  ;;  %v2029_v29 = vsel %vm2022_vm6, %v1939_v22, -inf }
 0x46e   : > { %2033 = vmax.xlane.f32.xlu1 %v2032_v27  ;;  %2030 = vmax.xlane.f32.xlu0 %v2029_v29 }
 0x4f3   : > { %v2028_v23 = vpop.xlane.xlu0 %2027  ;;  %v2025_v30 = vpop.xlane.xlu1 %2024 }
 0x4f4   : > { %v2036_v31 = vsub.f32 %v1860_v16, %v2028_v23  ;;  %v2035_v32 = vsub.f32 %v1781_v15, %v2025_v30 }
 0x4f6   : > { %v2041_v35 = vmul.f32 1.442695, %v2036_v31  ;;  %v2039_v36 = vmul.f32 1.442695, %v2035_v32 }
 0x4f8   : > { %3451 = vpow2.f32 %v2041_v35 }
 0x4f9   : > { %3453 = vpow2.f32 %v2039_v36 }
 0x4fb   : > { %v2034_v37 = vpop.xlane.xlu1 %2033  ;;  %v2031_v38 = vpop.xlane.xlu0 %2030 }
 0x4fc   : > { %v2038_v39 = vsub.f32 %v2018_v24, %v2034_v37  ;;  %v2037_v42 = vsub.f32 %v1939_v22, %v2031_v38 }
 0x4fe   : > { %v2045_v28 = vmul.f32 1.442695, %v2038_v39  ;;  %v2043_v43 = vmul.f32 1.442695, %v2037_v42  ;;  %v2521_v39 = vld [vmem:[#allocation9 + $0x10] sm:$0xff]  ;;  %v2522_v42 = vld [vmem:[#allocation9 + $0x18] sm:$0xff] }
 0x500   : > { %3455 = vpow2.f32 %v2045_v28 }
 0x501   : > { %3457 = vpow2.f32 %v2043_v43 }
 0x502   : > { %v3452_v44 = vpop.eup %3451 }
 0x503   : > { %v3454_v45 = vpop.eup %3453  ;;  %v2050_v21 = vsel %vm2022_vm6, %v3452_v44, 0.0 }
 0x504   : > { %2051 = vadd.xlane.f32.xlu1 %v2050_v21  ;;  %v2047_v47 = vsel %vm2022_vm6, %v3454_v45, 0.0  ;;  %v3301_v21 = vpack.c.bf16 %v2522_v42, %v2521_v39  ;;  %v3043_v39 = vld [vmem:[%s4414_s14] ss:$0 sm:$0xff] }
 0x505   : > { %2048 = vadd.xlane.f32.xlu0 %v2047_v47 }
 0x50a   : > { %v3456_v48 = vpop.eup %3455 }
 0x50b   : > { %v3458_v49 = vpop.eup %3457  ;;  %v2056_v50 = vsel %vm2022_vm6, %v3456_v48, 0.0 }
 0x50c   : > { %2057 = vadd.xlane.f32.xlu1 %v2056_v50  ;;  %v2053_v51 = vsel %vm2022_vm6, %v3458_v49, 0.0 }
 0x50d   : > { %2054 = vadd.xlane.f32.xlu0 %v2053_v51 }
 0x591   : > { %v2052_v57 = vpop.xlane.xlu1 %2051 }
 0x592   : > { %v2049_v58 = vpop.xlane.xlu0 %2048 }
 0x593   : > { %3459 = vrcp.f32 %v2049_v58 }
 0x594   : > { %3461 = vrcp.f32 %v2052_v57 }
 0x599   : > { %v2058_v59 = vpop.xlane.xlu1 %2057 }
 0x59a   : > { %3463 = vrcp.f32 %v2058_v59  ;;  %v2055_v60 = vpop.xlane.xlu0 %2054 }
 0x59b   : > { %3465 = vrcp.f32 %v2055_v60 }
 0x59d   : > { %v3460_v63 = vpop.eup %3459 }
 0x59e   : > { %v2060_v1 = vmul.f32 %v3460_v63, %v3454_v45  ;;  %v3462_v2 = vpop.eup %3461 }
 0x59f   : > { %v2062_v5 = vmul.f32 %v3462_v2, %v3452_v44 }
 0x5a0   : > { %3183 = vmatmul.mubr.msk.f32.vlgmr.msra.gmra.mrb[6].mxu1 %vm2022_vm6, %v2060_v1 }
 0x5a1   : > { %3290 = vmatpush3.bf16.msra.mxu1 %v3289_v0  ;;  %3189 = vmatprep.mubr.msk.f32.mxu1 %vm3703_vm2, %v3704_v6 }
 0x5a2   : > { %3294 = vmatprep.subr.bf16.mxu1 %v3702_v3 }
 0x5a4   : > { %v3464_v7 = vpop.eup %3463  ;;  %3190 = vmatmul.mubr.msk.f32.vlgmr.msra.gmra.mrb[8].mxu1 %vm2022_vm6, %v2062_v5 }
 0x5a5   : > { %v3466_v9 = vpop.eup %3465  ;;  %v2066_v10 = vmul.f32 %v3464_v7, %v3456_v48  ;;  %3296 = vmatpush3.bf16.msra.mxu1 %v3295_v4  ;;  %3203 = vmatprep.mubr.msk.f32.mxu1 %vm3703_vm2, %v3704_v6 }
 0x5a6   : > { %v2064_v11 = vmul.f32 %v3466_v9, %v3458_v49  ;;  %3303 = vmatprep.subr.bf16.mxu1 %v3702_v3 }
 0x5a8   : > { %3197 = vmatmul.mubr.msk.f32.vlgmr.msra.gmra.mrb[4].mxu0 %vm2022_vm6, %v2064_v11  ;;  %3204 = vmatmul.mubr.msk.f32.vlgmr.msra.gmra.mrb[10].mxu1 %vm2022_vm6, %v2066_v10 }
 0x5a9   : > { %3214 = vmatprep.mubr.msk.f32.mxu0 %vm3703_vm2, %v3704_v6  ;;  %3225 = vmatprep.mubr.msk.f32.mxu1 %vm3703_vm2, %v3704_v6 }
 0x5aa   : > { %3299 = vmatpush3.bf16.msra.mxu0 %v3298_v14 }
 0x5ab   : > { %3300 = vmatprep.subr.bf16.mxu0 %v3702_v3 }
 0x5ae   : > { %3302 = vmatpush3.bf16.msra.mxu0 %v3301_v21 }
 0x5af   : > { %3309 = vmatprep.subr.bf16.mxu0 %v3702_v3 }
 0x673   : > { %v2144_v15 = vpop.f32.mrb[6].mxu1 }
 0x674   : > { %v3184_v16 = vpop.f32.mrb[7].mxu1 }
 0x677   : > { %v2217_v17 = vpop.f32.mrb[8].mxu1 }
 0x678   : > { %v3191_v18 = vpop.f32.mrb[9].mxu1 }
 0x679   : > { %v2635_v18 = vld [vmem:[#allocation10 + $0x8] sm:$0xff] }
 0x67b   : > { %v2290_v19 = vpop.f32.mrb[4].mxu0  ;;  %v2363_v20 = vpop.f32.mrb[10].mxu1 }
 0x67c   : > { %v2367_v22 = vcombine.low %v2144_v15, %v2290_v19  ;;  %v2368_v24 = vcombine.high %v2144_v15, %v2290_v19  ;;  %v3198_v25 = vpop.f32.mrb[5].mxu0  ;;  %v2383_v26 = vcombine.low %v2217_v17, %v2363_v20  ;;  %v2384_v27 = vcombine.high %v2217_v17, %v2363_v20  ;;  %v3205_v29 = vpop.f32.mrb[11].mxu1  ;;  %v2636_v20 = vld [vmem:[#allocation10 + $0x10] sm:$0xff] }
 0x67d   : > { %v2720_v25 = vld [vmem:[%s4412_s12 + $0x8] sm:$0xff]  ;;  %v2722_v29 = vld [vmem:[%s4412_s12 + $0x18] sm:$0xff] }
 0x67e   : > { %v2375_v23 = vrot.slane %v2367_v22, %v4195_v33  ;;  %v2382_v30 = vrot.slane %v2368_v24, %v4195_v33  ;;  %v2391_v31 = vrot.slane %v2383_v26, %v4195_v33  ;;  %v2398_v32 = vrot.slane %v2384_v27, %v4195_v33  ;;  %v2637_v22 = vld [vmem:[#allocation10 + $0x18] sm:$0xff]  ;;  %v2721_v26 = vld [vmem:[%s4412_s12 + $0x10] sm:$0xff] }
 0x67f   : > { %v3307_v24 = vpack.c.bf16 %v2637_v22, %v2636_v20 }
 0x680   : > { %v2399_v35 = vcombine.low %v2375_v23, %v2391_v31  ;;  %v2400_v36 = vcombine.high %v2375_v23, %v2391_v31  ;;  %v2415_v37 = vcombine.low %v2382_v30, %v2398_v32  ;;  %v2416_v38 = vcombine.high %v2382_v30, %v2398_v32  ;;  %v2723_v30 = vld [vmem:[%s4412_s12 + $0x20] sm:$0xff]  ;;  %v2724_v31 = vld [vmem:[%s4412_s12 + $0x28] sm:$0xff] }
 0x681   : > { %v3313_v23 = vpack.c.bf16 %v2722_v29, %v2721_v26  ;;  %v3316_v32 = vpack.c.bf16 %v2724_v31, %v2723_v30 }
 0x682   : > { %v2407_v28 = vrot.slane %v2399_v35, %v4197_v40  ;;  %v2414_v43 = vrot.slane %v2400_v36, %v4197_v40  ;;  %v2423_v44 = vrot.slane %v2415_v37, %v4197_v40  ;;  %v2430_v45 = vrot.slane %v2416_v38, %v4197_v40 }
 0x684   : > { %v2435_v47 = vcombine.low %v2407_v28, %v2414_v43  ;;  %v3039_v48 = vcombine.high %v2407_v28, %v2414_v43  ;;  %v2451_v49 = vcombine.low %v2423_v44, %v2430_v45  ;;  %v3040_v50 = vcombine.high %v2423_v44, %v2430_v45  ;;  %v3044_v28 = vld [vmem:[%s4469_s11] ss:$0 sm:$0xff]  ;;  %v2726_v45 = vld [vmem:[%s4412_s12 + $0x38] sm:$0xff]  ;;  %s3713_s11 = smov [#allocation12]  }
 0x685   : > { %s3587_s24 = sshll.u32 %s3713_s11, 4  ;;  %s3588_s24 = int_to_ptr.vmem [resolvable:$false] %s3587_s24 }
 0x686   : > { %v2442_v51 = vrot.slane %v2435_v47, %v4195_v33  ;;  %v2450_v52 = vrot.slane %v3039_v48, %v4195_v33  ;;  %v2458_v53 = vrot.slane %v2451_v49, %v4195_v33  ;;  %v2466_v46 = vrot.slane %v3040_v50, %v4195_v33 }
 0x688   : > { %v2468_v54 = vcombine.high %v2442_v51, %v2450_v52  ;;  %v2484_v55 = vcombine.high %v2458_v53, %v2466_v46  ;;  %v2467_v56 = vcombine.low %v2442_v51, %v2450_v52  ;;  %v2483_v57 = vcombine.low %v2458_v53, %v2466_v46  ;;  %v3047_v52 = vld [vmem:[%s4471_s23] ss:$0 sm:$0xff]  ;;  %s4476_s23 = smov %s4475_s0 }
 0x68a   : > { %v2482_v58 = vrot.slane %v2468_v54, %v4197_v40  ;;  %v2498_v59 = vrot.slane %v2484_v55, %v4197_v40  ;;  %v2475_v60 = vrot.slane %v2467_v56, %v4197_v40  ;;  %v2491_v61 = vrot.slane %v2483_v57, %v4197_v40  ;;  %v3041_v40 = vld [vmem:[%s4409_s9] ss:$0 sm:$0xff] }
 0x68c   : > { %v2501_v62 = vcombine.low %v2482_v58, %v2498_v59  ;;  %v2500_v63 = vcombine.high %v2475_v60, %v2491_v61  ;;  %v2502_v0 = vcombine.high %v2482_v58, %v2498_v59  ;;  %v2499_v1 = vcombine.low %v2475_v60, %v2491_v61 }
 0x68e   : > { %2508 = vrot.lane.b32.xlu1 %v2501_v62, %s3710_s19  ;;  %2504 = vrot.lane.b32.xlu0 %v2500_v63, %s3711_s26  ;;  %s4470_s19 = sld [smem:[#allocation30_spill]] }
 0x692   : > { %2512 = vrot.lane.b32.xlu1 %v2502_v0, %s3712_s16 }
 0x694   : > { %v3045_v47 = vld [vmem:[%s4470_s19] ss:$0 sm:$0xff]  ;;  %s2855_s19 = sshll.u32 %s664_s29, 4  ;;  %s4344_s19 = int_to_ptr.vmem [resolvable:$true] %s2855_s19 }
 0x695   : > { %s3583_s17 = scalar_lea.vmem %s4344_s19, 128  ;;  %p3590_p6 = scmp.lt.s32.totalorder %s4344_s19, %s3588_s24 }
 0x696   : > { %p3584_p12 = scmp.ne.s32.totalorder %s4344_s19, %s3583_s17 }
 0x698   : > { %p3585_p4 = pnand %p3584_p12, %p4478_p1 }
 0x69a   : > { %p3586_p5 = pneg %p3585_p4 }
 0x700   : > { %v2509_v33 = vpop.permute.xlu1 %2508  ;;  %v2505_v34 = vpop.permute.xlu0 %2504 }
 0x701   : > { %v2515_v41 = vsel %vm1705_vm4, %v2499_v1, %v2505_v34 }
 0x702   : > { %v2516_v4 = vsel %vm2022_vm6, %v2515_v41, %v2509_v33  ;;  %v3049_v33 = vld [vmem:[%s4473_s27] ss:$0 sm:$0xff]  ;;  %s3589_s27 = scalar_lea.vmem %s3588_s24, 256 }
 0x703   : > { %v3050_v41 = vld [vmem:[%s4474_s13] ss:$0 sm:$0xff]  ;;  %p3591_p7 = scmp.lt.s32.totalorder %s3589_s27, %s3583_s17 }
 0x704   : > { %v2513_v2 = vpop.permute.xlu1 %2512 }
 0x705   : > { %v2518_v5 = vsel %vm2517_vm7, %v2516_v4, %v2513_v2  ;;  %p3592_p9 = por %p3591_p7, %p3590_p6 }
 0x706   : > { %3215 = vmatmul.mubr.msk.f32.vlgmr.msra.gmra.mrb[6].mxu0 %vm1476_vm3, %v2518_v5 }
 0x707   : > { %3244 = vmatprep.mubr.msk.f32.mxu0 %vm3703_vm2, %v3704_v6  ;;  %v2634_v6 = vld [vmem:[#allocation10] sm:$0xff]  ;;  %p3593_p11 = pnand %p3592_p9, %p3586_p5 }
 0x708   : > { %v3304_v19 = vpack.c.bf16 %v2635_v18, %v2634_v6 }
 0x70a   : > { %3305 = vmatpush3.bf16.msra.mxu1 %v3304_v19 }
 0x70b   : > { %3306 = vmatprep.subr.bf16.mxu1 %v3702_v3 }
 0x70e   : > { %3308 = vmatpush3.bf16.msra.mxu1 %v3307_v24 }
 0x7d9   : > { %v2599_v7 = vpop.f32.mrb[6].mxu0 }
 0x7da   : > { %v2600_v9 = vadd.f32 %v3041_v40, %v2599_v7  ;;  %v3216_v10 = vpop.f32.mrb[7].mxu0 }
 0x7dc   : > { %v2603_v11 = vadd.f32 %v2600_v9, %v4173_v8  ;;  %v2719_v8 = vld [vmem:[%s4412_s12] sm:$0xff] }
 0x7dd   : > { %v3310_v27 = vpack.c.bf16 %v2720_v25, %v2719_v8 }
 0x7de   : > { %v2604_v12 = vsel %vm1476_vm3, %v2603_v11, 0.0 }
 0x7df   : > { %2605 = vadd.xlane.f32.xlu0 %v2604_v12  ;;  %3311 = vmatpush3.bf16.msra.mxu0 %v3310_v27 }
 0x7e0   : > { %3312 = vmatprep.subr.bf16.mxu0 %v3702_v3 }
 0x7e3   : > { %3314 = vmatpush3.bf16.msra.mxu0 %v3313_v23 }
 0x7e4   : > { %3315 = vmatprep.subr.bf16.mxu0 %v3702_v3 }
 0x7e7   : > { %3317 = vmatpush3.bf16.msra.mxu0 %v3316_v32 }
 0x7e8   : > { %3318 = vmatprep.subr.bf16.mxu0 %v3702_v3  ;;  %v2725_v3 = vld [vmem:[%s4412_s12 + $0x30] sm:$0xff] }
 0x7e9   : > { %v3319_v21 = vpack.c.bf16 %v2726_v45, %v2725_v3 }
 0x7eb   : > { %3320 = vmatpush3.bf16.msra.mxu0 %v3319_v21 }
 0x86c   : > { %v2606_v13 = vpop.xlane.xlu0 %2605 }
 0x86d   : > { %v2608_v14 = vmul.f32 0.03125, %v2606_v13 }
 0x86f   : > { %v2609_v15 = vsub.f32 %v2603_v11, %v2608_v14 }
 0x871   : > { %v2610_v16 = vmul.f32 %v2609_v15, %v2609_v15 }
 0x873   : > { %v2611_v17 = vsel %vm1476_vm3, %v2610_v16, 0.0 }
 0x874   : > { %2612 = vadd.xlane.f32.xlu1 %v2611_v17 }
 0x901   : > { %v2613_v35 = vpop.xlane.xlu1 %2612 }
 0x902   : > { %v2614_v36 = vmul.f32 0.03125, %v2613_v35 }
 0x904   : > { %v2615_v37 = vadd.f32 1e-05, %v2614_v36 }
 0x906   : > { %3467 = vrsqrt.f32 %v2615_v37 }
 0x910   : > { %v3468_v38 = vpop.eup %3467 }
 0x911   : > { %v2617_v42 = vmul.f32 %v3468_v38, %v2609_v15 }
 0x913   : > { %v2625_v43 = vmul.f32 %v3043_v39, %v2617_v42 }
 0x915   : > { %v2633_v44 = vadd.f32 %v3044_v28, %v2625_v43 }
 0x917   : > { %3226 = vmatmul.mubr.msk.f32.vlgmr.msra.gmra.mrb[12].mxu1 %vm1476_vm3, %v2633_v44 }
 0x9ea   : > { %v2714_v48 = vpop.f32.mrb[12].mxu1 }
 0x9eb   : > { %v2715_v49 = vadd.f32 %v3045_v47, %v2714_v48  ;;  %v3227_v50 = vpop.f32.mrb[13].mxu1 }
 0x9ed   : > { %v2718_v51 = vmax.f32 %v2715_v49, 0.0 }
 0x9ef   : > { %3245 = vmatmul.mubr.msk.f32.vlgmr.msra.gmra.mrb[8].mxu0 %vm2734_vm8, %v2718_v51 }
 0xac2   : > { %v2804_v53 = vpop.f32.mrb[8].mxu0 }
 0xac3   : > { %v2805_v46 = vadd.f32 %v3047_v52, %v2804_v53  ;;  %v3246_v54 = vpop.f32.mrb[9].mxu0 }
 0xac5   : > { %v2808_v55 = vadd.f32 %v2805_v46, %v2633_v44 }
 0xac7   : > { %v2809_v56 = vsel %vm1476_vm3, %v2808_v55, 0.0 }
 0xac8   : > { %2810 = vadd.xlane.f32.xlu0 %v2809_v56 }
 0xb55   : > { %v2811_v57 = vpop.xlane.xlu0 %2810 }
 0xb56   : > { %v2812_v58 = vmul.f32 0.03125, %v2811_v57 }
 0xb58   : > { %v2813_v59 = vsub.f32 %v2808_v55, %v2812_v58 }
 0xb5a   : > { %v2814_v60 = vmul.f32 %v2813_v59, %v2813_v59 }
 0xb5c   : > { %v2815_v61 = vsel %vm1476_vm3, %v2814_v60, 0.0 }
 0xb5d   : > { %2816 = vadd.xlane.f32.xlu0 %v2815_v61 }
 0xbea   : > { %v2817_v62 = vpop.xlane.xlu0 %2816 }
 0xbeb   : > { %v2818_v63 = vmul.f32 0.03125, %v2817_v62 }
 0xbed   : > { %v2819_v0 = vadd.f32 1e-05, %v2818_v63 }
 0xbef   : > { %3469 = vrsqrt.f32 %v2819_v0 }
 0xbf9   : > { %v3470_v1 = vpop.eup %3469 }
 0xbfa   : > { %v2821_v34 = vmul.f32 %v3470_v1, %v2813_v59 }
 0xbfc   : > { %v2829_v2 = vmul.f32 %v3049_v33, %v2821_v34 }
 0xbfe   : > { %v2837_v4 = vadd.f32 %v3050_v41, %v2829_v2 }
 0xc00   : > { %2838 = vst.msk [vmem:[%s664_s29] sm:$0xff] %vm1476_vm3, %v2837_v4 }
 0xc01   : > { %3596 = shalt.err (!%p3593_p11)
}
 0xc02   : > { %s3597_s2 = scalar_lea.hbm %s4342_s18, 128  ;;  %s3601_s20 = scalar_lea.hbm %s4476_s23, 512 }
 0xc03   : > { %p3598_p13 = scmp.ne.s32.totalorder %s4342_s18, %s3597_s2  ;;  %p3602_p0 = scmp.lt.u32.totalorder %s4342_s18, %s4476_s23 }
 0xc04   : > { %p3603_p8 = scmp.lt.u32.totalorder %s3601_s20, %s3597_s2  ;;  %p3605_p12 = scmp.lt.u32.totalorder %s3597_s2, %s4342_s18 }
 0xc05   : > { %p3599_p3 = pnand %p3598_p13, %p4478_p1 }
 0xc06   : > { %p3604_p10 = por %p3603_p8, %p3602_p0 }
 0xc07   : > { %p3600_p2 = pneg %p3599_p3 }
 0xc08   : > { %p3606_p4 = por %p3605_p12, %p3604_p10 }
 0xc0a   : > { %p3607_p5 = pnand %p3606_p4, %p3600_p2 }
 0xc0c   : > { %3610 = shalt.err (!%p3607_p5)
}
 0xc0d   : > { %3337 = dma.vmem_to_hbm [thread:$0]  (%p4478_p1), %s4344_s19, 128, %s4342_s18, %s2840_s22  }
 0xc0e PF: > { %s4479_s26 = sld [smem:[#allocation21_spill]]  ;;  %s4480_s16 = sld [smem:[#allocation17_spill]] }
 0xc0f   : > { %s4481_s0 = sld [smem:[#allocation25_spill]] }
 0xc14   : > { %p3364_p6 = scmp.ge.s32.totalorder %s4479_s26, 2  ;;  %s2867_s30 = sand.u32 1, %s4480_s16  }
 0xc15   : > { %p4482_p7 = scmp.ne.s32.totalorder %s4481_s0, 0  ;;  %s2868_s17 = scalar_lea.sflag [#allocation6], %s2867_s30 }
 0xc17   : > { %p3353_p9 = pnand %p3364_p6, %p4482_p7 }
 0xc19   : > { %3656 = dma.done.wait (!%p3353_p9), %s2868_s17, 128  }
 0xc1a   : > { %3658 = vsyncadd (!%p3353_p9), %s2868_s17, 4294967168  ;;  %s34_s20 = sadd.s32 1, %s4479_s26   ;;  %s4483_s11 = sld [smem:[#allocation18_spill]] }
 0xc1b   : > { %p31_p11 = scmp.ge.s32.totalorder %s34_s20, 6   ;;  %s4484_s29 = sld [smem:[#allocation26_spill]] }
 0xc1c   : > { %s4485_s30 = sld [smem:[#allocation19_spill]]  ;;  %s4486_s0 = sld [smem:[#allocation20_spill]] }
 0xc1d   : > { %s4487_s19 = sld [smem:[#allocation22_spill]]  ;;  %s4488_s1 = sld [smem:[#allocation24_spill]] }
 0xc1e   : > { %s4489_s27 = smov %s3665_s28  ;;  %33 = sbr.rel (!%p31_p11) target bundleno = 18 (0x12), region = 151 }
 0xc20   : > { %s4490_s28 = smov %s4483_s11 }
 0xc25   :  { %2873 = vsyncpa [#allocation5], 1 }
 0xc26   :  { %2875 = vsyncpa [#allocation5 + $0x1], 1 }
 0xc27   :  { %2876 = vsyncpa [#allocation8], 1 }
 0xc28   :  { %2877 = vsyncpa [#allocation11], 1 }
 0xc29   :  { %2878 = vsyncpa [#allocation6], 1 }
 0xc2a   :  { %2880 = vsyncpa [#allocation6 + $0x1], 1 }

</bundles_post_ra>
